<compile_context>
chip_gen: v7x
topology: tpu7x:2x2x1
jax: 0.10.0
libtpu: 0.0.40
codegen_flags: <defaults>
</compile_context>

<pallas_src>
import functools

import jax
import jax.numpy as jnp
from jax.experimental import pallas as pl
from jax.experimental.pallas import tpu as pltpu


def _round_up(v, m):
    return ((v + m - 1) // m) * m


# -----------------------------------------------------------------------------
# Fused HDCB kernel (one image per grid step, channels-first, all in VMEM)
# -----------------------------------------------------------------------------
def hdcb_kernel(x_ref, dw1_ref, dw2_ref, dw3_ref, masks_ref, alpha_ref,
                pw1_w_ref, pw1_b_ref, pw2_w_ref, pw2_b_ref,
                pw3_w_ref, pw3_b_ref, o_ref, xpad_ref, cat_ref,
                *, H, W, C, dils, hpad):
    HW = H * W

    def dwcd_prelu(x_in, w_ref, alpha, dil, stage):
        # Depthwise Conv2d_cd (CD already folded into the centre tap) + PReLU.
        # Stage input -> centre of the H-padded scratch (lane offset hpad*W,
        # a multiple of 128 when 128 % W == 0 -> aligned unmasked store).
        xpad_ref[:, hpad * W:hpad * W + HW] = x_in
        acc = None
        for kw, dw in enumerate((-dil, 0, dil)):
            grp = None
            for kh, dh in enumerate((-dil, 0, dil)):
                start = (hpad + dh) * W + dw                 # static offset
                tap = xpad_ref[:, start:start + HW]          # per-tap ref slice
                contrib = tap * w_ref[:, kh * 3 + kw:kh * 3 + kw + 1]
                grp = contrib if grp is None else grp + contrib
            if dw != 0:
                # zero lanes whose horizontal read wrapped across an image row
                midx = 2 * stage + (0 if dw < 0 else 1)
                grp = grp * masks_ref[midx:midx + 1, :]
            acc = grp if acc is None else acc + grp
        return jnp.where(acc > 0, acc, alpha * acc)          # PReLU (shared)

    def pw_lrelu(nparts, w_ref, b_ref):
        # 1x1 conv over the virtual channel-concat: one MXU dot against the
        # persistent concat scratch (K = nparts*C), bf16 operands, f32 acc.
        act = cat_ref[0:nparts * C, :]                       # (nparts*C, HW) bf16
        y = jnp.dot(w_ref[...], act, preferred_element_type=jnp.float32)
        y = y + b_ref[...]                                   # (C,1) broadcast
        return jnp.where(y > 0, y, jnp.float32(0.01) * y)    # LeakyReLU(0.01)

    # Zero only the H-padding bands; the centre is fully rewritten each stage.
    # Done every grid step (NOT program_id-gated) so megacore stays correct.
    xpad_ref[:, 0:hpad * W] = jnp.zeros((C, hpad * W), jnp.float32)
    xpad_ref[:, (hpad + H) * W:(2 * hpad + H) * W] = jnp.zeros(
        (C, hpad * W), jnp.float32)

    x = x_ref[0]                                             # (C, H*W) f32
    cat_ref[0:C, :] = x.astype(cat_ref.dtype)

    d1 = dwcd_prelu(x, dw1_ref, alpha_ref[0], dils[0], 0)
    cat_ref[C:2 * C, :] = d1.astype(cat_ref.dtype)
    p1 = pw_lrelu(2, pw1_w_ref, pw1_b_ref)

    d2 = dwcd_prelu(p1, dw2_ref, alpha_ref[1], dils[1], 1)
    cat_ref[2 * C:3 * C, :] = d2.astype(cat_ref.dtype)
    p2 = pw_lrelu(3, pw2_w_ref, pw2_b_ref)

    d3 = dwcd_prelu(p2, dw3_ref, alpha_ref[2], dils[2], 2)
    cat_ref[3 * C:4 * C, :] = d3.astype(cat_ref.dtype)
    out = pw_lrelu(4, pw3_w_ref, pw3_b_ref)

    o_ref[0] = out.astype(o_ref.dtype)                       # lane-dense store


# -----------------------------------------------------------------------------
# Host-side weight prep + wrapper
# -----------------------------------------------------------------------------
def _cd_fold(w33c):
    """(3,3,C) Conv2d_cd weight -> (C,9) with the CD term folded into tap 4."""
    s = jnp.sum(w33c, axis=(0, 1)).astype(jnp.float32)       # (C,)
    w9 = w33c.reshape(9, w33c.shape[-1]).astype(jnp.float32)  # (9, C)
    w9 = w9.at[4].add(-s)                                     # centre -= sum(w)
    return jnp.transpose(w9)                                  # (C, 9)


def _edge_masks(H, W, dils):
    """(2*len(dils), H*W) lane masks killing W-edge wraparound per stage."""
    widx = jnp.arange(H * W, dtype=jnp.int32) % W
    rows = []
    for d in dils:
        rows.append((widx >= d).astype(jnp.float32))          # dw = -d taps
        rows.append((widx < (W - d)).astype(jnp.float32))     # dw = +d taps
    return jnp.stack(rows, axis=0)


def hdcb_forward_nchw(x, params, dilation_rates):
    """x: (N, C, H, W) float32 (PyTorch layout). Returns (N, C, H, W)."""
    N, C, H, W = x.shape
    HW = H * W
    dils = tuple(int(d) for d in dilation_rates)
    assert C % 8 == 0 and HW % 128 == 0, (
        "kernel assumes C % 8 == 0 and H*W % 128 == 0")

    hpad = max(dils) + 1                        # zero rows above/below the image
    if 128 % W == 0:                            # make hpad*W a multiple of 128 ->
        hpad = _round_up(hpad, 128 // W)        # aligned unmasked centre/border

    x2 = x.reshape(N, C, HW)                    # channels-first, lane-dense

    dw1 = _cd_fold(params["dw1_w"])
    dw2 = _cd_fold(params["dw2_w"])
    dw3 = _cd_fold(params["dw3_w"])
    masks = _edge_masks(H, W, dils)
    alphas = jnp.concatenate([params["prelu1"], params["prelu2"],
                              params["prelu3"]]).astype(jnp.float32)    # (3,)
    pw_w = [params["pw1_w"].astype(jnp.bfloat16),   # (C, 2C)
            params["pw2_w"].astype(jnp.bfloat16),   # (C, 3C)
            params["pw3_w"].astype(jnp.bfloat16)]   # (C, 4C)
    pw_b = [params[k].reshape(C, 1).astype(jnp.float32)
            for k in ("pw1_b", "pw2_b", "pw3_b")]

    kern = functools.partial(hdcb_kernel, H=H, W=W, C=C, dils=dils, hpad=hpad)
    y = pl.pallas_call(
        kern,
        out_shape=jax.ShapeDtypeStruct((N, C, HW), x.dtype),
        grid=(N,),
        in_specs=[
            pl.BlockSpec((1, C, HW), lambda n: (n, 0, 0)),        # x
            pl.BlockSpec((C, 9), lambda n: (0, 0)),               # dw1 (CD-folded)
            pl.BlockSpec((C, 9), lambda n: (0, 0)),               # dw2
            pl.BlockSpec((C, 9), lambda n: (0, 0)),               # dw3
            pl.BlockSpec((2 * len(dils), HW), lambda n: (0, 0)),  # W-edge masks
            pl.BlockSpec(memory_space=pltpu.MemorySpace.SMEM),    # prelu slopes
            pl.BlockSpec((C, 2 * C), lambda n: (0, 0)),           # pw1_w (bf16)
            pl.BlockSpec((C, 1), lambda n: (0, 0)),               # pw1_b
            pl.BlockSpec((C, 3 * C), lambda n: (0, 0)),           # pw2_w (bf16)
            pl.BlockSpec((C, 1), lambda n: (0, 0)),               # pw2_b
            pl.BlockSpec((C, 4 * C), lambda n: (0, 0)),           # pw3_w (bf16)
            pl.BlockSpec((C, 1), lambda n: (0, 0)),               # pw3_b
        ],
        out_specs=pl.BlockSpec((1, C, HW), lambda n: (n, 0, 0)),
        scratch_shapes=[
            pltpu.VMEM((C, (H + 2 * hpad) * W), jnp.float32),  # H-padded stage in
            pltpu.VMEM((4 * C, HW), jnp.bfloat16),             # persistent concat
        ],
        compiler_params=pltpu.CompilerParams(
            dimension_semantics=("parallel",)),
    )(x2, dw1, dw2, dw3, masks, alphas,
      pw_w[0], pw_b[0], pw_w[1], pw_b[1], pw_w[2], pw_b[2])
    return y.reshape(N, C, H, W)


def init_params(key, embedding_dim):
    C = embedding_dim
    ks = jax.random.split(key, 9)
    return {
        # depthwise Conv2d_cd weights, stored (3, 3, C)  (PyTorch: (C,1,3,3))
        "dw1_w": 0.1 * jax.random.normal(ks[0], (3, 3, C), jnp.float32),
        "dw2_w": 0.1 * jax.random.normal(ks[1], (3, 3, C), jnp.float32),
        "dw3_w": 0.1 * jax.random.normal(ks[2], (3, 3, C), jnp.float32),
        # PReLU slopes (PyTorch default: num_parameters=1, init=0.25)
        "prelu1": jnp.array([0.25], jnp.float32),
        "prelu2": jnp.array([0.25], jnp.float32),
        "prelu3": jnp.array([0.25], jnp.float32),
        # 1x1 convs, stored (Cout, Cin)  (PyTorch: (Cout,Cin,1,1)) + bias
        "pw1_w": 0.1 * jax.random.normal(ks[3], (C, 2 * C), jnp.float32),
        "pw1_b": 0.01 * jax.random.normal(ks[4], (C,), jnp.float32),
        "pw2_w": 0.1 * jax.random.normal(ks[5], (C, 3 * C), jnp.float32),
        "pw2_b": 0.01 * jax.random.normal(ks[6], (C,), jnp.float32),
        "pw3_w": 0.1 * jax.random.normal(ks[7], (C, 4 * C), jnp.float32),
        "pw3_b": 0.01 * jax.random.normal(ks[8], (C,), jnp.float32),
    }


# -----------------------------------------------------------------------------
# Plain-JAX reference (NCHW) for a correctness smoke check
# -----------------------------------------------------------------------------
def hdcb_reference_nchw(x, params, dils):
    def cd_dw(v, w33c, d):
        N, C, H, W = v.shape
        vp = jnp.pad(v, ((0, 0), (0, 0), (d, d), (d, d)))
        acc = jnp.zeros_like(v)
        for kh in range(3):
            for kw in range(3):
                acc = acc + (vp[:, :, kh * d:kh * d + H, kw * d:kw * d + W]
                             * w33c[kh, kw][None, :, None, None])
        return acc - v * jnp.sum(w33c, axis=(0, 1))[None, :, None, None]

    prelu = lambda v, a: jnp.where(v > 0, v, a * v)
    lrelu = lambda v: jnp.where(v > 0, v, 0.01 * v)

    def pw(v, w, b):
        y = jnp.einsum("nchw,dc->ndhw", v, w,
                       precision=jax.lax.Precision.HIGHEST) + b[None, :, None, None]
        return lrelu(y)

    d1 = prelu(cd_dw(x, params["dw1_w"], dils[0]), params["prelu1"][0])
    p1 = pw(jnp.concatenate([x, d1], 1), params["pw1_w"], params["pw1_b"])
    d2 = prelu(cd_dw(p1, params["dw2_w"], dils[1]), params["prelu2"][0])
    p2 = pw(jnp.concatenate([x, d1, d2], 1), params["pw2_w"], params["pw2_b"])
    d3 = prelu(cd_dw(p2, params["dw3_w"], dils[2]), params["prelu3"][0])
    return pw(jnp.concatenate([x, d1, d2, d3], 1), params["pw3_w"], params["pw3_b"])


if __name__ == "__main__":
    key = jax.random.PRNGKey(0)
    k_x, k_p = jax.random.split(key)

    N, C, H, W = 2, 32, 16, 16          # embedding_dim = 32 (module default)
    dilation_rates = (1, 2, 3)

    x_nchw = jax.random.normal(k_x, (N, C, H, W), jnp.float32)
    params = init_params(k_p, C)

    fwd = jax.jit(functools.partial(hdcb_forward_nchw,
                                    dilation_rates=dilation_rates))
    out = jax.block_until_ready(fwd(x_nchw, params))

    assert out.shape == (N, C, H, W)
    assert bool(jnp.all(jnp.isfinite(out)))

    ref = hdcb_reference_nchw(x_nchw, params, dilation_rates)
    # Kernel uses bf16 MXU operands (f32 accumulate) vs f32/HIGHEST reference,
    # so allow a slightly wider tolerance than pure-f32 parity.
    assert bool(jnp.allclose(out, ref, rtol=3e-2, atol=3e-2)), (
        "max abs diff = %f" % float(jnp.max(jnp.abs(out - ref))))

    print("KERNEL_OK")
</pallas_src>

<mosaic_0001>
module attributes {stable_mosaic.version = 11 : i64} {
  func.func @hdcb_kernel(%arg0: i32, %arg1: memref<1x32x256xf32, #tpu.memory_space<vmem>>, %arg2: memref<32x9xf32, #tpu.memory_space<vmem>>, %arg3: memref<32x9xf32, #tpu.memory_space<vmem>>, %arg4: memref<32x9xf32, #tpu.memory_space<vmem>>, %arg5: memref<6x256xf32, #tpu.memory_space<vmem>>, %arg6: memref<3xf32, #tpu.memory_space<smem>>, %arg7: memref<32x64xbf16, #tpu.memory_space<vmem>>, %arg8: memref<32x1xf32, #tpu.memory_space<vmem>>, %arg9: memref<32x96xbf16, #tpu.memory_space<vmem>>, %arg10: memref<32x1xf32, #tpu.memory_space<vmem>>, %arg11: memref<32x128xbf16, #tpu.memory_space<vmem>>, %arg12: memref<32x1xf32, #tpu.memory_space<vmem>>, %arg13: memref<1x32x256xf32, #tpu.memory_space<vmem>>, %arg14: memref<32x512xf32, #tpu.memory_space<vmem>>, %arg15: memref<128x256xbf16, #tpu.memory_space<vmem>>) attributes {dimension_semantics = [#tpu.dimension_semantics<parallel>], iteration_bounds = array<i64: 2>, scalar_prefetch = 0 : i64, scratch_operands = 2 : i64, tpu.core_type = #tpu.core_type<tc>, window_params = [{transform_indices = @transform_0, window_bounds = array<i64: 1, 32, 256>}, {pipeline_mode = #tpu.pipeline_mode<synchronous>, transform_indices = @transform_1, window_bounds = array<i64: 32, 9>}, {pipeline_mode = #tpu.pipeline_mode<synchronous>, transform_indices = @transform_2, window_bounds = array<i64: 32, 9>}, {pipeline_mode = #tpu.pipeline_mode<synchronous>, transform_indices = @transform_3, window_bounds = array<i64: 32, 9>}, {pipeline_mode = #tpu.pipeline_mode<synchronous>, transform_indices = @transform_4, window_bounds = array<i64: 6, 256>}, {transform_indices = @transform_5, window_bounds = array<i64: 3>}, {pipeline_mode = #tpu.pipeline_mode<synchronous>, transform_indices = @transform_6, window_bounds = array<i64: 32, 64>}, {pipeline_mode = #tpu.pipeline_mode<synchronous>, transform_indices = @transform_7, window_bounds = array<i64: 32, 1>}, {pipeline_mode = #tpu.pipeline_mode<synchronous>, transform_indices = @transform_8, window_bounds = array<i64: 32, 96>}, {pipeline_mode = #tpu.pipeline_mode<synchronous>, transform_indices = @transform_9, window_bounds = array<i64: 32, 1>}, {pipeline_mode = #tpu.pipeline_mode<synchronous>, transform_indices = @transform_10, window_bounds = array<i64: 32, 128>}, {pipeline_mode = #tpu.pipeline_mode<synchronous>, transform_indices = @transform_11, window_bounds = array<i64: 32, 1>}, {transform_indices = @transform_12, window_bounds = array<i64: 1, 32, 256>}]} {
    %cst = arith.constant 0.000000e+00 : f32
    %0 = vector.broadcast %cst : f32 to vector<32x128xf32>
    %c0 = arith.constant 0 : index
    %c0_0 = arith.constant 0 : index
    %1 = vector.load %arg14[%c0, %c0_0] : memref<32x512xf32, #tpu.memory_space<vmem>>, vector<32x128xf32>
    tpu.vector_store %arg14[%c0, %c0_0], %0 {strides = array<i32>} : memref<32x512xf32, #tpu.memory_space<vmem>>, vector<32x128xf32>,
    %cst_1 = arith.constant 0.000000e+00 : f32
    %2 = vector.broadcast %cst_1 : f32 to vector<32x128xf32>
    %c0_2 = arith.constant 0 : index
    %c384 = arith.constant 384 : index
    %3 = vector.load %arg14[%c0_2, %c384] : memref<32x512xf32, #tpu.memory_space<vmem>>, vector<32x128xf32>
    tpu.vector_store %arg14[%c0_2, %c384], %2 {strides = array<i32>} : memref<32x512xf32, #tpu.memory_space<vmem>>, vector<32x128xf32>,
    %c0_3 = arith.constant 0 : index
    %c0_4 = arith.constant 0 : index
    %c0_5 = arith.constant 0 : index
    %4 = vector.load %arg1[%c0_3, %c0_4, %c0_5] : memref<1x32x256xf32, #tpu.memory_space<vmem>>, vector<1x32x256xf32>
    %5 = vector.shape_cast %4 : vector<1x32x256xf32> to vector<32x256xf32>
    %6 = arith.truncf %5 : vector<32x256xf32> to vector<32x256xbf16>
    %c0_6 = arith.constant 0 : index
    %c0_7 = arith.constant 0 : index
    %7 = vector.load %arg15[%c0_6, %c0_7] : memref<128x256xbf16, #tpu.memory_space<vmem>>, vector<32x256xbf16>
    tpu.vector_store %arg15[%c0_6, %c0_7], %6 {strides = array<i32>} : memref<128x256xbf16, #tpu.memory_space<vmem>>, vector<32x256xbf16>,
    %c0_8 = arith.constant 0 : index
    %8 = memref.load %arg6[%c0_8] : memref<3xf32, #tpu.memory_space<smem>>
    %c0_9 = arith.constant 0 : index
    %c128 = arith.constant 128 : index
    %9 = vector.load %arg14[%c0_9, %c128] : memref<32x512xf32, #tpu.memory_space<vmem>>, vector<32x256xf32>
    tpu.vector_store %arg14[%c0_9, %c128], %5 {strides = array<i32>} : memref<32x512xf32, #tpu.memory_space<vmem>>, vector<32x256xf32>,
    %c0_10 = arith.constant 0 : index
    %c111 = arith.constant 111 : index
    %10 = vector.load %arg14[%c0_10, %c111] : memref<32x512xf32, #tpu.memory_space<vmem>>, vector<32x256xf32>
    %c0_11 = arith.constant 0 : index
    %c0_12 = arith.constant 0 : index
    %11 = vector.load %arg2[%c0_11, %c0_12] : memref<32x9xf32, #tpu.memory_space<vmem>>, vector<32x1xf32>
    %12 = vector.broadcast %11 : vector<32x1xf32> to vector<32x256xf32>
    %13 = arith.mulf %10, %12 : vector<32x256xf32>
    %c0_13 = arith.constant 0 : index
    %c127 = arith.constant 127 : index
    %14 = vector.load %arg14[%c0_13, %c127] : memref<32x512xf32, #tpu.memory_space<vmem>>, vector<32x256xf32>
    %c0_14 = arith.constant 0 : index
    %c3 = arith.constant 3 : index
    %15 = vector.load %arg2[%c0_14, %c3] : memref<32x9xf32, #tpu.memory_space<vmem>>, vector<32x1xf32>
    %16 = vector.broadcast %15 : vector<32x1xf32> to vector<32x256xf32>
    %17 = arith.mulf %14, %16 : vector<32x256xf32>
    %18 = arith.addf %13, %17 : vector<32x256xf32>
    %c0_15 = arith.constant 0 : index
    %c143 = arith.constant 143 : index
    %19 = vector.load %arg14[%c0_15, %c143] : memref<32x512xf32, #tpu.memory_space<vmem>>, vector<32x256xf32>
    %c0_16 = arith.constant 0 : index
    %c6 = arith.constant 6 : index
    %20 = vector.load %arg2[%c0_16, %c6] : memref<32x9xf32, #tpu.memory_space<vmem>>, vector<32x1xf32>
    %21 = vector.broadcast %20 : vector<32x1xf32> to vector<32x256xf32>
    %22 = arith.mulf %19, %21 : vector<32x256xf32>
    %23 = arith.addf %18, %22 : vector<32x256xf32>
    %c0_17 = arith.constant 0 : index
    %c0_18 = arith.constant 0 : index
    %24 = vector.load %arg5[%c0_17, %c0_18] : memref<6x256xf32, #tpu.memory_space<vmem>>, vector<1x256xf32>
    %25 = vector.broadcast %24 : vector<1x256xf32> to vector<32x256xf32>
    %26 = arith.mulf %23, %25 : vector<32x256xf32>
    %c0_19 = arith.constant 0 : index
    %c112 = arith.constant 112 : index
    %27 = vector.load %arg14[%c0_19, %c112] : memref<32x512xf32, #tpu.memory_space<vmem>>, vector<32x256xf32>
    %c0_20 = arith.constant 0 : index
    %c1 = arith.constant 1 : index
    %28 = vector.load %arg2[%c0_20, %c1] : memref<32x9xf32, #tpu.memory_space<vmem>>, vector<32x1xf32>
    %29 = vector.broadcast %28 : vector<32x1xf32> to vector<32x256xf32>
    %30 = arith.mulf %27, %29 : vector<32x256xf32>
    %c0_21 = arith.constant 0 : index
    %c128_22 = arith.constant 128 : index
    %31 = vector.load %arg14[%c0_21, %c128_22] : memref<32x512xf32, #tpu.memory_space<vmem>>, vector<32x256xf32>
    %c0_23 = arith.constant 0 : index
    %c4 = arith.constant 4 : index
    %32 = vector.load %arg2[%c0_23, %c4] : memref<32x9xf32, #tpu.memory_space<vmem>>, vector<32x1xf32>
    %33 = vector.broadcast %32 : vector<32x1xf32> to vector<32x256xf32>
    %34 = arith.mulf %31, %33 : vector<32x256xf32>
    %35 = arith.addf %30, %34 : vector<32x256xf32>
    %c0_24 = arith.constant 0 : index
    %c144 = arith.constant 144 : index
    %36 = vector.load %arg14[%c0_24, %c144] : memref<32x512xf32, #tpu.memory_space<vmem>>, vector<32x256xf32>
    %c0_25 = arith.constant 0 : index
    %c7 = arith.constant 7 : index
    %37 = vector.load %arg2[%c0_25, %c7] : memref<32x9xf32, #tpu.memory_space<vmem>>, vector<32x1xf32>
    %38 = vector.broadcast %37 : vector<32x1xf32> to vector<32x256xf32>
    %39 = arith.mulf %36, %38 : vector<32x256xf32>
    %40 = arith.addf %35, %39 : vector<32x256xf32>
    %41 = arith.addf %26, %40 : vector<32x256xf32>
    %c0_26 = arith.constant 0 : index
    %c113 = arith.constant 113 : index
    %42 = vector.load %arg14[%c0_26, %c113] : memref<32x512xf32, #tpu.memory_space<vmem>>, vector<32x256xf32>
    %c0_27 = arith.constant 0 : index
    %c2 = arith.constant 2 : index
    %43 = vector.load %arg2[%c0_27, %c2] : memref<32x9xf32, #tpu.memory_space<vmem>>, vector<32x1xf32>
    %44 = vector.broadcast %43 : vector<32x1xf32> to vector<32x256xf32>
    %45 = arith.mulf %42, %44 : vector<32x256xf32>
    %c0_28 = arith.constant 0 : index
    %c129 = arith.constant 129 : index
    %46 = vector.load %arg14[%c0_28, %c129] : memref<32x512xf32, #tpu.memory_space<vmem>>, vector<32x256xf32>
    %c0_29 = arith.constant 0 : index
    %c5 = arith.constant 5 : index
    %47 = vector.load %arg2[%c0_29, %c5] : memref<32x9xf32, #tpu.memory_space<vmem>>, vector<32x1xf32>
    %48 = vector.broadcast %47 : vector<32x1xf32> to vector<32x256xf32>
    %49 = arith.mulf %46, %48 : vector<32x256xf32>
    %50 = arith.addf %45, %49 : vector<32x256xf32>
    %c0_30 = arith.constant 0 : index
    %c145 = arith.constant 145 : index
    %51 = vector.load %arg14[%c0_30, %c145] : memref<32x512xf32, #tpu.memory_space<vmem>>, vector<32x256xf32>
    %c0_31 = arith.constant 0 : index
    %c8 = arith.constant 8 : index
    %52 = vector.load %arg2[%c0_31, %c8] : memref<32x9xf32, #tpu.memory_space<vmem>>, vector<32x1xf32>
    %53 = vector.broadcast %52 : vector<32x1xf32> to vector<32x256xf32>
    %54 = arith.mulf %51, %53 : vector<32x256xf32>
    %55 = arith.addf %50, %54 : vector<32x256xf32>
    %c1_32 = arith.constant 1 : index
    %c0_33 = arith.constant 0 : index
    %56 = vector.load %arg5[%c1_32, %c0_33] : memref<6x256xf32, #tpu.memory_space<vmem>>, vector<1x256xf32>
    %57 = vector.broadcast %56 : vector<1x256xf32> to vector<32x256xf32>
    %58 = arith.mulf %55, %57 : vector<32x256xf32>
    %59 = arith.addf %41, %58 : vector<32x256xf32>
    %cst_34 = arith.constant 0.000000e+00 : f32
    %60 = vector.broadcast %cst_34 : f32 to vector<32x256xf32>
    %61 = arith.cmpf ogt, %59, %60 : vector<32x256xf32>
    %62 = vector.broadcast %8 : f32 to vector<32x256xf32>
    %63 = arith.mulf %62, %59 : vector<32x256xf32>
    %64 = arith.select %61, %59, %63 : vector<32x256xi1>, vector<32x256xf32>
    %65 = arith.truncf %64 : vector<32x256xf32> to vector<32x256xbf16>
    %c32 = arith.constant 32 : index
    %c0_35 = arith.constant 0 : index
    %66 = vector.load %arg15[%c32, %c0_35] : memref<128x256xbf16, #tpu.memory_space<vmem>>, vector<32x256xbf16>
    tpu.vector_store %arg15[%c32, %c0_35], %65 {strides = array<i32>} : memref<128x256xbf16, #tpu.memory_space<vmem>>, vector<32x256xbf16>,
    %c0_36 = arith.constant 0 : index
    %c0_37 = arith.constant 0 : index
    %67 = vector.load %arg15[%c0_36, %c0_37] : memref<128x256xbf16, #tpu.memory_space<vmem>>, vector<64x256xbf16>
    %c0_38 = arith.constant 0 : index
    %c0_39 = arith.constant 0 : index
    %68 = vector.load %arg7[%c0_38, %c0_39] : memref<32x64xbf16, #tpu.memory_space<vmem>>, vector<32x64xbf16>
    %cst_40 = arith.constant dense<0.000000e+00> : vector<32x256xf32>
    %69 = tpu.matmul %68, %67, %cst_40 {dimension_numbers = #tpu.dot_dimension_numbers<[1], [0], [0], [1], [0, 0, 1, 1], [], []>} : vector<32x64xbf16>, vector<64x256xbf16>, vector<32x256xf32> -> vector<32x256xf32>
    %c0_41 = arith.constant 0 : index
    %c0_42 = arith.constant 0 : index
    %70 = vector.load %arg8[%c0_41, %c0_42] : memref<32x1xf32, #tpu.memory_space<vmem>>, vector<32x1xf32>
    %71 = vector.broadcast %70 : vector<32x1xf32> to vector<32x256xf32>
    %72 = arith.addf %69, %71 : vector<32x256xf32>
    %cst_43 = arith.constant 0.000000e+00 : f32
    %73 = vector.broadcast %cst_43 : f32 to vector<32x256xf32>
    %74 = arith.cmpf ogt, %72, %73 : vector<32x256xf32>
    %cst_44 = arith.constant 0.00999999977 : f32
    %75 = vector.broadcast %cst_44 : f32 to vector<32x256xf32>
    %76 = arith.mulf %75, %72 : vector<32x256xf32>
    %77 = arith.select %74, %72, %76 : vector<32x256xi1>, vector<32x256xf32>
    %c1_45 = arith.constant 1 : index
    %78 = memref.load %arg6[%c1_45] : memref<3xf32, #tpu.memory_space<smem>>
    %c0_46 = arith.constant 0 : index
    %c128_47 = arith.constant 128 : index
    %79 = vector.load %arg14[%c0_46, %c128_47] : memref<32x512xf32, #tpu.memory_space<vmem>>, vector<32x256xf32>
    tpu.vector_store %arg14[%c0_46, %c128_47], %77 {strides = array<i32>} : memref<32x512xf32, #tpu.memory_space<vmem>>, vector<32x256xf32>,
    %c0_48 = arith.constant 0 : index
    %c94 = arith.constant 94 : index
    %80 = vector.load %arg14[%c0_48, %c94] : memref<32x512xf32, #tpu.memory_space<vmem>>, vector<32x256xf32>
    %c0_49 = arith.constant 0 : index
    %c0_50 = arith.constant 0 : index
    %81 = vector.load %arg3[%c0_49, %c0_50] : memref<32x9xf32, #tpu.memory_space<vmem>>, vector<32x1xf32>
    %82 = vector.broadcast %81 : vector<32x1xf32> to vector<32x256xf32>
    %83 = arith.mulf %80, %82 : vector<32x256xf32>
    %c0_51 = arith.constant 0 : index
    %c126 = arith.constant 126 : index
    %84 = vector.load %arg14[%c0_51, %c126] : memref<32x512xf32, #tpu.memory_space<vmem>>, vector<32x256xf32>
    %c0_52 = arith.constant 0 : index
    %c3_53 = arith.constant 3 : index
    %85 = vector.load %arg3[%c0_52, %c3_53] : memref<32x9xf32, #tpu.memory_space<vmem>>, vector<32x1xf32>
    %86 = vector.broadcast %85 : vector<32x1xf32> to vector<32x256xf32>
    %87 = arith.mulf %84, %86 : vector<32x256xf32>
    %88 = arith.addf %83, %87 : vector<32x256xf32>
    %c0_54 = arith.constant 0 : index
    %c158 = arith.constant 158 : index
    %89 = vector.load %arg14[%c0_54, %c158] : memref<32x512xf32, #tpu.memory_space<vmem>>, vector<32x256xf32>
    %c0_55 = arith.constant 0 : index
    %c6_56 = arith.constant 6 : index
    %90 = vector.load %arg3[%c0_55, %c6_56] : memref<32x9xf32, #tpu.memory_space<vmem>>, vector<32x1xf32>
    %91 = vector.broadcast %90 : vector<32x1xf32> to vector<32x256xf32>
    %92 = arith.mulf %89, %91 : vector<32x256xf32>
    %93 = arith.addf %88, %92 : vector<32x256xf32>
    %c2_57 = arith.constant 2 : index
    %c0_58 = arith.constant 0 : index
    %94 = vector.load %arg5[%c2_57, %c0_58] : memref<6x256xf32, #tpu.memory_space<vmem>>, vector<1x256xf32>
    %95 = vector.broadcast %94 : vector<1x256xf32> to vector<32x256xf32>
    %96 = arith.mulf %93, %95 : vector<32x256xf32>
    %c0_59 = arith.constant 0 : index
    %c96 = arith.constant 96 : index
    %97 = vector.load %arg14[%c0_59, %c96] : memref<32x512xf32, #tpu.memory_space<vmem>>, vector<32x256xf32>
    %c0_60 = arith.constant 0 : index
    %c1_61 = arith.constant 1 : index
    %98 = vector.load %arg3[%c0_60, %c1_61] : memref<32x9xf32, #tpu.memory_space<vmem>>, vector<32x1xf32>
    %99 = vector.broadcast %98 : vector<32x1xf32> to vector<32x256xf32>
    %100 = arith.mulf %97, %99 : vector<32x256xf32>
    %c0_62 = arith.constant 0 : index
    %c128_63 = arith.constant 128 : index
    %101 = vector.load %arg14[%c0_62, %c128_63] : memref<32x512xf32, #tpu.memory_space<vmem>>, vector<32x256xf32>
    %c0_64 = arith.constant 0 : index
    %c4_65 = arith.constant 4 : index
    %102 = vector.load %arg3[%c0_64, %c4_65] : memref<32x9xf32, #tpu.memory_space<vmem>>, vector<32x1xf32>
    %103 = vector.broadcast %102 : vector<32x1xf32> to vector<32x256xf32>
    %104 = arith.mulf %101, %103 : vector<32x256xf32>
    %105 = arith.addf %100, %104 : vector<32x256xf32>
    %c0_66 = arith.constant 0 : index
    %c160 = arith.constant 160 : index
    %106 = vector.load %arg14[%c0_66, %c160] : memref<32x512xf32, #tpu.memory_space<vmem>>, vector<32x256xf32>
    %c0_67 = arith.constant 0 : index
    %c7_68 = arith.constant 7 : index
    %107 = vector.load %arg3[%c0_67, %c7_68] : memref<32x9xf32, #tpu.memory_space<vmem>>, vector<32x1xf32>
    %108 = vector.broadcast %107 : vector<32x1xf32> to vector<32x256xf32>
    %109 = arith.mulf %106, %108 : vector<32x256xf32>
    %110 = arith.addf %105, %109 : vector<32x256xf32>
    %111 = arith.addf %96, %110 : vector<32x256xf32>
    %c0_69 = arith.constant 0 : index
    %c98 = arith.constant 98 : index
    %112 = vector.load %arg14[%c0_69, %c98] : memref<32x512xf32, #tpu.memory_space<vmem>>, vector<32x256xf32>
    %c0_70 = arith.constant 0 : index
    %c2_71 = arith.constant 2 : index
    %113 = vector.load %arg3[%c0_70, %c2_71] : memref<32x9xf32, #tpu.memory_space<vmem>>, vector<32x1xf32>
    %114 = vector.broadcast %113 : vector<32x1xf32> to vector<32x256xf32>
    %115 = arith.mulf %112, %114 : vector<32x256xf32>
    %c0_72 = arith.constant 0 : index
    %c130 = arith.constant 130 : index
    %116 = vector.load %arg14[%c0_72, %c130] : memref<32x512xf32, #tpu.memory_space<vmem>>, vector<32x256xf32>
    %c0_73 = arith.constant 0 : index
    %c5_74 = arith.constant 5 : index
    %117 = vector.load %arg3[%c0_73, %c5_74] : memref<32x9xf32, #tpu.memory_space<vmem>>, vector<32x1xf32>
    %118 = vector.broadcast %117 : vector<32x1xf32> to vector<32x256xf32>
    %119 = arith.mulf %116, %118 : vector<32x256xf32>
    %120 = arith.addf %115, %119 : vector<32x256xf32>
    %c0_75 = arith.constant 0 : index
    %c162 = arith.constant 162 : index
    %121 = vector.load %arg14[%c0_75, %c162] : memref<32x512xf32, #tpu.memory_space<vmem>>, vector<32x256xf32>
    %c0_76 = arith.constant 0 : index
    %c8_77 = arith.constant 8 : index
    %122 = vector.load %arg3[%c0_76, %c8_77] : memref<32x9xf32, #tpu.memory_space<vmem>>, vector<32x1xf32>
    %123 = vector.broadcast %122 : vector<32x1xf32> to vector<32x256xf32>
    %124 = arith.mulf %121, %123 : vector<32x256xf32>
    %125 = arith.addf %120, %124 : vector<32x256xf32>
    %c3_78 = arith.constant 3 : index
    %c0_79 = arith.constant 0 : index
    %126 = vector.load %arg5[%c3_78, %c0_79] : memref<6x256xf32, #tpu.memory_space<vmem>>, vector<1x256xf32>
    %127 = vector.broadcast %126 : vector<1x256xf32> to vector<32x256xf32>
    %128 = arith.mulf %125, %127 : vector<32x256xf32>
    %129 = arith.addf %111, %128 : vector<32x256xf32>
    %cst_80 = arith.constant 0.000000e+00 : f32
    %130 = vector.broadcast %cst_80 : f32 to vector<32x256xf32>
    %131 = arith.cmpf ogt, %129, %130 : vector<32x256xf32>
    %132 = vector.broadcast %78 : f32 to vector<32x256xf32>
    %133 = arith.mulf %132, %129 : vector<32x256xf32>
    %134 = arith.select %131, %129, %133 : vector<32x256xi1>, vector<32x256xf32>
    %135 = arith.truncf %134 : vector<32x256xf32> to vector<32x256xbf16>
    %c64 = arith.constant 64 : index
    %c0_81 = arith.constant 0 : index
    %136 = vector.load %arg15[%c64, %c0_81] : memref<128x256xbf16, #tpu.memory_space<vmem>>, vector<32x256xbf16>
    tpu.vector_store %arg15[%c64, %c0_81], %135 {strides = array<i32>} : memref<128x256xbf16, #tpu.memory_space<vmem>>, vector<32x256xbf16>,
    %c0_82 = arith.constant 0 : index
    %c0_83 = arith.constant 0 : index
    %137 = vector.load %arg15[%c0_82, %c0_83] : memref<128x256xbf16, #tpu.memory_space<vmem>>, vector<96x256xbf16>
    %c0_84 = arith.constant 0 : index
    %c0_85 = arith.constant 0 : index
    %138 = vector.load %arg9[%c0_84, %c0_85] : memref<32x96xbf16, #tpu.memory_space<vmem>>, vector<32x96xbf16>
    %cst_86 = arith.constant dense<0.000000e+00> : vector<32x256xf32>
    %139 = tpu.matmul %138, %137, %cst_86 {dimension_numbers = #tpu.dot_dimension_numbers<[1], [0], [0], [1], [0, 0, 1, 1], [], []>} : vector<32x96xbf16>, vector<96x256xbf16>, vector<32x256xf32> -> vector<32x256xf32>
    %c0_87 = arith.constant 0 : index
    %c0_88 = arith.constant 0 : index
    %140 = vector.load %arg10[%c0_87, %c0_88] : memref<32x1xf32, #tpu.memory_space<vmem>>, vector<32x1xf32>
    %141 = vector.broadcast %140 : vector<32x1xf32> to vector<32x256xf32>
    %142 = arith.addf %139, %141 : vector<32x256xf32>
    %cst_89 = arith.constant 0.000000e+00 : f32
    %143 = vector.broadcast %cst_89 : f32 to vector<32x256xf32>
    %144 = arith.cmpf ogt, %142, %143 : vector<32x256xf32>
    %cst_90 = arith.constant 0.00999999977 : f32
    %145 = vector.broadcast %cst_90 : f32 to vector<32x256xf32>
    %146 = arith.mulf %145, %142 : vector<32x256xf32>
    %147 = arith.select %144, %142, %146 : vector<32x256xi1>, vector<32x256xf32>
    %c2_91 = arith.constant 2 : index
    %148 = memref.load %arg6[%c2_91] : memref<3xf32, #tpu.memory_space<smem>>
    %c0_92 = arith.constant 0 : index
    %c128_93 = arith.constant 128 : index
    %149 = vector.load %arg14[%c0_92, %c128_93] : memref<32x512xf32, #tpu.memory_space<vmem>>, vector<32x256xf32>
    tpu.vector_store %arg14[%c0_92, %c128_93], %147 {strides = array<i32>} : memref<32x512xf32, #tpu.memory_space<vmem>>, vector<32x256xf32>,
    %c0_94 = arith.constant 0 : index
    %c77 = arith.constant 77 : index
    %150 = vector.load %arg14[%c0_94, %c77] : memref<32x512xf32, #tpu.memory_space<vmem>>, vector<32x256xf32>
    %c0_95 = arith.constant 0 : index
    %c0_96 = arith.constant 0 : index
    %151 = vector.load %arg4[%c0_95, %c0_96] : memref<32x9xf32, #tpu.memory_space<vmem>>, vector<32x1xf32>
    %152 = vector.broadcast %151 : vector<32x1xf32> to vector<32x256xf32>
    %153 = arith.mulf %150, %152 : vector<32x256xf32>
    %c0_97 = arith.constant 0 : index
    %c125 = arith.constant 125 : index
    %154 = vector.load %arg14[%c0_97, %c125] : memref<32x512xf32, #tpu.memory_space<vmem>>, vector<32x256xf32>
    %c0_98 = arith.constant 0 : index
    %c3_99 = arith.constant 3 : index
    %155 = vector.load %arg4[%c0_98, %c3_99] : memref<32x9xf32, #tpu.memory_space<vmem>>, vector<32x1xf32>
    %156 = vector.broadcast %155 : vector<32x1xf32> to vector<32x256xf32>
    %157 = arith.mulf %154, %156 : vector<32x256xf32>
    %158 = arith.addf %153, %157 : vector<32x256xf32>
    %c0_100 = arith.constant 0 : index
    %c173 = arith.constant 173 : index
    %159 = vector.load %arg14[%c0_100, %c173] : memref<32x512xf32, #tpu.memory_space<vmem>>, vector<32x256xf32>
    %c0_101 = arith.constant 0 : index
    %c6_102 = arith.constant 6 : index
    %160 = vector.load %arg4[%c0_101, %c6_102] : memref<32x9xf32, #tpu.memory_space<vmem>>, vector<32x1xf32>
    %161 = vector.broadcast %160 : vector<32x1xf32> to vector<32x256xf32>
    %162 = arith.mulf %159, %161 : vector<32x256xf32>
    %163 = arith.addf %158, %162 : vector<32x256xf32>
    %c4_103 = arith.constant 4 : index
    %c0_104 = arith.constant 0 : index
    %164 = vector.load %arg5[%c4_103, %c0_104] : memref<6x256xf32, #tpu.memory_space<vmem>>, vector<1x256xf32>
    %165 = vector.broadcast %164 : vector<1x256xf32> to vector<32x256xf32>
    %166 = arith.mulf %163, %165 : vector<32x256xf32>
    %c0_105 = arith.constant 0 : index
    %c80 = arith.constant 80 : index
    %167 = vector.load %arg14[%c0_105, %c80] : memref<32x512xf32, #tpu.memory_space<vmem>>, vector<32x256xf32>
    %c0_106 = arith.constant 0 : index
    %c1_107 = arith.constant 1 : index
    %168 = vector.load %arg4[%c0_106, %c1_107] : memref<32x9xf32, #tpu.memory_space<vmem>>, vector<32x1xf32>
    %169 = vector.broadcast %168 : vector<32x1xf32> to vector<32x256xf32>
    %170 = arith.mulf %167, %169 : vector<32x256xf32>
    %c0_108 = arith.constant 0 : index
    %c128_109 = arith.constant 128 : index
    %171 = vector.load %arg14[%c0_108, %c128_109] : memref<32x512xf32, #tpu.memory_space<vmem>>, vector<32x256xf32>
    %c0_110 = arith.constant 0 : index
    %c4_111 = arith.constant 4 : index
    %172 = vector.load %arg4[%c0_110, %c4_111] : memref<32x9xf32, #tpu.memory_space<vmem>>, vector<32x1xf32>
    %173 = vector.broadcast %172 : vector<32x1xf32> to vector<32x256xf32>
    %174 = arith.mulf %171, %173 : vector<32x256xf32>
    %175 = arith.addf %170, %174 : vector<32x256xf32>
    %c0_112 = arith.constant 0 : index
    %c176 = arith.constant 176 : index
    %176 = vector.load %arg14[%c0_112, %c176] : memref<32x512xf32, #tpu.memory_space<vmem>>, vector<32x256xf32>
    %c0_113 = arith.constant 0 : index
    %c7_114 = arith.constant 7 : index
    %177 = vector.load %arg4[%c0_113, %c7_114] : memref<32x9xf32, #tpu.memory_space<vmem>>, vector<32x1xf32>
    %178 = vector.broadcast %177 : vector<32x1xf32> to vector<32x256xf32>
    %179 = arith.mulf %176, %178 : vector<32x256xf32>
    %180 = arith.addf %175, %179 : vector<32x256xf32>
    %181 = arith.addf %166, %180 : vector<32x256xf32>
    %c0_115 = arith.constant 0 : index
    %c83 = arith.constant 83 : index
    %182 = vector.load %arg14[%c0_115, %c83] : memref<32x512xf32, #tpu.memory_space<vmem>>, vector<32x256xf32>
    %c0_116 = arith.constant 0 : index
    %c2_117 = arith.constant 2 : index
    %183 = vector.load %arg4[%c0_116, %c2_117] : memref<32x9xf32, #tpu.memory_space<vmem>>, vector<32x1xf32>
    %184 = vector.broadcast %183 : vector<32x1xf32> to vector<32x256xf32>
    %185 = arith.mulf %182, %184 : vector<32x256xf32>
    %c0_118 = arith.constant 0 : index
    %c131 = arith.constant 131 : index
    %186 = vector.load %arg14[%c0_118, %c131] : memref<32x512xf32, #tpu.memory_space<vmem>>, vector<32x256xf32>
    %c0_119 = arith.constant 0 : index
    %c5_120 = arith.constant 5 : index
    %187 = vector.load %arg4[%c0_119, %c5_120] : memref<32x9xf32, #tpu.memory_space<vmem>>, vector<32x1xf32>
    %188 = vector.broadcast %187 : vector<32x1xf32> to vector<32x256xf32>
    %189 = arith.mulf %186, %188 : vector<32x256xf32>
    %190 = arith.addf %185, %189 : vector<32x256xf32>
    %c0_121 = arith.constant 0 : index
    %c179 = arith.constant 179 : index
    %191 = vector.load %arg14[%c0_121, %c179] : memref<32x512xf32, #tpu.memory_space<vmem>>, vector<32x256xf32>
    %c0_122 = arith.constant 0 : index
    %c8_123 = arith.constant 8 : index
    %192 = vector.load %arg4[%c0_122, %c8_123] : memref<32x9xf32, #tpu.memory_space<vmem>>, vector<32x1xf32>
    %193 = vector.broadcast %192 : vector<32x1xf32> to vector<32x256xf32>
    %194 = arith.mulf %191, %193 : vector<32x256xf32>
    %195 = arith.addf %190, %194 : vector<32x256xf32>
    %c5_124 = arith.constant 5 : index
    %c0_125 = arith.constant 0 : index
    %196 = vector.load %arg5[%c5_124, %c0_125] : memref<6x256xf32, #tpu.memory_space<vmem>>, vector<1x256xf32>
    %197 = vector.broadcast %196 : vector<1x256xf32> to vector<32x256xf32>
    %198 = arith.mulf %195, %197 : vector<32x256xf32>
    %199 = arith.addf %181, %198 : vector<32x256xf32>
    %cst_126 = arith.constant 0.000000e+00 : f32
    %200 = vector.broadcast %cst_126 : f32 to vector<32x256xf32>
    %201 = arith.cmpf ogt, %199, %200 : vector<32x256xf32>
    %202 = vector.broadcast %148 : f32 to vector<32x256xf32>
    %203 = arith.mulf %202, %199 : vector<32x256xf32>
    %204 = arith.select %201, %199, %203 : vector<32x256xi1>, vector<32x256xf32>
    %205 = arith.truncf %204 : vector<32x256xf32> to vector<32x256xbf16>
    %c96_127 = arith.constant 96 : index
    %c0_128 = arith.constant 0 : index
    %206 = vector.load %arg15[%c96_127, %c0_128] : memref<128x256xbf16, #tpu.memory_space<vmem>>, vector<32x256xbf16>
    tpu.vector_store %arg15[%c96_127, %c0_128], %205 {strides = array<i32>} : memref<128x256xbf16, #tpu.memory_space<vmem>>, vector<32x256xbf16>,
    %c0_129 = arith.constant 0 : index
    %c0_130 = arith.constant 0 : index
    %207 = vector.load %arg15[%c0_129, %c0_130] : memref<128x256xbf16, #tpu.memory_space<vmem>>, vector<128x256xbf16>
    %c0_131 = arith.constant 0 : index
    %c0_132 = arith.constant 0 : index
    %208 = vector.load %arg11[%c0_131, %c0_132] : memref<32x128xbf16, #tpu.memory_space<vmem>>, vector<32x128xbf16>
    %cst_133 = arith.constant dense<0.000000e+00> : vector<32x256xf32>
    %209 = tpu.matmul %208, %207, %cst_133 {dimension_numbers = #tpu.dot_dimension_numbers<[1], [0], [0], [1], [0, 0, 1, 1], [], []>} : vector<32x128xbf16>, vector<128x256xbf16>, vector<32x256xf32> -> vector<32x256xf32>
    %c0_134 = arith.constant 0 : index
    %c0_135 = arith.constant 0 : index
    %210 = vector.load %arg12[%c0_134, %c0_135] : memref<32x1xf32, #tpu.memory_space<vmem>>, vector<32x1xf32>
    %211 = vector.broadcast %210 : vector<32x1xf32> to vector<32x256xf32>
    %212 = arith.addf %209, %211 : vector<32x256xf32>
    %cst_136 = arith.constant 0.000000e+00 : f32
    %213 = vector.broadcast %cst_136 : f32 to vector<32x256xf32>
    %214 = arith.cmpf ogt, %212, %213 : vector<32x256xf32>
    %cst_137 = arith.constant 0.00999999977 : f32
    %215 = vector.broadcast %cst_137 : f32 to vector<32x256xf32>
    %216 = arith.mulf %215, %212 : vector<32x256xf32>
    %217 = arith.select %214, %212, %216 : vector<32x256xi1>, vector<32x256xf32>
    %c0_138 = arith.constant 0 : index
    %c0_139 = arith.constant 0 : index
    %c0_140 = arith.constant 0 : index
    %218 = vector.load %arg13[%c0_138, %c0_139, %c0_140] : memref<1x32x256xf32, #tpu.memory_space<vmem>>, vector<1x32x256xf32>
    %219 = vector.shape_cast %218 : vector<1x32x256xf32> to vector<32x256xf32>
    %220 = vector.shape_cast %217 : vector<32x256xf32> to vector<1x32x256xf32>
    tpu.vector_store %arg13[%c0_138, %c0_139, %c0_140], %220 {strides = array<i32>} : memref<1x32x256xf32, #tpu.memory_space<vmem>>, vector<1x32x256xf32>,
    return
  }
  func.func @transform_0(%arg0: i32) -> (i32, i32, i32) {
    %c0_i32 = arith.constant 0 : i32
    %c0_i32_0 = arith.constant 0 : i32
    %c0_i32_1 = arith.constant 0 : i32
    return %arg0, %c0_i32, %c0_i32_0 : i32, i32, i32
  }
  func.func @transform_1(%arg0: i32) -> (i32, i32) {
    %c0_i32 = arith.constant 0 : i32
    %c0_i32_0 = arith.constant 0 : i32
    %c0_i32_1 = arith.constant 0 : i32
    return %c0_i32, %c0_i32_0 : i32, i32
  }
  func.func @transform_2(%arg0: i32) -> (i32, i32) {
    %c0_i32 = arith.constant 0 : i32
    %c0_i32_0 = arith.constant 0 : i32
    %c0_i32_1 = arith.constant 0 : i32
    return %c0_i32, %c0_i32_0 : i32, i32
  }
  func.func @transform_3(%arg0: i32) -> (i32, i32) {
    %c0_i32 = arith.constant 0 : i32
    %c0_i32_0 = arith.constant 0 : i32
    %c0_i32_1 = arith.constant 0 : i32
    return %c0_i32, %c0_i32_0 : i32, i32
  }
  func.func @transform_4(%arg0: i32) -> (i32, i32) {
    %c0_i32 = arith.constant 0 : i32
    %c0_i32_0 = arith.constant 0 : i32
    %c0_i32_1 = arith.constant 0 : i32
    return %c0_i32, %c0_i32_0 : i32, i32
  }
  func.func @transform_5(%arg0: i32) -> i32 {
    %c0_i32 = arith.constant 0 : i32
    %c0_i32_0 = arith.constant 0 : i32
    return %c0_i32 : i32
  }
  func.func @transform_6(%arg0: i32) -> (i32, i32) {
    %c0_i32 = arith.constant 0 : i32
    %c0_i32_0 = arith.constant 0 : i32
    %c0_i32_1 = arith.constant 0 : i32
    return %c0_i32, %c0_i32_0 : i32, i32
  }
  func.func @transform_7(%arg0: i32) -> (i32, i32) {
    %c0_i32 = arith.constant 0 : i32
    %c0_i32_0 = arith.constant 0 : i32
    %c0_i32_1 = arith.constant 0 : i32
    return %c0_i32, %c0_i32_0 : i32, i32
  }
  func.func @transform_8(%arg0: i32) -> (i32, i32) {
    %c0_i32 = arith.constant 0 : i32
    %c0_i32_0 = arith.constant 0 : i32
    %c0_i32_1 = arith.constant 0 : i32
    return %c0_i32, %c0_i32_0 : i32, i32
  }
  func.func @transform_9(%arg0: i32) -> (i32, i32) {
    %c0_i32 = arith.constant 0 : i32
    %c0_i32_0 = arith.constant 0 : i32
    %c0_i32_1 = arith.constant 0 : i32
    return %c0_i32, %c0_i32_0 : i32, i32
  }
  func.func @transform_10(%arg0: i32) -> (i32, i32) {
    %c0_i32 = arith.constant 0 : i32
    %c0_i32_0 = arith.constant 0 : i32
    %c0_i32_1 = arith.constant 0 : i32
    return %c0_i32, %c0_i32_0 : i32, i32
  }
  func.func @transform_11(%arg0: i32) -> (i32, i32) {
    %c0_i32 = arith.constant 0 : i32
    %c0_i32_0 = arith.constant 0 : i32
    %c0_i32_1 = arith.constant 0 : i32
    return %c0_i32, %c0_i32_0 : i32, i32
  }
  func.func @transform_12(%arg0: i32) -> (i32, i32, i32) {
    %c0_i32 = arith.constant 0 : i32
    %c0_i32_0 = arith.constant 0 : i32
    %c0_i32_1 = arith.constant 0 : i32
    return %arg0, %c0_i32, %c0_i32_0 : i32, i32, i32
  }
}

</mosaic_0001>

<bundles_post_ra>
// kernel: hdcb_forward_nchw.1
= control target key start
LH: loop header
LB: loop body
LE: loop exit
PB: predicated region body
PF: predicated region fallthrough
CT: control target
= control target key end

     0   :  { %17 = vsyncpa [#allocation5], 0  ;;  %s4079_s21 = smov 0   ;;  %s6282_s0 = inlined_call_operand.vmem [shape: f32[2,32,256], index: 0, kind: input, shape index: {}]   ;;  %s6283_s1 = inlined_call_operand.vmem [shape: f32[32,9], index: 1, kind: input, shape index: {}]   ;;  %s6284_s2 = inlined_call_operand.vmem [shape: f32[32,9], index: 2, kind: input, shape index: {}]   ;;  %s6285_s3 = inlined_call_operand.vmem [shape: f32[32,9], index: 3, kind: input, shape index: {}]   ;;  %s6286_s4 = inlined_call_operand.vmem [shape: f32[6,256], index: 4, kind: input, shape index: {}]   ;;  %s6287_s5 = inlined_call_operand.vmem [shape: f32[3], index: 5, kind: input, shape index: {}]   ;;  %s6288_s6 = inlined_call_operand.vmem [shape: bf16[32,64], index: 6, kind: input, shape index: {}]   ;;  %s6289_s7 = inlined_call_operand.vmem [shape: f32[32,1], index: 7, kind: input, shape index: {}]   ;;  %s6290_s8 = inlined_call_operand.vmem [shape: bf16[32,96], index: 8, kind: input, shape index: {}]   ;;  %s6291_s9 = inlined_call_operand.vmem [shape: f32[32,1], index: 9, kind: input, shape index: {}]   ;;  %s6292_s10 = inlined_call_operand.vmem [shape: bf16[32,128], index: 10, kind: input, shape index: {}]   ;;  %s6293_s11 = inlined_call_operand.vmem [shape: f32[32,1], index: 11, kind: input, shape index: {}]   ;;  %s6294_s12 = inlined_call_operand.vmem [shape: f32[2,32,256], index: 12, kind: output, shape index: {}]  }
   0x1 LB: > { %s4085_s22 = sadd.s32 4294967295, %s3983_s21   ;;  %p3799_p0 = scmp.ge.s32.totalorder %s3983_s21, 1  ;;  %s3983_s21 = sphi %s4079_s21, %s23_s21  }
   0x2   : > { %p311_p1 = scmp.lt.s32.totalorder %s3983_s21, 3  ;;  %s336_s25 = sshll.u32 %s6287_s5, 4  ;;  %s337_s25 = int_to_ptr.vmem [resolvable:$true] %s336_s25 }
   0x3   : > { %p3837_p3 = scmp.eq.s32.totalorder %s4085_s22, 0  ;;  %s3958_s27 = scalar_lea.vmem %s337_s25, 16 }
   0x4   : > { %p4092_p2 = pnand %p3799_p0, %p311_p1  ;;  %p3959_p6 = scmp.ne.s32.totalorder %s337_s25, %s3958_s27 }
   0x5   : > { %p3966_p10 = scmp.lt.s32.totalorder %s337_s25, %s337_s25  ;;  %p3967_p11 = scmp.lt.s32.totalorder %s3958_s27, %s3958_s27 }
   0x6   : > { %p3833_p4 = pneg %p4092_p2 }
   0x7   : > { %p3968_p12 = por %p3967_p11, %p3966_p10 }
   0x8   : > { %p3834_p5 = pnand %p3837_p3, %p3833_p4 }
   0xa   : > { %p3960_p7 = pneg %p3834_p5 }
   0xc   : > { %p3961_p8 = pnand %p3960_p7, %p3959_p6 }
   0xe   : > { %p3962_p9 = pneg %p3961_p8 }
  0x10   : > { %p3969_p13 = pnand %p3968_p12, %p3962_p9 }
  0x12   : > { %3972 = shalt.err (!%p3969_p13)
}
  0x13   : > { %s3985_s28 = smov [#allocation4]   ;;  %375 = sbr.rel (%p4092_p2) target bundleno = 2213 (0x8a5), region = 68 }
  0x14   : > { %3836 = dma.vmem_to_smem (!%p3834_p5), %s337_s25, 16, %s3985_s28, [#allocation5]  }
  0x1a   : > { %3978 = dma.done.wait (%p3837_p3), [#allocation5], 16  }
  0x1b   : > { %3980 = vsyncadd (%p3837_p3), [#allocation5], 4294967280 }
  0x1c   : > { %381 = sfence }
  0x1d   : > { %v4110_v0 = vld [vmem:[%s6283_s1] sm:$0xff]  ;;  %v6311_v1 = vmov 4   ;;  %v6307_v2 = vmov 5   ;;  %v4119_v3 = vld [vmem:[%s6283_s1 + $0x8] sm:$0xff]  ;;  %v6309_v4 = vmov 8   ;;  %v6305_v5 = vmov 7  }
  0x1e   : > { %3876 = vset.pattern.permute.xlu0 %v6311_v1  ;;  %3877 = vset.pattern.permute.xlu1 %v6307_v2  ;;  %v4130_v6 = vld [vmem:[%s6283_s1 + $0x10] sm:$0xff]  ;;  %v4143_v7 = vld [vmem:[%s6283_s1 + $0x18] sm:$0xff]  ;;  %v6303_v8 = vmov 6   ;;  %v6301_v9 = vmov 3   ;;  %v6299_v10 = vmov 1   ;;  %v6297_v11 = vmov 2  }
  0x1f   : > { %776 = vperm.xlu0 %3876, %v4110_v0   ;;  %1045 = vperm.xlu1 %3877, %v4110_v0   ;;  %v6295_v12 = vmov 0   ;;  %p418_p0 = scmp.lt.s32.totalorder %s4085_s22, 1  ;;  %s3995_s25 = smov 112   ;;  %v718_v59 = vlaneseq  ;;  %vm683_vm0 = vcmask 785408   ;;  %vm574_vm1 = vcmask 916480  }
  0x20   : > { %1496 = vmatprep.mubr.bf16.mxu1 %v6295_v12  ;;  %3677 = vmatprep.mubr.bf16.mxu0 %v6295_v12  ;;  %s3996_s26 = smov 96   ;;  %s3997_s29 = smov 113   ;;  %vm1251_vm2 = vcmask 924672   ;;  %vm730_vm3 = vcmask 908288   ;;  %vm983_vm4 = vcmask 1039360   ;;  %vm1304_vm5 = vcmask 1031168  }
  0x21   : > { %s6384_s22 = smov (!%p418_p0, %s4085_s22), 1  ;;  %v719_v63 = vshrl.u32 %v718_v59, 7  ;;  %s3998_s14 = smov 111  }
  0x22   : > { %s3827_s19 = sshll.u32 %s6384_s22, 6  ;;  %s3999_s15 = smov 127  }
  0x23   : > { %780 = vperm.xlu0 %3876, %v4119_v3   ;;  %1049 = vperm.xlu1 %3877, %v4119_v3   ;;  %s4196_s24 = scalar_lea.vmem %s6282_s0, %s3827_s19  ;;  %s4000_s16 = smov 126  }
  0x24   : > { %v4199_v13 = vld [vmem:[%s4196_s24] sm:$0xff]  ;;  %v4203_v16 = vld [vmem:[%s4196_s24 + $0x8] sm:$0xff]  ;;  %v4206_v17 = vld [vmem:[%s4196_s24 + $0x10] sm:$0xff]  ;;  %s4645_s17 = sld [smem:[#allocation4]]  ;;  %s4001_s18 = smov 17  }
  0x25   : > { %v4212_v22 = vld [vmem:[%s4196_s24 + $0x18] sm:$0xff]  ;;  %v4248_v50 = vld [vmem:[%s4196_s24 + $0x20] sm:$0xff]  ;;  %v4254_v54 = vld [vmem:[%s4196_s24 + $0x28] sm:$0xff]  ;;  %s4002_s30 = smov 64   ;;  %s4004_s20 = smov 94  }
  0x26   : > { %v4257_v55 = vld [vmem:[%s4196_s24 + $0x30] sm:$0xff]  ;;  %v4264_v60 = vld [vmem:[%s4196_s24 + $0x38] sm:$0xff]  ;;  %s4006_s23 = smov 34   ;;  %s4008_s13 = smov 32  }
  0x27   : > { %3880 = vset.pattern.permute.xlu0 %v6309_v4  ;;  %3878 = vset.pattern.permute.xlu1 %v6305_v5  ;;  %s3820_s24 = sld [smem:[#allocation4 + $0x2]] }
  0x28   : > { %1145 = vperm.xlu0 %3880, %v4119_v3   ;;  %856 = vperm.xlu1 %3878, %v4119_v3  }
  0x2c   : > { %3882 = vset.pattern.permute.xlu0 %v6307_v2  ;;  %3879 = vset.pattern.permute.xlu1 %v6309_v4 }
  0x2d   : > { %1053 = vperm.xlu0 %3882, %v4130_v6   ;;  %1141 = vperm.xlu1 %3879, %v4110_v0  }
  0x31   : > { %3883 = vset.pattern.permute.xlu0 %v6305_v5  ;;  %3881 = vset.pattern.permute.xlu1 %v6311_v1 }
  0x32   : > { %852 = vperm.xlu0 %3883, %v4110_v0   ;;  %784 = vperm.xlu1 %3881, %v4130_v6  }
  0x36   : > { %864 = vperm.xlu0 %3883, %v4143_v7   ;;  %788 = vperm.xlu1 %3881, %v4143_v7  }
  0x3a   : > { %3884 = vset.pattern.permute.xlu1 %v6307_v2  ;;  %3889 = vset.pattern.permute.xlu0 %v6303_v8 }
  0x3b   : > { %1057 = vperm.xlu1 %3884, %v4143_v7   ;;  %624 = vperm.xlu0 %3889, %v4119_v3  }
  0x3f   : > { %3885 = vset.pattern.permute.xlu1 %v6305_v5  ;;  %3890 = vset.pattern.permute.xlu0 %v6301_v9 }
  0x40   : > { %860 = vperm.xlu1 %3885, %v4130_v6   ;;  %511 = vperm.xlu0 %3890, %v4110_v0  }
  0x44   : > { %3886 = vset.pattern.permute.xlu1 %v6309_v4  ;;  %523 = vperm.xlu0 %3890, %v4143_v7  }
  0x45   : > { %1149 = vperm.xlu1 %3886, %v4130_v6  }
  0x48   : > { %3895 = vset.pattern.permute.xlu0 %v6299_v10 }
  0x49   : > { %1153 = vperm.xlu1 %3886, %v4143_v7   ;;  %756 = vperm.xlu0 %3895, %v4130_v6  }
  0x4d   : > { %3887 = vset.pattern.permute.xlu1 %v6301_v9  ;;  %3896 = vset.pattern.permute.xlu0 %v6297_v11 }
  0x4e   : > { %515 = vperm.xlu1 %3887, %v4119_v3   ;;  %1017 = vperm.xlu0 %3896, %v4110_v0  }
  0x52   : > { %3888 = vset.pattern.permute.xlu1 %v6303_v8  ;;  %1029 = vperm.xlu0 %3896, %v4143_v7  }
  0x53   : > { %620 = vperm.xlu1 %3888, %v4110_v0  }
  0x56   : > { %3899 = vset.pattern.permute.xlu0 %v6295_v12 }
  0x57   : > { %3891 = vset.pattern.permute.xlu1 %v6299_v10 }
  0x58   : > { %748 = vperm.xlu1 %3891, %v4110_v0  }
  0x5c   : > { %752 = vperm.xlu1 %3891, %v4119_v3  }
  0x60   : > { %3892 = vset.pattern.permute.xlu1 %v6297_v11 }
  0x61   : > { %1021 = vperm.xlu1 %3892, %v4119_v3  }
  0x65   : > { %3893 = vset.pattern.permute.xlu1 %v6301_v9 }
  0x66   : > { %519 = vperm.xlu1 %3893, %v4130_v6  }
  0x6a   : > { %3894 = vset.pattern.permute.xlu1 %v6303_v8 }
  0x6b   : > { %628 = vperm.xlu1 %3894, %v4130_v6  }
  0x6f   : > { %632 = vperm.xlu1 %3894, %v4143_v7  }
  0x73   : > { %3897 = vset.pattern.permute.xlu1 %v6299_v10 }
  0x74   : > { %760 = vperm.xlu1 %3897, %v4143_v7  }
  0x78   : > { %3898 = vset.pattern.permute.xlu1 %v6297_v11 }
  0x79   : > { %1025 = vperm.xlu1 %3898, %v4130_v6  }
  0x7d   : > { %3900 = vset.pattern.permute.xlu1 %v6295_v12 }
  0x9e   : > { %v777_v14 = vpop.permute.xlu0 %776  ;;  %v1046_v19 = vpop.permute.xlu1 %1045 }
  0x9f   : > { %v791_v15 = vmul.f32 %v777_v14, %v4199_v13  ;;  %v792_v20 = vmul.f32 %v777_v14, %v4203_v16  ;;  %v1060_v23 = vmul.f32 %v1046_v19, %v4199_v13  ;;  %v1062_v26 = vmul.f32 0.0, %v1046_v19 }
  0xa0   : > { %v1061_v27 = vmul.f32 %v1046_v19, %v4203_v16  ;;  %v4273_v19 = vsub.s32 0, %v719_v63 }
  0xa1   : > { %807 = vrot.lane.b32.xlu1 %v791_v15, %s3995_s25 }
  0xa2   : > { %v781_v18 = vpop.permute.xlu0 %780  ;;  %v1050_v28 = vpop.permute.xlu1 %1049  ;;  %6331 = vst [vmem:[#allocation7_spill] sm:$0xff] %v4273_v19 }
  0xa3   : > { %v793_v21 = vmul.f32 %v781_v18, %v4206_v17  ;;  %v794_v24 = vmul.f32 %v781_v18, %v4212_v22  ;;  %v1064_v30 = vmul.f32 %v1050_v28, %v4212_v22  ;;  %v1063_v31 = vmul.f32 %v1050_v28, %v4206_v17 }
  0xa4   : > { %v1065_v35 = vmul.f32 0.0, %v1050_v28 }
  0xa5   : > { %811 = vrot.lane.b32.xlu0 %v793_v21, %s3995_s25  ;;  %809 = vrot.lane.b32.xlu1 %v792_v20, %s3995_s25  ;;  %v3808_v20 = vld [vmem:[%s6286_s4 + $0x1] ss:$8 sm:$0x3] }
  0xa7   : > { %v1146_v25 = vpop.permute.xlu0 %1145  ;;  %v857_v33 = vpop.permute.xlu1 %856 }
  0xa8   : > { %v871_v39 = vmul.f32 %v857_v33, %v4212_v22  ;;  %v870_v40 = vmul.f32 %v857_v33, %v4206_v17  ;;  %v872_v43 = vmul.f32 0.0, %v857_v33  ;;  %v1160_v48 = vmul.f32 %v1146_v25, %v4212_v22 }
  0xa9   : > { %1084 = vrot.lane.b32.xlu0 %v1060_v23, %s3995_s25  ;;  %813 = vrot.lane.b32.xlu1 %v794_v24, %s3995_s25  ;;  %v1159_v49 = vmul.f32 %v1146_v25, %v4206_v17  ;;  %v1161_v52 = vmul.f32 0.0, %v1146_v25  ;;  %v1242_v25 = vrot.slane %v3808_v20, %v4273_v19 }
  0xac   : > { %v1054_v29 = vpop.permute.xlu0 %1053  ;;  %v1142_v38 = vpop.permute.xlu1 %1141 }
  0xad   : > { %1088 = vrot.lane.b32.xlu0 %v1062_v26, %s3995_s25  ;;  %1086 = vrot.lane.b32.xlu1 %v1061_v27, %s3995_s25  ;;  %v1156_v42 = vmul.f32 %v1142_v38, %v4199_v13  ;;  %v1158_v44 = vmul.f32 0.0, %v1142_v38  ;;  %v1157_v45 = vmul.f32 %v1142_v38, %v4203_v16  ;;  %v1066_v62 = vmul.f32 %v1054_v29, %v4248_v50 }
  0xae   : > { %v1068_v14 = vmul.f32 0.0, %v1054_v29  ;;  %v1067_v15 = vmul.f32 %v1054_v29, %v4254_v54  ;;  %v4283_v26 = vsub.s32 1, %v719_v63 }
  0xb0   : > { %6332 = vst [vmem:[#allocation8_spill] sm:$0xff] %v4283_v26  ;;  %v1246_v28 = vrot.slane %v3808_v20, %v4283_v26 }
  0xb1   : > { %1092 = vrot.lane.b32.xlu0 %v1064_v30, %s3995_s25  ;;  %1090 = vrot.lane.b32.xlu1 %v1063_v31, %s3995_s25  ;;  %v853_v32 = vpop.permute.xlu0 %852  ;;  %v785_v41 = vpop.permute.xlu1 %784 }
  0xb2   : > { %v867_v34 = vmul.f32 %v853_v32, %v4199_v13  ;;  %v869_v36 = vmul.f32 0.0, %v853_v32  ;;  %v868_v37 = vmul.f32 %v853_v32, %v4203_v16  ;;  %v795_v51 = vmul.f32 %v785_v41, %v4248_v50 }
  0xb3   : > { %v796_v56 = vmul.f32 %v785_v41, %v4254_v54 }
  0xb5   : > { %891 = vrot.lane.b32.xlu0 %v867_v34, %s3996_s26  ;;  %1094 = vrot.lane.b32.xlu1 %v1065_v35, %s3995_s25  ;;  %v789_v46 = vpop.permute.xlu1 %788  ;;  %v865_v34 = vpop.permute.xlu0 %864 }
  0xb6   : > { %v797_v57 = vmul.f32 %v789_v46, %v4257_v55  ;;  %v798_v61 = vmul.f32 %v789_v46, %v4264_v60  ;;  %v877_v35 = vmul.f32 %v865_v34, %v4264_v60 }
  0xb9   : > { %895 = vrot.lane.b32.xlu0 %v869_v36, %s3996_s26  ;;  %893 = vrot.lane.b32.xlu1 %v868_v37, %s3996_s26  ;;  %v876_v36 = vmul.f32 %v865_v34, %v4257_v55 }
  0xba   : > { %v1058_v47 = vpop.permute.xlu1 %1057 }
  0xbb   : > { %v1070_v21 = vmul.f32 %v1058_v47, %v4264_v60  ;;  %v1069_v23 = vmul.f32 %v1058_v47, %v4257_v55  ;;  %v1071_v27 = vmul.f32 0.0, %v1058_v47 }
  0xbd   : > { %899 = vrot.lane.b32.xlu0 %v871_v39, %s3996_s26  ;;  %897 = vrot.lane.b32.xlu1 %v870_v40, %s3996_s26  ;;  %v878_v39 = vmul.f32 0.0, %v865_v34 }
  0xbf   : > { %v861_v53 = vpop.permute.xlu1 %860 }
  0xc0   : > { %v873_v30 = vmul.f32 %v861_v53, %v4248_v50  ;;  %v875_v31 = vmul.f32 0.0, %v861_v53  ;;  %v874_v32 = vmul.f32 %v861_v53, %v4254_v54 }
  0xc1   : > { %1180 = vrot.lane.b32.xlu0 %v1156_v42, %s3996_s26  ;;  %901 = vrot.lane.b32.xlu1 %v872_v43, %s3996_s26  ;;  %v625_v43 = vpop.permute.xlu0 %624 }
  0xc4   : > { %v1150_v58 = vpop.permute.xlu1 %1149 }
  0xc5   : > { %1184 = vrot.lane.b32.xlu0 %v1158_v44, %s3996_s26  ;;  %1182 = vrot.lane.b32.xlu1 %v1157_v45, %s3996_s26  ;;  %v1162_v38 = vmul.f32 %v1150_v58, %v4248_v50  ;;  %v1164_v41 = vmul.f32 0.0, %v1150_v58  ;;  %v1163_v42 = vmul.f32 %v1150_v58, %v4254_v54 }
  0xc8   : > { %v1154_v18 = vpop.permute.xlu1 %1153 }
  0xc9   : > { %1188 = vrot.lane.b32.xlu0 %v1160_v48, %s3996_s26  ;;  %1186 = vrot.lane.b32.xlu1 %v1159_v49, %s3996_s26  ;;  %v1166_v45 = vmul.f32 %v1154_v18, %v4264_v60  ;;  %v1165_v46 = vmul.f32 %v1154_v18, %v4257_v55  ;;  %v1167_v47 = vmul.f32 0.0, %v1154_v18  ;;  %v512_v48 = vpop.permute.xlu0 %511  ;;  %v638_v18 = vmul.f32 %v625_v43, %v4206_v17 }
  0xcd   : > { %815 = vrot.lane.b32.xlu0 %v795_v51, %s3995_s25  ;;  %1190 = vrot.lane.b32.xlu1 %v1161_v52, %s3996_s26  ;;  %v516_v24 = vpop.permute.xlu1 %515  ;;  %v524_v51 = vpop.permute.xlu0 %523  ;;  %v528_v52 = vmul.f32 %v512_v48, %v4203_v16 }
  0xce   : > { %v530_v58 = vmul.f32 %v516_v24, %v4206_v17 }
  0xd1   : > { %819 = vrot.lane.b32.xlu0 %v797_v57, %s3995_s25  ;;  %817 = vrot.lane.b32.xlu1 %v796_v56, %s3995_s25  ;;  %v527_v56 = vmul.f32 %v512_v48, %v4199_v13  ;;  %v4328_v57 = vpop.permute.xlu0 %756 }
  0xd2   : > { %v4287_v29 = vpop.permute.xlu1 %620 }
  0xd3   : > { %v637_v20 = vmul.f32 0.0, %v4287_v29 }
  0xd5   : > { %1096 = vrot.lane.b32.xlu0 %v1066_v62, %s3995_s25  ;;  %821 = vrot.lane.b32.xlu1 %v798_v61, %s3995_s25  ;;  %v4337_v59 = vpop.permute.xlu0 %1017  ;;  %v636_v61 = vmul.f32 %v4287_v29, %v4203_v16  ;;  %v526_v62 = vmul.f32 0.0, %v512_v48 }
  0xd7   : > { %v4292_v33 = vpop.permute.xlu1 %748 }
  0xd9   : > { %1100 = vrot.lane.b32.xlu0 %v1068_v14, %s3995_s25  ;;  %1098 = vrot.lane.b32.xlu1 %v1067_v15, %s3995_s25  ;;  %v4347_v63 = vpop.permute.xlu0 %1029  ;;  %v635_v14 = vmul.f32 %v4287_v29, %v4199_v13  ;;  %v716_v29 = vld [vmem:[%s6286_s4] ss:$8 sm:$0x3] }
  0xdb   : > { %v4300_v37 = vpop.permute.xlu1 %752 }
  0xdd   : > { %1104 = vrot.lane.b32.xlu0 %v1070_v21, %s3995_s25  ;;  %1102 = vrot.lane.b32.xlu1 %v1069_v23, %s3995_s25 }
  0xe0   : > { %v4305_v40 = vpop.permute.xlu1 %1021 }
  0xe1   : > { %1247 = vrot.lane.b32.xlu0 %v1242_v25, %s3997_s29  ;;  %1106 = vrot.lane.b32.xlu1 %v1071_v27, %s3995_s25  ;;  %v639_v25 = vmul.f32 %v625_v43, %v4212_v22 }
  0xe5   : > { %903 = vrot.lane.b32.xlu0 %v873_v30, %s3996_s26  ;;  %1249 = vrot.lane.b32.xlu1 %v1246_v28, %s3997_s29  ;;  %v4310_v44 = vpop.permute.xlu1 %519 }
  0xe6   : > { %v534_v30 = vmul.f32 %v4310_v44, %v4254_v54 }
  0xe9   : > { %907 = vrot.lane.b32.xlu0 %v875_v31, %s3996_s26  ;;  %905 = vrot.lane.b32.xlu1 %v874_v32, %s3996_s26  ;;  %v533_v31 = vmul.f32 %v4310_v44, %v4248_v50 }
  0xea   : > { %v4316_v49 = vpop.permute.xlu1 %628 }
  0xed   : > { %911 = vrot.lane.b32.xlu0 %v877_v35, %s3996_s26  ;;  %909 = vrot.lane.b32.xlu1 %v876_v36, %s3996_s26  ;;  %v537_v35 = vmul.f32 %v524_v51, %v4264_v60  ;;  %v725_v36 = vrot.slane %v716_v29, %v4283_v26 }
  0xee   : > { %v4323_v53 = vpop.permute.xlu1 %632 }
  0xf1   : > { %1192 = vrot.lane.b32.xlu0 %v1162_v38, %s3996_s26  ;;  %913 = vrot.lane.b32.xlu1 %v878_v39, %s3996_s26  ;;  %v536_v38 = vmul.f32 %v524_v51, %v4257_v55 }
  0xf5   : > { %1196 = vrot.lane.b32.xlu0 %v1164_v41, %s3996_s26  ;;  %1194 = vrot.lane.b32.xlu1 %v1163_v42, %s3996_s26  ;;  %v721_v42 = vrot.slane %v716_v29, %v4273_v19 }
  0xf9   : > { %1200 = vrot.lane.b32.xlu0 %v1166_v45, %s3996_s26  ;;  %1198 = vrot.lane.b32.xlu1 %v1165_v46, %s3996_s26  ;;  %v535_v46 = vmul.f32 0.0, %v524_v51  ;;  %v644_v51 = vmul.f32 %v4323_v53, %v4257_v55 }
  0xfd   : > { %480 = vperm.xlu0 %3899, %v4110_v0   ;;  %1202 = vrot.lane.b32.xlu1 %v1167_v47, %s3996_s26  ;;  %v531_v0 = vmul.f32 %v516_v24, %v4212_v22  ;;  %v532_v47 = vmul.f32 0.0, %v4310_v44  ;;  %v643_v44 = vmul.f32 0.0, %v4316_v49 }
 0x101   : > { %495 = vperm.xlu0 %3899, %v4143_v7   ;;  %485 = vperm.xlu1 %3900, %v4119_v3   ;;  %v4332_v7 = vpop.permute.xlu1 %760  ;;  %v529_v3 = vmul.f32 0.0, %v516_v24  ;;  %v640_v24 = vmul.f32 0.0, %v625_v43 }
 0x105   : > { %554 = vrot.lane.b32.xlu0 %v528_v52, %s3995_s25  ;;  %490 = vperm.xlu1 %3900, %v4130_v6   ;;  %v4341_v6 = vpop.permute.xlu1 %1025 }
 0x106   : > { %3905 = vset.pattern.permute.xlu0 %v6309_v4 }
 0x109   : > { %560 = vrot.lane.b32.xlu0 %v531_v0, %s3995_s25  ;;  %552 = vrot.lane.b32.xlu1 %v527_v56, %s3995_s25  ;;  %v642_v56 = vmul.f32 %v4316_v49, %v4254_v54  ;;  %v641_v0 = vmul.f32 %v4316_v49, %v4248_v50  ;;  %v645_v49 = vmul.f32 %v4323_v53, %v4264_v60 }
 0x10d   : > { %556 = vrot.lane.b32.xlu0 %v529_v3, %s3995_s25  ;;  %558 = vrot.lane.b32.xlu1 %v530_v58, %s3995_s25 }
 0x111   : > { %661 = vrot.lane.b32.xlu0 %v636_v61, %s3996_s26  ;;  %550 = vrot.lane.b32.xlu1 %v526_v62, %s3995_s25  ;;  %v765_v61 = vmul.f32 %v4292_v33, %v4203_v16 }
 0x113   : > { %v4351_v15 = vpop.permute.xlu1 %807 }
 0x115   : > { %665 = vrot.lane.b32.xlu0 %v638_v18, %s3996_s26  ;;  %659 = vrot.lane.b32.xlu1 %v635_v14, %s3996_s26  ;;  %v646_v18 = vmul.f32 0.0, %v4323_v53 }
 0x117   : > { %v4357_v21 = vpop.permute.xlu0 %811  ;;  %v4359_v23 = vpop.permute.xlu1 %809 }
 0x118   : > { %v823_v53 = vsel %vm574_vm1, %v4351_v15, %v4359_v23 }
 0x119   : > { %669 = vrot.lane.b32.xlu0 %v640_v24, %s3996_s26  ;;  %663 = vrot.lane.b32.xlu1 %v637_v20, %s3996_s26  ;;  %v841_v24 = vadd.f32 %v4359_v23, %v765_v61 }
 0x11b   : > { %v4364_v27 = vpop.permute.xlu0 %1084  ;;  %v4366_v28 = vpop.permute.xlu1 %813 }
 0x11d   : > { %566 = vrot.lane.b32.xlu0 %v534_v30, %s3995_s25  ;;  %667 = vrot.lane.b32.xlu1 %v639_v25, %s3996_s26  ;;  %v763_v25 = vmul.f32 0.0, %v4292_v33  ;;  %v768_v30 = vmul.f32 %v4300_v37, %v4212_v22 }
 0x11f   : > { %v4377_v32 = vpop.permute.xlu0 %1088  ;;  %v4379_v34 = vpop.permute.xlu1 %1086 }
 0x121   : > { %572 = vrot.lane.b32.xlu0 %v537_v35, %s3995_s25  ;;  %564 = vrot.lane.b32.xlu1 %v533_v31, %s3995_s25 }
 0x123   : > { %v4386_v39 = vpop.permute.xlu0 %1092  ;;  %v4388_v41 = vpop.permute.xlu1 %1090 }
 0x125   : > { %728 = vrot.lane.b32.xlu0 %v725_v36, %s3998_s14  ;;  %570 = vrot.lane.b32.xlu1 %v536_v38, %s3995_s25  ;;  %v839_v38 = vadd.f32 %v4351_v15, %v763_v25  ;;  %v767_v15 = vmul.f32 %v4300_v37, %v4206_v17 }
 0x127   : > { %v892_v43 = vpop.permute.xlu0 %891  ;;  %v4392_v45 = vpop.permute.xlu1 %1094 }
 0x129   : > { %568 = vrot.lane.b32.xlu0 %v535_v46, %s3995_s25  ;;  %726 = vrot.lane.b32.xlu1 %v721_v42, %s3998_s14  ;;  %v844_v42 = vadd.f32 %v4366_v28, %v768_v30  ;;  %v764_v46 = vmul.f32 %v4292_v33, %v4199_v13  ;;  %v824_v33 = vsel %vm574_vm1, %v4357_v21, %v4366_v28 }
 0x12b   : > { %v896_v48 = vpop.permute.xlu0 %895  ;;  %v894_v52 = vpop.permute.xlu1 %893 }
 0x12c   : > { %v916_v20 = vsel %vm683_vm0, %v894_v52, %v896_v48  ;;  %v935_v48 = vadd.f32 %v892_v43, %v839_v38  ;;  %v1034_v38 = vmul.f32 %v4337_v59, %v4203_v16 }
 0x12d   : > { %673 = vrot.lane.b32.xlu0 %v642_v56, %s3996_s26  ;;  %562 = vrot.lane.b32.xlu1 %v532_v47, %s3995_s25  ;;  %v937_v29 = vadd.f32 %v916_v20, %v841_v24  ;;  %v766_v47 = vmul.f32 0.0, %v4300_v37  ;;  %s4013_s25 = smov 51  }
 0x12f   : > { %v900_v3 = vpop.permute.xlu0 %899  ;;  %v898_v58 = vpop.permute.xlu1 %897  ;;  %v842_v61 = vadd.f32 %v4357_v21, %v766_v47 }
 0x131   : > { %677 = vrot.lane.b32.xlu0 %v644_v51, %s3996_s26  ;;  %671 = vrot.lane.b32.xlu1 %v641_v0, %s3996_s26 }
 0x133   : > { %v4409_v62 = vpop.permute.xlu0 %1180  ;;  %v902_v14 = vpop.permute.xlu1 %901 }
 0x134   : > { %v918_v36 = vsel %vm683_vm0, %v900_v3, %v902_v14  ;;  %v840_v14 = vadd.f32 %v823_v53, %v764_v46  ;;  %v1033_v53 = vmul.f32 %v4337_v59, %v4199_v13 }
 0x135   : > { %681 = vrot.lane.b32.xlu0 %v646_v18, %s3996_s26  ;;  %675 = vrot.lane.b32.xlu1 %v643_v44, %s3996_s26  ;;  %v940_v56 = vadd.f32 %v918_v36, %v844_v42  ;;  %v915_v44 = vsel %vm683_vm0, %v892_v43, %v894_v52  ;;  %v938_v18 = vadd.f32 %v898_v58, %v842_v61 }
 0x136   : > { %v936_v23 = vadd.f32 %v915_v44, %v840_v14  ;;  %v917_v43 = vsel %vm683_vm0, %v898_v58, %v900_v3  ;;  %v843_v52 = vadd.f32 %v824_v33, %v767_v15  ;;  %v1109_v36 = vsel %vm574_vm1, %v4379_v34, %v4377_v32 }
 0x137   : > { %v1185_v31 = vpop.permute.xlu0 %1184  ;;  %v1183_v35 = vpop.permute.xlu1 %1182  ;;  %v1108_v42 = vsel %vm574_vm1, %v4364_v27, %v4379_v34  ;;  %v1111_v61 = vsel %vm574_vm1, %v4386_v39, %v4392_v45  ;;  %v1110_v34 = vsel %vm574_vm1, %v4388_v41, %v4386_v39  ;;  %v1036_v33 = vmul.f32 %v4305_v40, %v4206_v17 }
 0x138   : > { %v1205_v46 = vsel %vm683_vm0, %v1183_v35, %v1185_v31  ;;  %v1204_v32 = vsel %vm683_vm0, %v4409_v62, %v1183_v35  ;;  %v1129_v44 = vadd.f32 %v1108_v42, %v1033_v53  ;;  %v1037_v31 = vmul.f32 %v4305_v40, %v4212_v22 }
 0x139   : > { %963 = vrot.lane.b32.xlu0 %v937_v29, %s3999_s15  ;;  %679 = vrot.lane.b32.xlu1 %v645_v49, %s3996_s26  ;;  %v939_v49 = vadd.f32 %v917_v43, %v843_v52  ;;  %v1032_v42 = vmul.f32 0.0, %v4337_v59 }
 0x13a   : > { %v1225_v15 = vadd.f32 %v1204_v32, %v1129_v44  ;;  %v1133_v45 = vadd.f32 %v1111_v61, %v1037_v31 }
 0x13b   : > { %v1189_v0 = vpop.permute.xlu0 %1188  ;;  %v4432_v51 = vpop.permute.xlu1 %1186  ;;  %v1128_v44 = vadd.f32 %v4364_v27, %v1032_v42 }
 0x13c   : > { %v1206_v43 = vsel %vm683_vm0, %v4432_v51, %v1189_v0 }
 0x13d   : > { %969 = vrot.lane.b32.xlu0 %v940_v56, %s3999_s15  ;;  %959 = vrot.lane.b32.xlu1 %v935_v48, %s3999_s15  ;;  %v1130_v56 = vadd.f32 %v1109_v36, %v1034_v38  ;;  %v1035_v38 = vmul.f32 0.0, %v4305_v40 }
 0x13f   : > { %v4443_v20 = vpop.permute.xlu0 %815  ;;  %v1191_v24 = vpop.permute.xlu1 %1190  ;;  %v1226_v14 = vadd.f32 %v1205_v46, %v1130_v56  ;;  %v1131_v56 = vadd.f32 %v4388_v41, %v1035_v38 }
 0x140   : > { %v1207_v35 = vsel %vm683_vm0, %v1189_v0, %v1191_v24 }
 0x141   : > { %965 = vrot.lane.b32.xlu0 %v938_v18, %s3999_s15  ;;  %961 = vrot.lane.b32.xlu1 %v936_v23, %s3999_s15  ;;  %v1229_v24 = vadd.f32 %v1207_v35, %v1133_v45  ;;  %v1227_v40 = vadd.f32 %v4432_v51, %v1131_v56 }
 0x143   : > { %v4448_v25 = vpop.permute.xlu0 %819  ;;  %v818_v30 = vpop.permute.xlu1 %817 }
 0x144   : > { %v825_v41 = vsel %vm574_vm1, %v4443_v20, %v818_v30 }
 0x145   : > { %967 = vrot.lane.b32.xlu1 %v939_v49, %s3999_s15  ;;  %v1132_v49 = vadd.f32 %v1110_v34, %v1036_v33  ;;  %v1224_v34 = vadd.f32 %v4409_v62, %v1128_v44  ;;  %v770_v33 = vmul.f32 %v4328_v57, %v4248_v50 }
 0x147   : > { %v4451_v21 = vpop.permute.xlu0 %1096  ;;  %v4453_v37 = vpop.permute.xlu1 %821  ;;  %v1228_v53 = vadd.f32 %v1206_v43, %v1132_v49  ;;  %v846_v45 = vadd.f32 %v825_v41, %v770_v33  ;;  %v774_v49 = vmul.f32 %v4332_v7, %v4264_v60 }
 0x14b   : > { %v4455_v28 = vpop.permute.xlu0 %1100  ;;  %v4457_v29 = vpop.permute.xlu1 %1098 }
 0x14c   : > { %v1113_v56 = vsel %vm574_vm1, %v4457_v29, %v4455_v28 }
 0x14f   : > { %v4459_v3 = vpop.permute.xlu0 %1104  ;;  %v4461_v58 = vpop.permute.xlu1 %1102 }
 0x153   : > { %v4474_v47 = vpop.permute.xlu0 %1247  ;;  %v4476_v48 = vpop.permute.xlu1 %1106 }
 0x154   : > { %v1259_v27 = vmul.f32 %v4474_v47, %v1227_v40  ;;  %v772_v40 = vmul.f32 0.0, %v4332_v7 }
 0x157   : > { %v4491_v23 = vpop.permute.xlu0 %903  ;;  %v4493_v18 = vpop.permute.xlu1 %1249 }
 0x158   : > { %v1258_v39 = vmul.f32 %v4493_v18, %v1226_v14  ;;  %v4500_v52 = vsel %vm1251_vm2, %v4474_v47, %v4493_v18  ;;  %v1261_v32 = vmul.f32 %v4493_v18, %v1229_v24  ;;  %v771_v14 = vmul.f32 %v4328_v57, %v4254_v54 }
 0x159   : > { %v1257_v36 = vmul.f32 %v4500_v52, %v1225_v15  ;;  %v1260_v61 = vmul.f32 %v4500_v52, %v1228_v53  ;;  %v1256_v15 = vmul.f32 %v4474_v47, %v1224_v34  ;;  %v850_v53 = vadd.f32 %v4453_v37, %v774_v49 }
 0x15a   : > { %1284 = vrot.lane.b32.xlu0 %v1258_v39, %s4000_s16  ;;  %v847_v62 = vadd.f32 %v818_v30, %v771_v14  ;;  %v773_v30 = vmul.f32 %v4332_v7, %v4257_v55  ;;  %v769_v14 = vmul.f32 0.0, %v4328_v57  ;;  %v1114_v57 = vsel %vm574_vm1, %v4461_v58, %v4459_v3 }
 0x15b   : > { %v908_v46 = vpop.permute.xlu0 %907  ;;  %v906_v0 = vpop.permute.xlu1 %905  ;;  %1282 = vrot.lane.b32.xlu1 %v1257_v36, %s4000_s16  ;;  %v826_v36 = vsel %vm574_vm1, %v4448_v25, %v4453_v37  ;;  %v1112_v37 = vsel %vm574_vm1, %v4451_v21, %v4457_v29 }
 0x15c   : > { %v920_v51 = vsel %vm683_vm0, %v906_v0, %v908_v46  ;;  %v919_v35 = vsel %vm683_vm0, %v4491_v23, %v906_v0  ;;  %v849_v0 = vadd.f32 %v826_v36, %v773_v30  ;;  %v845_v7 = vadd.f32 %v4443_v20, %v769_v14 }
 0x15d   : > { %v943_v38 = vadd.f32 %v920_v51, %v847_v62  ;;  %v942_v24 = vadd.f32 %v919_v35, %v846_v45  ;;  %v1043_v20 = vmul.f32 %v4347_v63, %v4264_v60 }
 0x15e   : > { %1290 = vrot.lane.b32.xlu0 %v1261_v32, %s4000_s16  ;;  %v941_v49 = vadd.f32 %v4491_v23, %v845_v7 }
 0x15f   : > { %v912_v59 = vpop.permute.xlu0 %911  ;;  %v910_v31 = vpop.permute.xlu1 %909  ;;  %1288 = vrot.lane.b32.xlu1 %v1260_v61, %s4000_s16  ;;  %v1040_v61 = vmul.f32 %v4341_v6, %v4254_v54 }
 0x160   : > { %v921_v46 = vsel %vm683_vm0, %v910_v31, %v912_v59 }
 0x161   : > { %v945_v28 = vadd.f32 %v921_v46, %v849_v0  ;;  %v1136_v33 = vadd.f32 %v1113_v56, %v1040_v61 }
 0x162   : > { %1286 = vrot.lane.b32.xlu0 %v1259_v27, %s4000_s16  ;;  %v848_v27 = vadd.f32 %v4448_v25, %v772_v40  ;;  %v1115_v25 = vsel %vm574_vm1, %v4459_v3, %v4476_v48  ;;  %v1041_v3 = vmul.f32 0.0, %v4347_v63 }
 0x163   : > { %v1193_v43 = vpop.permute.xlu0 %1192  ;;  %v914_v39 = vpop.permute.xlu1 %913  ;;  %1280 = vrot.lane.b32.xlu1 %v1256_v15, %s4000_s16 }
 0x164   : > { %v922_v42 = vsel %vm683_vm0, %v912_v59, %v914_v39  ;;  %v1039_v59 = vmul.f32 %v4341_v6, %v4248_v50  ;;  %v944_v35 = vadd.f32 %v910_v31, %v848_v27  ;;  %v1042_v39 = vmul.f32 %v4347_v63, %v4257_v55 }
 0x165   : > { %v946_v34 = vadd.f32 %v922_v42, %v850_v53  ;;  %v1038_v53 = vmul.f32 0.0, %v4341_v6  ;;  %v1137_v56 = vadd.f32 %v4461_v58, %v1041_v3 }
 0x166   : > { %975 = vrot.lane.b32.xlu0 %v943_v38, %s3999_s15  ;;  %v1135_v15 = vadd.f32 %v1112_v37, %v1039_v59  ;;  %v1138_v30 = vadd.f32 %v1114_v57, %v1042_v39 }
 0x167   : > { %v1197_v32 = vpop.permute.xlu0 %1196  ;;  %v1195_v44 = vpop.permute.xlu1 %1194  ;;  %973 = vrot.lane.b32.xlu1 %v942_v24, %s3999_s15  ;;  %v1139_v24 = vadd.f32 %v1115_v25, %v1043_v20 }
 0x168   : > { %v1209_v41 = vsel %vm683_vm0, %v1195_v44, %v1197_v32  ;;  %v1208_v51 = vsel %vm683_vm0, %v1193_v43, %v1195_v44  ;;  %v1134_v32 = vadd.f32 %v4451_v21, %v1038_v53 }
 0x169   : > { %v1232_v45 = vadd.f32 %v1209_v41, %v1136_v33  ;;  %v1231_v36 = vadd.f32 %v1208_v51, %v1135_v15 }
 0x16a   : > { %981 = vrot.lane.b32.xlu0 %v946_v34, %s3999_s15  ;;  %v1230_v61 = vadd.f32 %v1193_v43, %v1134_v32 }
 0x16b   : > { %v1201_v29 = vpop.permute.xlu0 %1200  ;;  %v1199_v62 = vpop.permute.xlu1 %1198  ;;  %979 = vrot.lane.b32.xlu1 %v945_v28, %s3999_s15  ;;  %v1264_v48 = vmul.f32 %v4493_v18, %v1232_v45  ;;  %v1263_v23 = vmul.f32 %v4500_v52, %v1231_v36  ;;  %v4619_v36 = vpack.c.bf16 %v4212_v22, %v4203_v16 }
 0x16c   : > { %v1210_v38 = vsel %vm683_vm0, %v1199_v62, %v1201_v29  ;;  %v1233_v63 = vadd.f32 %v1199_v62, %v1137_v56  ;;  %v1262_v58 = vmul.f32 %v4474_v47, %v1230_v61 }
 0x16d   : > { %v1234_v46 = vadd.f32 %v1210_v38, %v1138_v30  ;;  %v4623_v38 = vpack.c.bf16 %v4206_v17, %v4199_v13  ;;  %1464 = vmatprep.subr.bf16.mxu1 %v4619_v36  ;;  %3645 = vmatprep.subr.bf16.mxu0 %v4619_v36 }
 0x16e   : > { %977 = vrot.lane.b32.xlu0 %v944_v35, %s3999_s15  ;;  %v1265_v6 = vmul.f32 %v4474_v47, %v1233_v63 }
 0x16f   : > { %v1203_v42 = vpop.permute.xlu1 %1202  ;;  %971 = vrot.lane.b32.xlu1 %v941_v49, %s3999_s15  ;;  %v1266_v40 = vmul.f32 %v4500_v52, %v1234_v46  ;;  %1465 = vmatpush1.bf16.msra.mxu1 %v4623_v38  ;;  %s4003_s15 = smov 98  }
 0x170   : > { %v1211_v31 = vsel %vm683_vm0, %v1201_v29, %v1203_v42  ;;  %3646 = vmatpush1.bf16.msra.mxu0 %v4623_v38 }
 0x171   : > { %v1235_v0 = vadd.f32 %v1211_v31, %v1139_v24 }
 0x172   : > { %1296 = vrot.lane.b32.xlu0 %v1264_v48, %s4000_s16 }
 0x173   : > { %v1267_v44 = vmul.f32 %v4493_v18, %v1235_v0  ;;  %1294 = vrot.lane.b32.xlu1 %v1263_v23, %s4000_s16 }
 0x176   : > { %1302 = vrot.lane.b32.xlu0 %v1267_v44, %s4000_s16 }
 0x177   : > { %1300 = vrot.lane.b32.xlu1 %v1266_v40, %s4000_s16 }
 0x17a   : > { %1298 = vrot.lane.b32.xlu0 %v1265_v6, %s4000_s16 }
 0x17b   : > { %1292 = vrot.lane.b32.xlu1 %v1262_v58, %s4000_s16 }
 0x17c   : > { %v481_v21 = vpop.permute.xlu0 %480 }
 0x17d   : > { %v500_v23 = vmul.f32 %v481_v21, %v4203_v16  ;;  %v499_v63 = vmul.f32 %v481_v21, %v4199_v13  ;;  %v498_v58 = vmul.f32 0.0, %v481_v21 }
 0x180   : > { %v4589_v18 = vpop.permute.xlu0 %495  ;;  %v4591_v37 = vpop.permute.xlu1 %485 }
 0x181   : > { %v503_v56 = vmul.f32 %v4591_v37, %v4212_v22  ;;  %v502_v12 = vmul.f32 %v4591_v37, %v4206_v17 }
 0x184   : > { %v555_v43 = vpop.permute.xlu0 %554  ;;  %v4593_v34 = vpop.permute.xlu1 %490 }
 0x185   : > { %v597_v61 = vadd.f32 %v555_v43, %v500_v23 }
 0x188   : > { %v561_v52 = vpop.permute.xlu0 %560  ;;  %v553_v59 = vpop.permute.xlu1 %552 }
 0x189   : > { %v576_v32 = vsel %vm574_vm1, %v553_v59, %v555_v43 }
 0x18a   : > { %v596_v16 = vadd.f32 %v576_v32, %v499_v63 }
 0x18c   : > { %v557_v14 = vpop.permute.xlu0 %556  ;;  %v559_v28 = vpop.permute.xlu1 %558 }
 0x18d   : > { %v578_v6 = vsel %vm574_vm1, %v559_v28, %v561_v52  ;;  %v577_v63 = vsel %vm574_vm1, %v557_v14, %v559_v28 }
 0x18e   : > { %v599_v17 = vadd.f32 %v578_v6, %v502_v12  ;;  %v4677_v6 = vstv %s4645_s17  ;;  %s4009_s17 = smov 83  }
 0x190   : > { %v662_v41 = vpop.permute.xlu0 %661  ;;  %v551_v27 = vpop.permute.xlu1 %550 }
 0x194   : > { %v4595_v33 = vpop.permute.xlu0 %665  ;;  %v4597_v47 = vpop.permute.xlu1 %659 }
 0x195   : > { %v684_v40 = vsel %vm683_vm0, %v4597_v47, %v662_v41 }
 0x196   : > { %v705_v11 = vadd.f32 %v684_v40, %v596_v16 }
 0x198   : > { %v670_v51 = vpop.permute.xlu0 %669  ;;  %v664_v7 = vpop.permute.xlu1 %663 }
 0x199   : > { %v685_v44 = vsel %vm683_vm0, %v662_v41, %v664_v7  ;;  %v600_v7 = vadd.f32 %v561_v52, %v503_v56  ;;  %v575_v41 = vsel %vm574_vm1, %v551_v27, %v553_v59  ;;  %v4670_v27 = vpack.c.bf16 %v4257_v55, %v4248_v50 }
 0x19a   : > { %v706_v22 = vadd.f32 %v685_v44, %v597_v61  ;;  %v595_v40 = vadd.f32 %v575_v41, %v498_v58 }
 0x19c   : > { %v4599_v15 = vpop.permute.xlu0 %566  ;;  %v668_v29 = vpop.permute.xlu1 %667 }
 0x19d   : > { %v687_v13 = vsel %vm683_vm0, %v668_v29, %v670_v51  ;;  %v686_v32 = vsel %vm683_vm0, %v4595_v33, %v668_v29  ;;  %v4665_v51 = vpack.c.bf16 %v4264_v60, %v4254_v54  ;;  %v501_v29 = vmul.f32 0.0, %v4591_v37 }
 0x19e   : > { %v709_v56 = vadd.f32 %v687_v13, %v600_v7  ;;  %v708_v14 = vadd.f32 %v686_v32, %v599_v17 }
 0x19f   : > { %1466 = vmatprep.subr.bf16.mxu1 %v4665_v51  ;;  %3647 = vmatprep.subr.bf16.mxu0 %v4665_v51 }
 0x1a0   : > { %v4601_v62 = vpop.permute.xlu0 %572  ;;  %v4603_v57 = vpop.permute.xlu1 %564  ;;  %1467 = vmatpush1.bf16.msra.mxu1 %v4670_v27  ;;  %3648 = vmatpush1.bf16.msra.mxu0 %v4670_v27 }
 0x1a4   : > { %v4605_v25 = vpop.permute.xlu0 %728  ;;  %v4607_v35 = vpop.permute.xlu1 %570 }
 0x1a5   : > { %v737_v21 = vmul.f32 %v4605_v25, %v706_v22  ;;  %v740_v12 = vmul.f32 %v4605_v25, %v709_v56  ;;  %v598_v22 = vadd.f32 %v577_v63, %v501_v29 }
 0x1a7   : > { %v707_v32 = vadd.f32 %v4595_v33, %v598_v22 }
 0x1a8   : > { %v4609_v45 = vpop.permute.xlu0 %568  ;;  %v4611_v39 = vpop.permute.xlu1 %726 }
 0x1a9   : > { %v4655_v23 = vsel %vm730_vm3, %v4611_v39, %v4605_v25  ;;  %vm1398_vm3 = vcmask 138240  }
 0x1aa   : > { %v736_v59 = vmul.f32 %v4655_v23, %v705_v11  ;;  %v739_v13 = vmul.f32 %v4655_v23, %v708_v14  ;;  %v738_v14 = vmul.f32 %v4611_v39, %v707_v32 }
 0x1ac   : > { %v4613_v20 = vpop.permute.xlu0 %673  ;;  %v4615_v49 = vpop.permute.xlu1 %562 }
 0x1b0   : > { %v4629_v30 = vpop.permute.xlu0 %677  ;;  %v4631_v24 = vpop.permute.xlu1 %671 }
 0x1b4   : > { %v4633_v42 = vpop.permute.xlu1 %675  ;;  %v4635_v3 = vpop.permute.xlu0 %681 }
 0x1b8   : > { %v4637_v48 = vpop.permute.xlu1 %679  ;;  %v964_v31 = vpop.permute.xlu0 %963 }
 0x1b9   : > { %v1006_v61 = vadd.f32 %v964_v31, %v737_v21  ;;  %v704_v21 = vadd.f32 %v4597_v47, %v595_v40 }
 0x1bc   : > { %v960_v53 = vpop.permute.xlu1 %959  ;;  %v970_v46 = vpop.permute.xlu0 %969 }
 0x1bd   : > { %v1009_v7 = vadd.f32 %v970_v46, %v740_v12 }
 0x1c0   : > { %v962_v0 = vpop.permute.xlu1 %961  ;;  %v966_v43 = vpop.permute.xlu0 %965 }
 0x1c1   : > { %v985_v52 = vsel %vm983_vm4, %v962_v0, %v964_v31  ;;  %v984_v17 = vsel %vm983_vm4, %v960_v53, %v962_v0 }
 0x1c2   : > { %v1005_v16 = vadd.f32 %v985_v52, %v736_v59 }
 0x1c4   : > { %v968_v44 = vpop.permute.xlu1 %967 }
 0x1c5   : > { %v987_v37 = vsel %vm983_vm4, %v968_v44, %v970_v46  ;;  %v735_v46 = vmul.f32 %v4611_v39, %v704_v21 }
 0x1c6   : > { %v1008_v63 = vadd.f32 %v987_v37, %v739_v13 }
 0x1c7   : > { %v1004_v0 = vadd.f32 %v984_v17, %v735_v46  ;;  %v505_v46 = vmul.f32 %v4593_v34, %v4248_v50  ;;  %v508_v50 = vmul.f32 %v4589_v18, %v4257_v55  ;;  %v504_v55 = vmul.f32 0.0, %v4593_v34 }
 0x1cc   : > { %v1285_v28 = vpop.permute.xlu0 %1284 }
 0x1cd   : > { %v1327_v31 = vadd.f32 %v1285_v28, %v1006_v61  ;;  %v1283_v11 = vpop.permute.xlu1 %1282  ;;  %v986_v61 = vsel %vm983_vm4, %v966_v43, %v968_v44 }
 0x1ce   : > { %v1306_v58 = vsel %vm1304_vm5, %v1283_v11, %v1285_v28  ;;  %v1007_v40 = vadd.f32 %v986_v61, %v738_v14  ;;  %v506_v61 = vmul.f32 %v4593_v34, %v4254_v54 }
 0x1cf   : > { %v1326_v41 = vadd.f32 %v1306_v58, %v1005_v16  ;;  %v1352_v52 = vmul.f32 %v4677_v6, %v1327_v31  ;;  %vm1339_vm6 = vcmp.gt.f32.partialorder %v1327_v31, 0.0 }
 0x1d0   : > { %v1291_v56 = vpop.permute.xlu0 %1290  ;;  %v603_v54 = vadd.f32 %v4599_v15, %v506_v61 }
 0x1d1   : > { %v1330_v59 = vadd.f32 %v1291_v56, %v1009_v7  ;;  %v1289_v29 = vpop.permute.xlu1 %1288  ;;  %v1351_v33 = vmul.f32 %v4677_v6, %v1326_v41  ;;  %v1364_v12 = vsel %vm1339_vm6, %v1327_v31, %v1352_v52  ;;  %vm1338_vm8 = vcmp.gt.f32.partialorder %v1326_v41, 0.0 }
 0x1d2   : > { %v1308_v28 = vsel %vm1304_vm5, %v1289_v29, %v1291_v56 }
 0x1d3   : > { %vm1342_vm7 = vcmp.gt.f32.partialorder %v1330_v59, 0.0  ;;  %v1355_v47 = vmul.f32 %v4677_v6, %v1330_v59  ;;  %v1329_v53 = vadd.f32 %v1308_v28, %v1008_v63  ;;  %v1363_v21 = vsel %vm1338_vm8, %v1326_v41, %v1351_v33 }
 0x1d4   : > { %v1287_v43 = vpop.permute.xlu0 %1286  ;;  %v689_v41 = vsel %vm683_vm0, %v4613_v20, %v4633_v42  ;;  %v688_v28 = vsel %vm683_vm0, %v4631_v24, %v4613_v20  ;;  %v582_v42 = vsel %vm574_vm1, %v4607_v35, %v4601_v62 }
 0x1d5   : > { %v1367_v44 = vsel %vm1342_vm7, %v1330_v59, %v1355_v47  ;;  %vm1341_vm9 = vcmp.gt.f32.partialorder %v1329_v53, 0.0  ;;  %v1354_v16 = vmul.f32 %v4677_v6, %v1329_v53  ;;  %v1307_v22 = vsel %vm1304_vm5, %v1287_v43, %v1289_v29  ;;  %v1281_v37 = vpop.permute.xlu1 %1280 }
 0x1d6   : > { %v1328_v58 = vadd.f32 %v1307_v22, %v1007_v40  ;;  %v1305_v7 = vsel %vm1304_vm5, %v1281_v37, %v1283_v11  ;;  %v1376_v13 = vpack.c.bf16 %v1367_v44, %v1364_v12  ;;  %v580_v11 = vsel %vm574_vm1, %v4603_v57, %v4599_v15 }
 0x1d7   : > { %v1325_v32 = vadd.f32 %v1305_v7, %v1004_v0  ;;  %v1366_v56 = vsel %vm1341_vm9, %v1329_v53, %v1354_v16  ;;  %v509_v53 = vmul.f32 %v4589_v18, %v4264_v60  ;;  %v602_v0 = vadd.f32 %v580_v11, %v505_v46 }
 0x1d8   : > { %vm1340_vm10 = vcmp.gt.f32.partialorder %v1328_v58, 0.0  ;;  %v1353_v17 = vmul.f32 %v4677_v6, %v1328_v58  ;;  %v976_v31 = vpop.permute.xlu0 %975  ;;  %1390 = vrot.lane.b32.xlu0 %v1376_v13, %s4001_s18  ;;  %v1375_v52 = vpack.c.bf16 %v1366_v56, %v1363_v21  ;;  %v712_v40 = vadd.f32 %v689_v41, %v603_v54 }
 0x1d9   : > { %vm1337_vm11 = vcmp.gt.f32.partialorder %v1325_v32, 0.0  ;;  %v1350_v63 = vmul.f32 %v4677_v6, %v1325_v32  ;;  %v974_v59 = vpop.permute.xlu1 %973  ;;  %v691_v15 = vsel %vm683_vm0, %v4637_v48, %v4635_v3  ;;  %v606_v20 = vadd.f32 %v4601_v62, %v509_v53 }
 0x1da   : > { %v1365_v29 = vsel %vm1340_vm10, %v1328_v58, %v1353_v17  ;;  %1388 = vrot.lane.b32.xlu1 %v1375_v52, %s4001_s18  ;;  %v579_v60 = vsel %vm574_vm1, %v4615_v49, %v4603_v57  ;;  %v711_v43 = vadd.f32 %v688_v28, %v602_v0  ;;  %v690_v44 = vsel %vm683_vm0, %v4629_v30, %v4637_v48 }
 0x1db   : > { %v1362_v14 = vsel %vm1337_vm11, %v1325_v32, %v1350_v63  ;;  %v605_v16 = vadd.f32 %v582_v42, %v508_v50  ;;  %v581_v3 = vsel %vm574_vm1, %v4609_v45, %v4607_v35  ;;  %v743_v37 = vmul.f32 %v4605_v25, %v712_v40 }
 0x1dc   : > { %v982_v33 = vpop.permute.xlu0 %981  ;;  %v1374_v47 = vpack.c.bf16 %v1365_v29, %v1362_v14  ;;  %v715_v62 = vadd.f32 %v691_v15, %v606_v20  ;;  %v507_v7 = vmul.f32 0.0, %v4589_v18  ;;  %v601_v57 = vadd.f32 %v579_v60, %v504_v55 }
 0x1dd   : > { %v980_v12 = vpop.permute.xlu1 %979  ;;  %v714_v49 = vadd.f32 %v690_v44, %v605_v16  ;;  %v989_v13 = vsel %vm983_vm4, %v974_v59, %v976_v31  ;;  %v1012_v32 = vadd.f32 %v976_v31, %v743_v37  ;;  %v742_v48 = vmul.f32 %v4655_v23, %v711_v43 }
 0x1de   : > { %1386 = vrot.lane.b32.xlu1 %v1374_v47, %s4001_s18  ;;  %v604_v21 = vadd.f32 %v581_v3, %v507_v7  ;;  %v746_v17 = vmul.f32 %v4605_v25, %v715_v62  ;;  %v991_v35 = vsel %vm983_vm4, %v980_v12, %v982_v33  ;;  %v710_v18 = vadd.f32 %v4631_v24, %v601_v57 }
 0x1df   : > { %v1011_v56 = vadd.f32 %v989_v13, %v742_v48  ;;  %v745_v63 = vmul.f32 %v4655_v23, %v714_v49  ;;  %v1425_v13 = vld [vmem:[%s6289_s7 + $0x10] sm:$0xff] }
 0x1e0   : > { %v978_v22 = vpop.permute.xlu0 %977  ;;  %v713_v61 = vadd.f32 %v4629_v30, %v604_v21  ;;  %v1015_v31 = vadd.f32 %v982_v33, %v746_v17  ;;  %v741_v24 = vmul.f32 %v4611_v39, %v710_v18  ;;  %v4784_v48 = vld [vmem:[%s6284_s2 + $0x10] sm:$0xff]  ;;  %v4797_v21 = vld [vmem:[%s6284_s2 + $0x18] sm:$0xff]  ;;  %v6334_v17 = vmov 0  }
 0x1e1   : > { %v972_v58 = vpop.permute.xlu1 %971  ;;  %v1014_v29 = vadd.f32 %v991_v35, %v745_v63  ;;  %v990_v25 = vsel %vm983_vm4, %v978_v22, %v980_v12  ;;  %v1426_v35 = vld [vmem:[%s6289_s7 + $0x18] sm:$0xff] }
 0x1e2   : > { %v988_v14 = vsel %vm983_vm4, %v972_v58, %v974_v59  ;;  %v744_v30 = vmul.f32 %v4611_v39, %v713_v61  ;;  %v1423_v58 = vld [vmem:[%s6289_s7] sm:$0xff]  ;;  %vm1457_vm4 = vcmask 523264  }
 0x1e3   : > { %v1010_v40 = vadd.f32 %v988_v14, %v741_v24 }
 0x1e4   : > { %v1297_v34 = vpop.permute.xlu0 %1296  ;;  %v1013_v42 = vadd.f32 %v990_v25, %v744_v30  ;;  %v3953_v25 = vld [vmem:[%s6288_s6 + $0x8] sm:$0xff]  }
 0x1e5   : > { %v1333_v45 = vadd.f32 %v1297_v34, %v1012_v32  ;;  %v1295_v52 = vpop.permute.xlu1 %1294  ;;  %v4777_v32 = vld [vmem:[%s6284_s2] sm:$0xff] }
 0x1e6   : > { %v1310_v11 = vsel %vm1304_vm5, %v1295_v52, %v1297_v34  ;;  %v6333_v34 = vmov 2  }
 0x1e7   : > { %v1332_v41 = vadd.f32 %v1310_v11, %v1011_v56  ;;  %v1358_v46 = vmul.f32 %v4677_v6, %v1333_v45  ;;  %vm1345_vm12 = vcmp.gt.f32.partialorder %v1333_v45, 0.0  ;;  %v1424_v56 = vld [vmem:[%s6289_s7 + $0x8] sm:$0xff] }
 0x1e8   : > { %v1303_v54 = vpop.permute.xlu0 %1302 }
 0x1e9   : > { %v1336_v28 = vadd.f32 %v1303_v54, %v1015_v31  ;;  %v1301_v47 = vpop.permute.xlu1 %1300  ;;  %v1357_v33 = vmul.f32 %v4677_v6, %v1332_v41  ;;  %v1370_v12 = vsel %vm1345_vm12, %v1333_v45, %v1358_v46  ;;  %vm1344_vm14 = vcmp.gt.f32.partialorder %v1332_v41, 0.0 }
 0x1ea   : > { %v1312_v23 = vsel %vm1304_vm5, %v1301_v47, %v1303_v54  ;;  %v3952_v54 = vld [vmem:[%s6288_s6] sm:$0xff]  }
 0x1eb   : > { %vm1348_vm13 = vcmp.gt.f32.partialorder %v1336_v28, 0.0  ;;  %v1361_v53 = vmul.f32 %v4677_v6, %v1336_v28  ;;  %v1335_v0 = vadd.f32 %v1312_v23, %v1014_v29  ;;  %v1369_v55 = vsel %vm1344_vm14, %v1332_v41, %v1357_v33 }
 0x1ec   : > { %v1299_v59 = vpop.permute.xlu0 %1298  ;;  %vm2337_vm14 = vcmask 801792  }
 0x1ed   : > { %v1373_v50 = vsel %vm1348_vm13, %v1336_v28, %v1361_v53  ;;  %vm1347_vm15 = vcmp.gt.f32.partialorder %v1335_v0, 0.0  ;;  %v1360_v15 = vmul.f32 %v4677_v6, %v1335_v0  ;;  %v1311_v20 = vsel %vm1304_vm5, %v1299_v59, %v1301_v47  ;;  %v1293_v39 = vpop.permute.xlu1 %1292 }
 0x1ee   : > { %v1334_v60 = vadd.f32 %v1311_v20, %v1013_v42  ;;  %v1309_v43 = vsel %vm1304_vm5, %v1293_v39, %v1295_v52  ;;  %v1379_v44 = vpack.c.bf16 %v1373_v50, %v1370_v12  ;;  %v3815_v50 = vld [vmem:[%s6286_s4 + $0x3] ss:$8 sm:$0x3] }
 0x1ef   : > { %v1331_v16 = vadd.f32 %v1309_v43, %v1010_v40  ;;  %v1372_v22 = vsel %vm1347_vm15, %v1335_v0, %v1360_v15  ;;  %v2328_v20 = vrot.slane %v3815_v50, %v4273_v19  ;;  %vm1817_vm15 = vcmask 769024  }
 0x1f0   : > { %vm1346_vm1 = vcmp.gt.f32.partialorder %v1334_v60, 0.0  ;;  %v1359_v3 = vmul.f32 %v4677_v6, %v1334_v60  ;;  %1396 = vrot.lane.b32.xlu1 %v1379_v44, %s4001_s18  ;;  %v1378_v37 = vpack.c.bf16 %v1372_v22, %v1369_v55  ;;  %v2332_v44 = vrot.slane %v3815_v50, %v4283_v26 }
 0x1f1   : > { %vm1343_vm2 = vcmp.gt.f32.partialorder %v1331_v16, 0.0  ;;  %v1356_v62 = vmul.f32 %v4677_v6, %v1331_v16  ;;  %v4772_v6 = vld [vmem:[%s6284_s2 + $0x8] sm:$0xff] }
 0x1f2   : > { %v1371_v7 = vsel %vm1346_vm1, %v1334_v60, %v1359_v3  ;;  %1394 = vrot.lane.b32.xlu0 %v1378_v37, %s4001_s18  ;;  %vm2390_vm1 = vcmask 1014784  }
 0x1f3   : > { %v1368_v57 = vsel %vm1343_vm2, %v1331_v16, %v1356_v62 }
 0x1f4   : > { %1429 = vperm.xlu1 %3900, %v1423_v58   ;;  %v1377_v49 = vpack.c.bf16 %v1371_v7, %v1368_v57 }
 0x1f6   : > { %1392 = vrot.lane.b32.xlu0 %v1377_v49, %s4001_s18 }
 0x1f8   : > { %1439 = vperm.xlu1 %3900, %v1425_v13  }
 0x1fa   : > { %2231 = vperm.xlu0 %3905, %v4772_v6  }
 0x1fc   : > { %3901 = vset.pattern.permute.xlu1 %v6311_v1 }
 0x1fd   : > { %1863 = vperm.xlu1 %3901, %v4777_v32  }
 0x1fe   : > { %3907 = vset.pattern.permute.xlu0 %v6307_v2 }
 0x1ff   : > { %2139 = vperm.xlu0 %3907, %v4784_v48  }
 0x201   : > { %3902 = vset.pattern.permute.xlu1 %v6307_v2 }
 0x202   : > { %2131 = vperm.xlu1 %3902, %v4777_v32  }
 0x203   : > { %3908 = vset.pattern.permute.xlu0 %v6305_v5 }
 0x204   : > { %1939 = vperm.xlu0 %3908, %v4777_v32  }
 0x206   : > { %2135 = vperm.xlu1 %3902, %v4772_v6  }
 0x208   : > { %1951 = vperm.xlu0 %3908, %v4797_v21  }
 0x20a   : > { %3903 = vset.pattern.permute.xlu1 %v6305_v5 }
 0x20b   : > { %1943 = vperm.xlu1 %3903, %v4772_v6  }
 0x20c   : > { %3914 = vset.pattern.permute.xlu0 %v6303_v8 }
 0x20d   : > { %1711 = vperm.xlu0 %3914, %v4772_v6  }
 0x20f   : > { %3904 = vset.pattern.permute.xlu1 %v6309_v4 }
 0x210   : > { %2227 = vperm.xlu1 %3904, %v4777_v32  }
 0x211   : > { %3915 = vset.pattern.permute.xlu0 %v6301_v9 }
 0x212   : > { %1599 = vperm.xlu0 %3915, %v4777_v32  }
 0x214   : > { %3906 = vset.pattern.permute.xlu1 %v6311_v1 }
 0x215   : > { %1871 = vperm.xlu1 %3906, %v4784_v48  }
 0x216   : > { %1611 = vperm.xlu0 %3915, %v4797_v21  }
 0x219   : > { %1875 = vperm.xlu1 %3906, %v4797_v21  }
 0x21a   : > { %3920 = vset.pattern.permute.xlu0 %v6299_v10 }
 0x21b   : > { %1843 = vperm.xlu0 %3920, %v4784_v48  }
 0x21d   : > { %3909 = vset.pattern.permute.xlu1 %v6307_v2 }
 0x21e   : > { %2143 = vperm.xlu1 %3909, %v4797_v21  }
 0x21f   : > { %3921 = vset.pattern.permute.xlu0 %v6333_v34 }
 0x220   : > { %2103 = vperm.xlu0 %3921, %v4777_v32  }
 0x222   : > { %3910 = vset.pattern.permute.xlu1 %v6305_v5 }
 0x223   : > { %1947 = vperm.xlu1 %3910, %v4784_v48  }
 0x224   : > { %2115 = vperm.xlu0 %3921, %v4797_v21  }
 0x227   : > { %3911 = vset.pattern.permute.xlu1 %v6309_v4 }
 0x228   : > { %2235 = vperm.xlu1 %3911, %v4784_v48   ;;  %3924 = vset.pattern.permute.xlu0 %v6334_v17 }
 0x229   : > { %1434 = vperm.xlu0 %3924, %v1424_v56  }
 0x22c   : > { %2239 = vperm.xlu1 %3911, %v4797_v21  }
 0x22d   : > { %1444 = vperm.xlu0 %3924, %v1426_v35  }
 0x230   : > { %3912 = vset.pattern.permute.xlu1 %v6301_v9 }
 0x231   : > { %1603 = vperm.xlu1 %3912, %v4772_v6  }
 0x235   : > { %3913 = vset.pattern.permute.xlu1 %v6303_v8 }
 0x236   : > { %1707 = vperm.xlu1 %3913, %v4777_v32  }
 0x23a   : > { %3916 = vset.pattern.permute.xlu1 %v6299_v10 }
 0x23b   : > { %1835 = vperm.xlu1 %3916, %v4777_v32  }
 0x23f   : > { %1839 = vperm.xlu1 %3916, %v4772_v6  }
 0x243   : > { %3917 = vset.pattern.permute.xlu1 %v6333_v34 }
 0x244   : > { %2107 = vperm.xlu1 %3917, %v4772_v6  }
 0x248   : > { %3918 = vset.pattern.permute.xlu1 %v6301_v9 }
 0x249   : > { %1607 = vperm.xlu1 %3918, %v4784_v48  }
 0x24a   : > { %v1391_v45 = vpop.permute.xlu0 %1390 }
 0x24c   : > { %v1389_v52 = vpop.permute.xlu1 %1388 }
 0x24d   : > { %v1400_v61 = vsel %vm1398_vm3, %v1389_v52, %v1391_v45  ;;  %3919 = vset.pattern.permute.xlu1 %v6303_v8 }
 0x24e   : > { %1468 = vmatprep.subr.bf16.mxu1 %v1400_v61  ;;  %3649 = vmatprep.subr.bf16.mxu0 %v1400_v61 }
 0x24f   : > { %1715 = vperm.xlu1 %3919, %v4784_v48  }
 0x250   : > { %v1387_v18 = vpop.permute.xlu1 %1386 }
 0x251   : > { %v1399_v63 = vsel %vm1398_vm3, %v1387_v18, %v1389_v52 }
 0x252   : > { %1469 = vmatpush1.bf16.msra.mxu1 %v1399_v63  ;;  %3650 = vmatpush1.bf16.msra.mxu0 %v1399_v63 }
 0x253   : > { %1719 = vperm.xlu1 %3919, %v4797_v21  }
 0x257   : > { %3922 = vset.pattern.permute.xlu1 %v6299_v10 }
 0x258   : > { %1847 = vperm.xlu1 %3922, %v4797_v21  }
 0x25c   : > { %3923 = vset.pattern.permute.xlu1 %v6333_v34 }
 0x25d   : > { %2111 = vperm.xlu1 %3923, %v4784_v48  }
 0x261   : > { %3925 = vset.pattern.permute.xlu1 %v6334_v17 }
 0x262   : > { %v1397_v11 = vpop.permute.xlu1 %1396 }
 0x264   : > { %v1395_v31 = vpop.permute.xlu0 %1394 }
 0x265   : > { %v1402_v41 = vsel %vm1398_vm3, %v1395_v31, %v1397_v11 }
 0x266   : > { %1470 = vmatprep.subr.bf16.mxu1 %v1402_v41  ;;  %3651 = vmatprep.subr.bf16.mxu0 %v1402_v41 }
 0x268   : > { %v1393_v29 = vpop.permute.xlu0 %1392 }
 0x269   : > { %v1401_v46 = vsel %vm1398_vm3, %v1393_v29, %v1395_v31 }
 0x26a   : > { %1471 = vmatpush1.bf16.msra.mxu1 %v1401_v46  ;;  %3652 = vmatpush1.bf16.msra.mxu0 %v1401_v46 }
 0x26b   : > { %2553 = vmatprep.subr.bf16.mxu1 %v4619_v36 }
 0x26d   : > { %3811 = vmatmul.mubr.msk.bf16.vlgmr.msra.gmra.mrb[0].mxu1 %vm1457_vm4, %v3952_v54 }
 0x26e   : > { %2554 = vmatpush1.bf16.msra.mxu1 %v4623_v38  ;;  %1506 = vmatprep.mubr.bf16.mxu1 %v6334_v17 }
 0x26f   : > { %2555 = vmatprep.subr.bf16.mxu1 %v4665_v51 }
 0x272   : > { %2556 = vmatpush1.bf16.msra.mxu1 %v4670_v27 }
 0x273   : > { %v4866_v14 = vpop.permute.xlu1 %1429  ;;  %2557 = vmatprep.subr.bf16.mxu1 %v1400_v61 }
 0x275   : > { %3812 = vmatmul.mubr.msk.bf16.gmra.mrb[4].mxu1 %vm1457_vm4, %v3953_v25 }
 0x276   : > { %2558 = vmatpush1.bf16.msra.mxu1 %v1399_v63  ;;  %2585 = vmatprep.mubr.bf16.mxu1 %v6334_v17 }
 0x277   : > { %2559 = vmatprep.subr.bf16.mxu1 %v1402_v41  ;;  %v4870_v36 = vpop.permute.xlu1 %1439 }
 0x279   : > { %v4872_v38 = vpop.permute.xlu0 %2231 }
 0x27a   : > { %2560 = vmatpush1.bf16.msra.mxu1 %v1401_v46  ;;  %v2247_v42 = vmul.f32 0.0, %v4872_v38 }
 0x27c   : > { %v4874_v51 = vpop.permute.xlu1 %1863 }
 0x27e   : > { %v4876_v28 = vpop.permute.xlu0 %2139 }
 0x27f   : > { %v2154_v59 = vmul.f32 0.0, %v4876_v28 }
 0x281   : > { %v4878_v47 = vpop.permute.xlu1 %2131 }
 0x282   : > { %v2148_v27 = vmul.f32 0.0, %v4878_v47 }
 0x283   : > { %v4881_v30 = vpop.permute.xlu0 %1939 }
 0x284   : > { %2174 = vrot.lane.b32.xlu0 %v2148_v27, %s3996_s26  ;;  %v1956_v24 = vmul.f32 0.0, %v4881_v30 }
 0x285   : > { %v4885_v23 = vpop.permute.xlu1 %2135 }
 0x286   : > { %v2151_v33 = vmul.f32 0.0, %v4885_v23 }
 0x287   : > { %v4915_v16 = vpop.permute.xlu0 %1951 }
 0x288   : > { %1982 = vrot.lane.b32.xlu0 %v1956_v24, %s4002_s30  ;;  %2180 = vrot.lane.b32.xlu1 %v2151_v33, %s3996_s26  ;;  %v1965_v3 = vmul.f32 0.0, %v4915_v16 }
 0x28a   : > { %v4890_v53 = vpop.permute.xlu1 %1943 }
 0x28b   : > { %v1959_v0 = vmul.f32 0.0, %v4890_v53 }
 0x28c   : > { %v4932_v57 = vpop.permute.xlu0 %1711 }
 0x28d   : > { %1988 = vrot.lane.b32.xlu1 %v1959_v0, %s4002_s30 }
 0x28f   : > { %v4895_v40 = vpop.permute.xlu1 %2227 }
 0x290   : > { %v2244_v12 = vmul.f32 0.0, %v4895_v40 }
 0x291   : > { %2276 = vrot.lane.b32.xlu1 %v2247_v42, %s4002_s30  ;;  %v1600_v13 = vpop.permute.xlu0 %1599 }
 0x292   : > { %2270 = vrot.lane.b32.xlu0 %v2244_v12, %s4002_s30  ;;  %v1614_v56 = vmul.f32 0.0, %v1600_v13 }
 0x294   : > { %v4904_v15 = vpop.permute.xlu1 %1871 }
 0x295   : > { %v4947_v52 = vpop.permute.xlu0 %1611 }
 0x296   : > { %2186 = vrot.lane.b32.xlu0 %v2154_v59, %s3996_s26 }
 0x298   : > { %v4908_v39 = vpop.permute.xlu1 %1875 }
 0x29a   : > { %2333 = vrot.lane.b32.xlu0 %v2328_v20, %s4003_s15 }
 0x29d   : > { %v4910_v60 = vpop.permute.xlu1 %2143 }
 0x29e   : > { %v2157_v43 = vmul.f32 0.0, %v4910_v60 }
 0x2a0   : > { %2192 = vrot.lane.b32.xlu1 %v2157_v43, %s3996_s26 }
 0x2a2   : > { %v4917_v55 = vpop.permute.xlu1 %1947 }
 0x2a3   : > { %v1962_v22 = vmul.f32 0.0, %v4917_v55 }
 0x2a4   : > { %2335 = vrot.lane.b32.xlu1 %v2332_v44, %s4003_s15 }
 0x2a5   : > { %1994 = vrot.lane.b32.xlu0 %v1962_v22, %s4002_s30 }
 0x2a7   : > { %v4922_v37 = vpop.permute.xlu1 %2235 }
 0x2a8   : > { %v2250_v62 = vmul.f32 0.0, %v4922_v37  ;;  %2000 = vrot.lane.b32.xlu1 %v1965_v3, %s4002_s30 }
 0x2aa   : > { %2282 = vrot.lane.b32.xlu0 %v2250_v62, %s4002_s30 }
 0x2ab   : > { %v4927_v58 = vpop.permute.xlu1 %2239 }
 0x2ac   : > { %v2253_v7 = vmul.f32 0.0, %v4927_v58 }
 0x2ae   : > { %1568 = vperm.xlu0 %3924, %v4777_v32   ;;  %2288 = vrot.lane.b32.xlu1 %v2253_v7, %s4002_s30 }
 0x2b0   : > { %v4936_v49 = vpop.permute.xlu1 %1603 }
 0x2b1   : > { %v1617_v32 = vmul.f32 0.0, %v4936_v49 }
 0x2b2   : > { %1583 = vperm.xlu0 %3924, %v4797_v21   ;;  %1573 = vperm.xlu1 %3925, %v4772_v6   ;;  %v1727_v21 = vmul.f32 0.0, %v4932_v57 }
 0x2b5   : > { %v1708_v35 = vpop.permute.xlu1 %1707 }
 0x2b6   : > { %3926 = vset.pattern.permute.xlu0 %v6311_v1  ;;  %1578 = vperm.xlu1 %3925, %v4784_v48   ;;  %v1724_v45 = vmul.f32 0.0, %v1708_v35  ;;  %v4949_v48 = vpop.permute.xlu0 %1843 }
 0x2b7   : > { %1867 = vperm.xlu0 %3926, %v4772_v6  }
 0x2ba   : > { %1638 = vrot.lane.b32.xlu1 %v1614_v56, %s3996_s26  ;;  %v4951_v61 = vpop.permute.xlu0 %2103 }
 0x2bb   : > { %1644 = vrot.lane.b32.xlu0 %v1617_v32, %s3996_s26 }
 0x2be   : > { %1750 = vrot.lane.b32.xlu1 %v1724_v45, %s4002_s30  ;;  %v4953_v6 = vpop.permute.xlu0 %2115 }
 0x2bf   : > { %1756 = vrot.lane.b32.xlu0 %v1727_v21, %s4002_s30 }
 0x2c2   : > { %v1435_v18 = vpop.permute.xlu0 %1434 }
 0x2c6   : > { %v4955_v63 = vpop.permute.xlu0 %1444 }
 0x2f6   : > { %v4957_v11 = vpop.permute.xlu0 %2174 }
 0x2fa   : > { %v4959_v31 = vpop.permute.xlu0 %1982 }
 0x304   : > { %v4961_v41 = vpop.permute.xlu0 %2270 }
 0x308   : > { %v4963_v29 = vpop.permute.xlu0 %2186 }
 0x30c   : > { %v4965_v46 = vpop.permute.xlu0 %2333 }
 0x317   : > { %v4967_v25 = vpop.permute.xlu0 %1994 }
 0x31c   : > { %v4974_v50 = vpop.permute.xlu0 %2282 }
 0x32d   : > { %v4991_v32 = vpop.permute.xlu0 %1568 }
 0x340   : > { %v1498_v54 = vpop.f32.mrb[0].mxu1 }
 0x341   : > { %v1499_v27 = vadd.f32 %v1498_v54, %v4866_v14  ;;  %v1500_v24 = vpop.f32.mrb[1].mxu1 }
 0x342   : > { %v1502_v33 = vpop.f32.mrb[2].mxu1  ;;  %v1501_v20 = vadd.f32 %v1500_v24, %v4866_v14  ;;  %v5000_v24 = vpop.permute.xlu1 %1835 }
 0x343   : > { %vm1517_vm6 = vcmp.gt.f32.partialorder %v1499_v27, 0.0  ;;  %v1525_v0 = vmul.f32 0.01, %v1499_v27  ;;  %v1504_v42 = vpop.f32.mrb[3].mxu1  ;;  %v1503_v54 = vadd.f32 %v1502_v33, %v1435_v18 }
 0x344   : > { %v1526_v7 = vmul.f32 0.01, %v1501_v20  ;;  %vm1518_vm7 = vcmp.gt.f32.partialorder %v1501_v20, 0.0 }
 0x345   : > { %v4970_v12 = vsel %vm1517_vm6, %v1499_v27, %v1525_v0  ;;  %vm1519_vm8 = vcmp.gt.f32.partialorder %v1503_v54, 0.0 }
 0x346   : > { %v2146_v59 = vmul.f32 %v4878_v47, %v4970_v12  ;;  %v1878_v43 = vmul.f32 %v4874_v51, %v4970_v12  ;;  %v1954_v62 = vmul.f32 %v4881_v30, %v4970_v12  ;;  %v1615_v14 = vmul.f32 %v1600_v13, %v4970_v12 }
 0x347   : > { %v2242_v45 = vmul.f32 %v4895_v40, %v4970_v12  ;;  %v4996_v21 = vsel %vm1518_vm7, %v1501_v20, %v1526_v7  ;;  %v1722_v27 = vmul.f32 %v1708_v35, %v4970_v12  ;;  %v5011_v20 = vpop.permute.xlu1 %1839 }
 0x348   : > { %v1508_v44 = vpop.f32.mrb[4].mxu1  ;;  %2170 = vrot.lane.b32.xlu0 %v2146_v59, %s3996_s26  ;;  %1894 = vrot.lane.b32.xlu1 %v1878_v43, %s3996_s26  ;;  %v1616_v0 = vmul.f32 %v1600_v13, %v4996_v21  ;;  %v5004_v59 = vpop.permute.xlu0 %1583  ;;  %v1527_v43 = vmul.f32 0.01, %v1503_v54  ;;  %v1723_v33 = vmul.f32 %v1708_v35, %v4996_v21  ;;  %v2147_v13 = vmul.f32 %v4878_v47, %v4996_v21 }
 0x349   : > { %v4981_v22 = vpop.f32.mrb[5].mxu1  ;;  %6335 = vst [vmem:[#allocation9_spill] sm:$0xff] %v5004_v59 }
 0x34a   : > { %v4983_v3 = vpop.f32.mrb[6].mxu1  ;;  %v5013_v7 = vsel %vm1519_vm8, %v1503_v54, %v1527_v43 }
 0x34b   : > { %v4987_v56 = vpop.f32.mrb[7].mxu1  ;;  %v5023_v35 = vpop.permute.xlu1 %2107  ;;  %v1725_v47 = vmul.f32 %v4932_v57, %v5013_v7  ;;  %v2149_v43 = vmul.f32 %v4885_v23, %v5013_v7 }
 0x34c   : > { %1978 = vrot.lane.b32.xlu0 %v1954_v62, %s4002_s30  ;;  %1640 = vrot.lane.b32.xlu1 %v1615_v14, %s3996_s26  ;;  %v1879_v62 = vmul.f32 %v4874_v51, %v4996_v21  ;;  %v1505_v14 = vadd.f32 %v1504_v42, %v1435_v18  ;;  %v2243_v42 = vmul.f32 %v4895_v40, %v4996_v21 }
 0x34d   : > { %v1509_v40 = vadd.f32 %v1508_v44, %v4870_v36 }
 0x34e   : > { %vm1520_vm9 = vcmp.gt.f32.partialorder %v1505_v14, 0.0 }
 0x34f   : > { %v5036_v54 = vpop.permute.xlu1 %1607  ;;  %vm1521_vm10 = vcmp.gt.f32.partialorder %v1509_v40, 0.0 }
 0x350   : > { %2266 = vrot.lane.b32.xlu0 %v2242_v45, %s4002_s30  ;;  %1746 = vrot.lane.b32.xlu1 %v1722_v27, %s4002_s30  ;;  %v1868_v45 = vpop.permute.xlu0 %1867  ;;  %v1528_v27 = vmul.f32 0.01, %v1505_v14 }
 0x351   : > { %v1880_v51 = vmul.f32 %v1868_v45, %v5013_v7 }
 0x352   : > { %v5028_v18 = vsel %vm1520_vm9, %v1505_v14, %v1528_v27 }
 0x353   : > { %v5048_v14 = vpop.permute.xlu1 %1715 }
 0x354   : > { %1642 = vrot.lane.b32.xlu0 %v1616_v0, %s3996_s26  ;;  %1896 = vrot.lane.b32.xlu1 %v1879_v62, %s3996_s26  ;;  %v1955_v0 = vmul.f32 %v4881_v30, %v4996_v21  ;;  %v2150_v30 = vmul.f32 %v4885_v23, %v5028_v18  ;;  %v1958_v62 = vmul.f32 %v4890_v53, %v5028_v18 }
 0x355   : > { %v2246_v23 = vmul.f32 %v4872_v38, %v5028_v18 }
 0x357   : > { %v5059_v44 = vpop.permute.xlu1 %1719 }
 0x358   : > { %1748 = vrot.lane.b32.xlu0 %v1723_v33, %s4002_s30  ;;  %2172 = vrot.lane.b32.xlu1 %v2147_v13, %s3996_s26  ;;  %v1957_v33 = vmul.f32 %v4890_v53, %v5013_v7  ;;  %v1529_v13 = vmul.f32 0.01, %v1509_v40  ;;  %v1619_v53 = vmul.f32 %v4936_v49, %v5028_v18 }
 0x35a   : > { %v5061_v27 = vsel %vm1521_vm10, %v1509_v40, %v1529_v13 }
 0x35b   : > { %v1621_v40 = vmul.f32 %v5036_v54, %v5061_v27 }
 0x35c   : > { %1898 = vrot.lane.b32.xlu0 %v1880_v51, %s3996_s26  ;;  %1980 = vrot.lane.b32.xlu1 %v1955_v0, %s4002_s30  ;;  %v2245_v51 = vmul.f32 %v4872_v38, %v5013_v7  ;;  %v1618_v0 = vmul.f32 %v4936_v49, %v5013_v7  ;;  %v1882_v38 = vmul.f32 %v4904_v15, %v5061_v27 }
 0x35d   : > { %v2152_v49 = vmul.f32 %v4876_v28, %v5061_v27 }
 0x360   : > { %1752 = vrot.lane.b32.xlu0 %v1725_v47, %s4002_s30  ;;  %2268 = vrot.lane.b32.xlu1 %v2243_v42, %s4002_s30  ;;  %v1881_v47 = vmul.f32 %v1868_v45, %v5028_v18  ;;  %v1511_v42 = vadd.f32 %v4981_v22, %v4870_v36  ;;  %v1960_v36 = vmul.f32 %v4917_v55, %v5061_v27 }
 0x361   : > { %v1513_v45 = vadd.f32 %v4983_v3, %v4955_v63 }
 0x362   : > { %vm1522_vm11 = vcmp.gt.f32.partialorder %v1511_v42, 0.0 }
 0x363   : > { %vm1523_vm12 = vcmp.gt.f32.partialorder %v1513_v45, 0.0 }
 0x364   : > { %2178 = vrot.lane.b32.xlu0 %v2150_v30, %s3996_s26  ;;  %2176 = vrot.lane.b32.xlu1 %v2149_v43, %s3996_s26  ;;  %v5073_v30 = vpop.permute.xlu1 %1847  ;;  %v1726_v43 = vmul.f32 %v4932_v57, %v5028_v18  ;;  %v2248_v57 = vmul.f32 %v4922_v37, %v5061_v27 }
 0x368   : > { %1986 = vrot.lane.b32.xlu0 %v1958_v62, %s4002_s30  ;;  %1984 = vrot.lane.b32.xlu1 %v1957_v33, %s4002_s30  ;;  %v1530_v62 = vmul.f32 0.01, %v1511_v42  ;;  %v5084_v22 = vpop.permute.xlu1 %2111 }
 0x36a   : > { %v5090_v33 = vsel %vm1522_vm11, %v1511_v42, %v1530_v62  ;;  %v1515_v42 = vadd.f32 %v4987_v56, %v4955_v63 }
 0x36b   : > { %v1883_v13 = vmul.f32 %v4904_v15, %v5090_v33  ;;  %v3814_v15 = vld [vmem:[%s6286_s4 + $0x2] ss:$8 sm:$0x3]  ;;  %v2249_v62 = vmul.f32 %v4922_v37, %v5090_v33 }
 0x36c   : > { %2274 = vrot.lane.b32.xlu0 %v2246_v23, %s4002_s30  ;;  %2272 = vrot.lane.b32.xlu1 %v2245_v51, %s4002_s30  ;;  %v1531_v23 = vmul.f32 0.01, %v1513_v45  ;;  %v5099_v3 = vpop.permute.xlu1 %2180  ;;  %v1622_v51 = vmul.f32 %v5036_v54, %v5090_v33  ;;  %vm1524_vm13 = vcmp.gt.f32.partialorder %v1515_v42, 0.0 }
 0x370   : > { %1648 = vrot.lane.b32.xlu0 %v1619_v53, %s3996_s26  ;;  %1646 = vrot.lane.b32.xlu1 %v1618_v0, %s3996_s26  ;;  %v5104_v53 = vsel %vm1523_vm12, %v1513_v45, %v1531_v23  ;;  %v2153_v0 = vmul.f32 %v4876_v28, %v5090_v33  ;;  %v1812_v28 = vrot.slane %v3814_v15, %v4283_v26 }
 0x371   : > { %v2155_v56 = vmul.f32 %v4910_v60, %v5104_v53  ;;  %v2251_v23 = vmul.f32 %v4927_v58, %v5104_v53 }
 0x374   : > { %1902 = vrot.lane.b32.xlu0 %v1882_v38, %s3996_s26  ;;  %1900 = vrot.lane.b32.xlu1 %v1881_v47, %s3996_s26  ;;  %v1884_v38 = vmul.f32 %v4908_v39, %v5104_v53  ;;  %v5115_v47 = vpop.permute.xlu1 %1988 }
 0x378   : > { %2182 = vrot.lane.b32.xlu0 %v2152_v49, %s3996_s26  ;;  %1754 = vrot.lane.b32.xlu1 %v1726_v43, %s4002_s30  ;;  %v1961_v49 = vmul.f32 %v4917_v55, %v5090_v33  ;;  %v1532_v43 = vmul.f32 0.01, %v1515_v42  ;;  %v1623_v55 = vmul.f32 0.0, %v4947_v52 }
 0x37a   : > { %v5131_v63 = vsel %vm1524_vm13, %v1515_v42, %v1532_v43  ;;  %v1731_v42 = vmul.f32 %v5059_v44, %v5104_v53  ;;  %v1620_v43 = vmul.f32 0.0, %v5036_v54  ;;  %v1730_v54 = vmul.f32 0.0, %v5048_v14 }
 0x37b   : > { %v2156_v37 = vmul.f32 %v4910_v60, %v5131_v63  ;;  %v2252_v60 = vmul.f32 %v4927_v58, %v5131_v63  ;;  %v1808_v58 = vrot.slane %v3814_v15, %v4273_v19  ;;  %v1625_v15 = vmul.f32 %v4947_v52, %v5131_v63 }
 0x37c   : > { %1990 = vrot.lane.b32.xlu0 %v1960_v36, %s4002_s30  ;;  %1652 = vrot.lane.b32.xlu1 %v1621_v40, %s3996_s26  ;;  %v5127_v36 = vpop.permute.xlu1 %2276  ;;  %v1963_v40 = vmul.f32 %v4915_v16, %v5104_v53 }
 0x380   : > { %2278 = vrot.lane.b32.xlu0 %v2248_v57, %s4002_s30  ;;  %1904 = vrot.lane.b32.xlu1 %v1883_v13, %s3996_s26  ;;  %v5139_v45 = vpop.permute.xlu1 %2192  ;;  %v1964_v57 = vmul.f32 %v4915_v16, %v5131_v63  ;;  %v1729_v16 = vmul.f32 %v5048_v14, %v5090_v33 }
 0x384   : > { %1654 = vrot.lane.b32.xlu0 %v1622_v51, %s3996_s26  ;;  %2184 = vrot.lane.b32.xlu1 %v2153_v0, %s3996_s26  ;;  %v5150_v13 = vpop.permute.xlu1 %2335  ;;  %v1624_v51 = vmul.f32 %v4947_v52, %v5104_v53  ;;  %v1732_v52 = vmul.f32 %v5059_v44, %v5131_v63 }
 0x388   : > { %1906 = vrot.lane.b32.xlu0 %v1884_v38, %s3996_s26  ;;  %1992 = vrot.lane.b32.xlu1 %v1961_v49, %s4002_s30  ;;  %v5161_v0 = vpop.permute.xlu1 %2000  ;;  %v1885_v38 = vmul.f32 %v4908_v39, %v5131_v63 }
 0x38c   : > { %1815 = vrot.lane.b32.xlu0 %v1812_v28, %s4004_s20  ;;  %2280 = vrot.lane.b32.xlu1 %v2249_v62, %s4002_s30  ;;  %v5170_v49 = vpop.permute.xlu1 %2288  ;;  %v1733_v28 = vmul.f32 0.0, %v5059_v44  ;;  %v1728_v62 = vmul.f32 %v5048_v14, %v5061_v27 }
 0x390   : > { %1656 = vrot.lane.b32.xlu0 %v1623_v55, %s3996_s26  ;;  %2188 = vrot.lane.b32.xlu1 %v2155_v56, %s3996_s26  ;;  %v5177_v39 = vpop.permute.xlu1 %1573  ;;  %v5189_v56 = vpop.permute.xlu0 %1644 }
 0x394   : > { %2190 = vrot.lane.b32.xlu0 %v2156_v37, %s3996_s26  ;;  %1996 = vrot.lane.b32.xlu1 %v1963_v40, %s4002_s30  ;;  %v5185_v55 = vpop.permute.xlu1 %1578 }
 0x395   : > { %6336 = vst [vmem:[#allocation10_spill] sm:$0xff] %v5185_v55  ;;  %v2121_v55 = vmul.f32 0.0, %v5023_v35 }
 0x398   : > { %1998 = vrot.lane.b32.xlu0 %v1964_v57, %s4002_s30  ;;  %2284 = vrot.lane.b32.xlu1 %v2251_v23, %s4002_s30  ;;  %v5191_v37 = vpop.permute.xlu1 %1638  ;;  %v5199_v57 = vpop.permute.xlu0 %1756 }
 0x399   : > { %6337 = vst [vmem:[#allocation11_spill] sm:$0xff] %v5199_v57 }
 0x39c   : > { %2286 = vrot.lane.b32.xlu0 %v2252_v60, %s4002_s30  ;;  %1658 = vrot.lane.b32.xlu1 %v1624_v51, %s3996_s26  ;;  %v5197_v40 = vpop.permute.xlu1 %1750  ;;  %v1850_v60 = vmul.f32 0.0, %v5000_v24 }
 0x3a0   : > { %1760 = vrot.lane.b32.xlu0 %v1729_v16, %s4002_s30  ;;  %1908 = vrot.lane.b32.xlu1 %v1885_v38, %s3996_s26 }
 0x3a4   : > { %1764 = vrot.lane.b32.xlu0 %v1731_v42, %s4002_s30  ;;  %1813 = vrot.lane.b32.xlu1 %v1808_v58, %s4004_s20 }
 0x3a8   : > { %1768 = vrot.lane.b32.xlu0 %v1733_v28, %s4002_s30  ;;  %1650 = vrot.lane.b32.xlu1 %v1620_v43, %s3996_s26 }
 0x3ac   : > { %1660 = vrot.lane.b32.xlu0 %v1625_v15, %s3996_s26  ;;  %1758 = vrot.lane.b32.xlu1 %v1728_v62, %s4002_s30  ;;  %s4005_s26 = smov 124  }
 0x3b0   : > { %1762 = vrot.lane.b32.xlu1 %v1730_v54, %s4002_s30 }
 0x3b4   : > { %1766 = vrot.lane.b32.xlu1 %v1732_v52, %s4002_s30  ;;  %v2118_v52 = vmul.f32 0.0, %v4951_v61  ;;  %s4007_s30 = smov 80  }
 0x3ba   : > { %v2171_v23 = vpop.permute.xlu0 %2170  ;;  %v1895_v51 = vpop.permute.xlu1 %1894 }
 0x3bb   : > { %v1926_v14 = vadd.f32 %v1895_v51, %v1850_v60  ;;  %v1851_v60 = vmul.f32 %v5000_v24, %v4970_v12  ;;  %v2214_v10 = vadd.f32 %v2171_v23, %v2118_v52 }
 0x3be   : > { %v1979_v16 = vpop.permute.xlu0 %1978  ;;  %v5202_v58 = vpop.permute.xlu1 %1640 }
 0x3bf   : > { %v2022_v38 = vadd.f32 %v1979_v16, %v1926_v14  ;;  %v1852_v14 = vmul.f32 %v5000_v24, %v4996_v21 }
 0x3c1   : > { %2046 = vrot.lane.b32.xlu1 %v2022_v38, %s4000_s16 }
 0x3c2   : > { %v2267_v42 = vpop.permute.xlu0 %2266  ;;  %v5205_v28 = vpop.permute.xlu1 %1746 }
 0x3c3   : > { %6338 = vst [vmem:[#allocation12_spill] sm:$0xff] %v5205_v28  ;;  %v2310_v1 = vadd.f32 %v2267_v42, %v2214_v10 }
 0x3c5   : > { %v2342_v52 = vmul.f32 %v4965_v46, %v2310_v1 }
 0x3c6   : > { %v5207_v44 = vpop.permute.xlu0 %1642  ;;  %v1897_v43 = vpop.permute.xlu1 %1896 }
 0x3c7   : > { %v1910_v54 = vsel %vm683_vm0, %v1895_v51, %v1897_v43  ;;  %v1928_v8 = vadd.f32 %v1897_v43, %v1852_v14  ;;  %v1853_v43 = vmul.f32 0.0, %v5011_v20 }
 0x3c8   : > { %v1927_v9 = vadd.f32 %v1910_v54, %v1851_v60  ;;  %v2120_v60 = vmul.f32 %v4951_v61, %v4996_v21 }
 0x3ca   : > { %v5209_v15 = vpop.permute.xlu0 %1748  ;;  %v2173_v62 = vpop.permute.xlu1 %2172 }
 0x3cb   : > { %v2195_v1 = vsel %vm683_vm0, %v2173_v62, %v4957_v11  ;;  %v2194_v14 = vsel %vm683_vm0, %v2171_v23, %v2173_v62 }
 0x3cc   : > { %v2216_v11 = vadd.f32 %v2195_v1, %v2120_v60 }
 0x3ce   : > { %v1899_v38 = vpop.permute.xlu0 %1898  ;;  %v1981_v5 = vpop.permute.xlu1 %1980 }
 0x3cf   : > { %v2002_v2 = vsel %vm1457_vm4, %v1979_v16, %v1981_v5  ;;  %v2003_v4 = vsel %vm1457_vm4, %v1981_v5, %v4959_v31  ;;  %v1929_v5 = vadd.f32 %v1899_v38, %v1853_v43  ;;  %v2119_v43 = vmul.f32 %v4951_v61, %v4970_v12 }
 0x3d0   : > { %v2023_v51 = vadd.f32 %v2002_v2, %v1927_v9  ;;  %v2024_v26 = vadd.f32 %v2003_v4, %v1928_v8 }
 0x3d1   : > { %v2215_v62 = vadd.f32 %v2194_v14, %v2119_v43 }
 0x3d2   : > { %v5220_v19 = vpop.permute.xlu0 %1752  ;;  %2050 = vrot.lane.b32.xlu0 %v2024_v26, %s4000_s16  ;;  %2048 = vrot.lane.b32.xlu1 %v2023_v51, %s4000_s16  ;;  %v2269_v24 = vpop.permute.xlu1 %2268 }
 0x3d3   : > { %6339 = vst [vmem:[#allocation13_spill] sm:$0xff] %v5220_v19  ;;  %v2290_v34 = vsel %vm1457_vm4, %v2267_v42, %v2269_v24 }
 0x3d4   : > { %v2311_v42 = vadd.f32 %v2290_v34, %v2215_v62 }
 0x3d6   : > { %v2179_v54 = vpop.permute.xlu0 %2178  ;;  %2366 = vrot.lane.b32.xlu1 %v2342_v52, %s4005_s26  ;;  %v2177_v16 = vpop.permute.xlu1 %2176  ;;  %v1855_v52 = vmul.f32 %v5011_v20, %v5028_v18 }
 0x3d7   : > { %v2217_v1 = vadd.f32 %v2177_v16, %v2121_v55 }
 0x3da   : > { %v1987_v10 = vpop.permute.xlu0 %1986  ;;  %v1985_v2 = vpop.permute.xlu1 %1984 }
 0x3db   : > { %v2025_v4 = vadd.f32 %v1985_v2, %v1929_v5  ;;  %v2291_v5 = vsel %vm1457_vm4, %v2269_v24, %v4961_v41  ;;  %v2005_v19 = vsel %vm1457_vm4, %v1987_v10, %v5115_v47  ;;  %v2196_v41 = vsel %vm683_vm0, %v2177_v16, %v2179_v54 }
 0x3dc   : > { %v2312_v57 = vadd.f32 %v2291_v5, %v2216_v11 }
 0x3dd   : > { %2052 = vrot.lane.b32.xlu0 %v2025_v4, %s4000_s16  ;;  %v1854_v4 = vmul.f32 %v5011_v20, %v5013_v7 }
 0x3de   : > { %v2275_v8 = vpop.permute.xlu0 %2274  ;;  %v2273_v9 = vpop.permute.xlu1 %2272  ;;  %v2344_v34 = vmul.f32 %v5150_v13, %v2312_v57 }
 0x3df   : > { %v2292_v47 = vsel %vm1457_vm4, %v2273_v9, %v2275_v8  ;;  %v2313_v55 = vadd.f32 %v2273_v9, %v2217_v1  ;;  %v2293_v60 = vsel %vm1457_vm4, %v2275_v8, %v5127_v36  ;;  %v1856_v9 = vmul.f32 0.0, %v4949_v48 }
 0x3e1   : > { %v2345_v57 = vmul.f32 %v4965_v46, %v2313_v55  ;;  %v1859_v55 = vmul.f32 0.0, %v5073_v30 }
 0x3e2   : > { %v5228_v26 = vpop.permute.xlu0 %1648  ;;  %v5230_v31 = vpop.permute.xlu1 %1646 }
 0x3e3   : > { %6340 = vst [vmem:[#allocation14_spill] sm:$0xff] %v5228_v26  ;;  %v2004_v26 = vsel %vm1457_vm4, %v1985_v2, %v1987_v10  ;;  %v2123_v2 = vmul.f32 %v5023_v35, %v5028_v18 }
 0x3e6   : > { %v1903_v51 = vpop.permute.xlu0 %1902  ;;  %v1901_v17 = vpop.permute.xlu1 %1900 }
 0x3e7   : > { %v1911_v59 = vsel %vm683_vm0, %v1899_v38, %v1901_v17  ;;  %v1931_v23 = vadd.f32 %v1901_v17, %v1855_v52  ;;  %v2122_v17 = vmul.f32 %v5023_v35, %v5013_v7  ;;  %v1932_v36 = vadd.f32 %v1903_v51, %v1856_v9 }
 0x3e8   : > { %v1930_v61 = vadd.f32 %v1911_v59, %v1854_v4  ;;  %v2197_v59 = vsel %vm683_vm0, %v2179_v54, %v5099_v3 }
 0x3e9   : > { %v2027_v20 = vadd.f32 %v2005_v19, %v1931_v23  ;;  %v2218_v10 = vadd.f32 %v2196_v41, %v2122_v17  ;;  %v5265_v19 = vsel %vm2337_vm14, %v4965_v46, %v5150_v13  ;;  %v2219_v14 = vadd.f32 %v2197_v59, %v2123_v2 }
 0x3ea   : > { %v5252_v28 = vpop.permute.xlu0 %2182  ;;  %v2026_v38 = vadd.f32 %v2004_v26, %v1930_v61  ;;  %v5256_v24 = vpop.permute.xlu1 %1754  ;;  %v2343_v26 = vmul.f32 %v5265_v19, %v2311_v42  ;;  %v1857_v61 = vmul.f32 %v4949_v48, %v5061_v27  ;;  %v1858_v41 = vmul.f32 %v4949_v48, %v5090_v33 }
 0x3eb   : > { %2056 = vrot.lane.b32.xlu0 %v2027_v20, %s4000_s16  ;;  %v2314_v3 = vadd.f32 %v2292_v47, %v2218_v10  ;;  %v2315_v52 = vadd.f32 %v2293_v60, %v2219_v14  ;;  %vm2484_vm14 = vcmask 277504  }
 0x3ec   : > { %2054 = vrot.lane.b32.xlu1 %v2026_v38, %s4000_s16 }
 0x3ed   : > { %v2346_v35 = vmul.f32 %v5265_v19, %v2314_v3  ;;  %v2347_v8 = vmul.f32 %v5150_v13, %v2315_v52 }
 0x3ee   : > { %v1991_v16 = vpop.permute.xlu0 %1990  ;;  %v5273_v54 = vpop.permute.xlu1 %1652 }
 0x3ef   : > { %2370 = vrot.lane.b32.xlu0 %v2344_v34, %s4005_s26  ;;  %v2028_v11 = vadd.f32 %v1991_v16, %v1932_v36  ;;  %v2125_v36 = vmul.f32 %v5084_v22, %v5061_v27 }
 0x3f0   : > { %2368 = vrot.lane.b32.xlu1 %v2343_v26, %s4005_s26 }
 0x3f2   : > { %v5278_v43 = vpop.permute.xlu0 %2278  ;;  %v1905_v5 = vpop.permute.xlu1 %1904 }
 0x3f3   : > { %2372 = vrot.lane.b32.xlu0 %v2345_v57, %s4005_s26  ;;  %v1912_v62 = vsel %vm683_vm0, %v1903_v51, %v1905_v5  ;;  %v1934_v17 = vadd.f32 %v1905_v5, %v1858_v41  ;;  %v1861_v5 = vmul.f32 %v5073_v30, %v5131_v63 }
 0x3f4   : > { %2374 = vrot.lane.b32.xlu1 %v2346_v35, %s4005_s26  ;;  %v1933_v42 = vadd.f32 %v1912_v62, %v1857_v61  ;;  %v2126_v35 = vmul.f32 %v5084_v22, %v5090_v33 }
 0x3f6   : > { %v5285_v4 = vpop.permute.xlu0 %1654  ;;  %v2185_v23 = vpop.permute.xlu1 %2184 }
 0x3f7   : > { %2376 = vrot.lane.b32.xlu0 %v2347_v8, %s4005_s26  ;;  %v2199_v57 = vsel %vm683_vm0, %v2185_v23, %v4963_v29  ;;  %v2198_v9 = vsel %vm683_vm0, %v5252_v28, %v2185_v23  ;;  %v1860_v29 = vmul.f32 %v5073_v30, %v5104_v53 }
 0x3f8   : > { %2058 = vrot.lane.b32.xlu1 %v2028_v11, %s4000_s16  ;;  %v2129_v11 = vmul.f32 %v4953_v6, %v5131_v63  ;;  %v2222_v61 = vadd.f32 %v2199_v57, %v2126_v35  ;;  %v2124_v35 = vmul.f32 0.0, %v5084_v22 }
 0x3fa   : > { %v1907_v20 = vpop.permute.xlu0 %1906  ;;  %v1993_v38 = vpop.permute.xlu1 %1992 }
 0x3fb   : > { %v2006_v1 = vsel %vm1457_vm4, %v1991_v16, %v1993_v38  ;;  %v2007_v47 = vsel %vm1457_vm4, %v1993_v38, %v4967_v25  ;;  %v1935_v26 = vadd.f32 %v1907_v20, %v1859_v55  ;;  %v2221_v38 = vadd.f32 %v2198_v9, %v2125_v36 }
 0x3fc   : > { %v2029_v51 = vadd.f32 %v2006_v1, %v1933_v42  ;;  %v2030_v59 = vadd.f32 %v2007_v47, %v1934_v17  ;;  %v2220_v36 = vadd.f32 %v5252_v28, %v2124_v35 }
 0x3fe   : > { %v5297_v10 = vpop.permute.xlu0 %1815  ;;  %2062 = vrot.lane.b32.xlu0 %v2030_v59, %s4000_s16  ;;  %2060 = vrot.lane.b32.xlu1 %v2029_v51, %s4000_s16  ;;  %v2281_v48 = vpop.permute.xlu1 %2280 }
 0x3ff   : > { %v2295_v8 = vsel %vm1457_vm4, %v2281_v48, %v4974_v50  ;;  %v2294_v23 = vsel %vm1457_vm4, %v5278_v43, %v2281_v48  ;;  %v2128_v48 = vmul.f32 %v4953_v6, %v5104_v53 }
 0x400   : > { %v2318_v51 = vadd.f32 %v2295_v8, %v2222_v61 }
 0x402   : > { %v5301_v34 = vpop.permute.xlu0 %1656  ;;  %v2189_v2 = vpop.permute.xlu1 %2188 }
 0x406   : > { %v1997_v60 = vpop.permute.xlu1 %1996  ;;  %v2191_v16 = vpop.permute.xlu0 %2190 }
 0x407   : > { %v2031_v3 = vadd.f32 %v1997_v60, %v1935_v26  ;;  %v2201_v1 = vsel %vm683_vm0, %v2191_v16, %v5139_v45  ;;  %v2200_v30 = vsel %vm683_vm0, %v2189_v2, %v2191_v16  ;;  %v2317_v26 = vadd.f32 %v2294_v23, %v2221_v38 }
 0x408   : > { %v2225_v57 = vadd.f32 %v2201_v1, %v2129_v11  ;;  %v2350_v16 = vmul.f32 %v5150_v13, %v2318_v51  ;;  %v1588_v51 = vmul.f32 %v4991_v32, %v4996_v21 }
 0x409   : > { %2064 = vrot.lane.b32.xlu0 %v2031_v3, %s4000_s16  ;;  %v2349_v9 = vmul.f32 %v5265_v19, %v2317_v26  ;;  %v1771_v26 = vsel %vm1457_vm4, %v5209_v15, %v5197_v40 }
 0x40a   : > { %v2285_v25 = vpop.permute.xlu1 %2284  ;;  %v1999_v14 = vpop.permute.xlu0 %1998 }
 0x40b   : > { %v2009_v50 = vsel %vm1457_vm4, %v1999_v14, %v5161_v0  ;;  %v2008_v59 = vsel %vm1457_vm4, %v1997_v60, %v1999_v14  ;;  %v2224_v0 = vadd.f32 %v2200_v30, %v2128_v48  ;;  %v2127_v60 = vmul.f32 0.0, %v4953_v6 }
 0x40c   : > { %v1663_v30 = vsel %vm683_vm0, %v5202_v58, %v5207_v44 }
 0x40e   : > { %v5305_v52 = vpop.permute.xlu1 %1658  ;;  %v2287_v41 = vpop.permute.xlu0 %2286 }
 0x40f   : > { %v2296_v45 = vsel %vm1457_vm4, %v2285_v25, %v2287_v41 }
 0x412   : > { %v1909_v62 = vpop.permute.xlu1 %1908 }
 0x413   : > { %v1913_v42 = vsel %vm683_vm0, %v1907_v20, %v1909_v62  ;;  %v1937_v17 = vadd.f32 %v1909_v62, %v1861_v5  ;;  %v2297_v20 = vsel %vm1457_vm4, %v2287_v41, %v5170_v49  ;;  %v2320_v5 = vadd.f32 %v2296_v45, %v2224_v0 }
 0x414   : > { %v1936_v47 = vadd.f32 %v1913_v42, %v1860_v29  ;;  %v2321_v14 = vadd.f32 %v2297_v20, %v2225_v57  ;;  %v2223_v49 = vadd.f32 %v2189_v2, %v2127_v60  ;;  %v2316_v29 = vadd.f32 %v5278_v43, %v2220_v36  ;;  %v6341_v20 = vld [vmem:[#allocation12_spill] sm:$0xff] }
 0x415   : > { %v2033_v55 = vadd.f32 %v2009_v50, %v1937_v17  ;;  %v2352_v6 = vmul.f32 %v5265_v19, %v2320_v5  ;;  %v1662_v50 = vsel %vm683_vm0, %v5191_v37, %v5202_v58  ;;  %v1587_v37 = vmul.f32 %v4991_v32, %v4970_v12 }
 0x416   : > { %v2032_v3 = vadd.f32 %v2008_v59, %v1936_v47  ;;  %v2319_v8 = vadd.f32 %v2285_v25, %v2223_v49  ;;  %v2353_v11 = vmul.f32 %v5150_v13, %v2321_v14  ;;  %v2348_v2 = vmul.f32 %v4965_v46, %v2316_v29  ;;  %v5355_v28 = vpop.permute.xlu1 %1813  ;;  %v5359_v13 = vpop.permute.xlu0 %1760 }
 0x417   : > { %2068 = vrot.lane.b32.xlu0 %v2033_v55, %s4000_s16  ;;  %v1586_v47 = vmul.f32 0.0, %v4991_v32  ;;  %v1664_v59 = vsel %vm683_vm0, %v5189_v56, %v5230_v31  ;;  %v1589_v55 = vmul.f32 0.0, %v5177_v39  ;;  %v1684_v58 = vadd.f32 %v5207_v44, %v1588_v51  ;;  %v6342_v32 = vld [vmem:[#allocation14_spill] sm:$0xff] }
 0x418   : > { %2066 = vrot.lane.b32.xlu1 %v2032_v3, %s4000_s16  ;;  %v2351_v22 = vmul.f32 %v4965_v46, %v2319_v8  ;;  %s5385_s16 = sld [smem:[#allocation4 + $0x1]]  ;;  %v1770_v56 = vsel %vm1457_vm4, %v6341_v20, %v5209_v15  ;;  %v1683_v57 = vadd.f32 %v1663_v30, %v1587_v37  ;;  %v1591_v45 = vmul.f32 %v5177_v39, %v5028_v18 }
 0x419   : > { %v1682_v48 = vadd.f32 %v1662_v50, %v1586_v47  ;;  %v1685_v0 = vadd.f32 %v1664_v59, %v1589_v55  ;;  %v1792_v12 = vadd.f32 %v1771_v26, %v1684_v58  ;;  %v1665_v40 = vsel %vm683_vm0, %v5230_v31, %v6342_v32  ;;  %v6344_v31 = vld [vmem:[#allocation13_spill] sm:$0xff] }
 0x41a   : > { %v5357_v25 = vpop.permute.xlu1 %1650  ;;  %v5363_v19 = vpop.permute.xlu0 %1764  ;;  %v5407_v44 = vsel %vm1817_vm15, %v5355_v28, %v5297_v10  ;;  %v1590_v15 = vmul.f32 %v5177_v39, %v5013_v7  ;;  %v1791_v14 = vadd.f32 %v1770_v56, %v1683_v57  ;;  %v1687_v18 = vadd.f32 %v6342_v32, %v1591_v45 }
 0x41b   : > { %2382 = vrot.lane.b32.xlu0 %v2350_v16, %s4005_s26  ;;  %v6343_v16 = vld [vmem:[#allocation11_spill] sm:$0xff]  ;;  %v1772_v5 = vsel %vm1457_vm4, %v6344_v31, %v5256_v24  ;;  %v1824_v49 = vmul.f32 %v5297_v10, %v1792_v12  ;;  %v1793_v7 = vadd.f32 %v6344_v31, %v1685_v0 }
 0x41c   : > { %2380 = vrot.lane.b32.xlu1 %v2349_v9, %s4005_s26  ;;  %v1773_v60 = vsel %vm1457_vm4, %v5256_v24, %v6343_v16  ;;  %v1790_v9 = vadd.f32 %v6341_v20, %v1682_v48  ;;  %v1823_v29 = vmul.f32 %v5407_v44, %v1791_v14 }
 0x41d   : > { %v1795_v39 = vadd.f32 %v1773_v60, %v1687_v18  ;;  %v1825_v30 = vmul.f32 %v5355_v28, %v1793_v7 }
 0x41e   : > { %v5361_v43 = vpop.permute.xlu1 %1758  ;;  %v5367_v61 = vpop.permute.xlu0 %1768  ;;  %v1822_v55 = vmul.f32 %v5355_v28, %v1790_v9 }
 0x41f   : > { %2388 = vrot.lane.b32.xlu0 %v2353_v11, %s4005_s26  ;;  %v1686_v11 = vadd.f32 %v1665_v40, %v1590_v15  ;;  %v1827_v51 = vmul.f32 %v5297_v10, %v1795_v39 }
 0x420   : > { %2386 = vrot.lane.b32.xlu1 %v2352_v6, %s4005_s26 }
 0x421   : > { %v1794_v47 = vadd.f32 %v1772_v5, %v1686_v11 }
 0x422   : > { %v5365_v62 = vpop.permute.xlu1 %1762  ;;  %v5371_v41 = vpop.permute.xlu0 %1660 }
 0x423   : > { %2384 = vrot.lane.b32.xlu0 %v2351_v22, %s4005_s26 }
 0x424   : > { %2378 = vrot.lane.b32.xlu1 %v2348_v2, %s4005_s26  ;;  %v5422_v2 = vstv %s5385_s16  ;;  %s4010_s26 = smov 77   ;;  %s4011_s16 = smov 125  }
 0x426   : > { %v5369_v23 = vpop.permute.xlu1 %1766 }
 0x433   : > { %v2047_v46 = vpop.permute.xlu1 %2046 }
 0x444   : > { %v2049_v42 = vpop.permute.xlu1 %2048  ;;  %v2051_v17 = vpop.permute.xlu0 %2050 }
 0x445   : > { %v2071_v36 = vsel %vm1304_vm5, %v2049_v42, %v2051_v17  ;;  %v2092_v6 = vadd.f32 %v2051_v17, %v1824_v49  ;;  %v2070_v37 = vsel %vm1304_vm5, %v2047_v46, %v2049_v42 }
 0x446   : > { %v2091_v24 = vadd.f32 %v2071_v36, %v1823_v29  ;;  %v2090_v0 = vadd.f32 %v2070_v37, %v1822_v55  ;;  %v6345_v29 = vld [vmem:[#allocation10_spill] sm:$0xff]  ;;  %v6346_v55 = vld [vmem:[#allocation9_spill] sm:$0xff] }
 0x447   : > { %v1597_v37 = vmul.f32 %v6346_v55, %v5131_v63 }
 0x448   : > { %v2367_v1 = vpop.permute.xlu1 %2366 }
 0x44f   : > { %v2053_v38 = vpop.permute.xlu0 %2052 }
 0x45d   : > { %v2057_v21 = vpop.permute.xlu0 %2056 }
 0x45e   : > { %v2055_v3 = vpop.permute.xlu1 %2054  ;;  %v2095_v57 = vadd.f32 %v2057_v21, %v1827_v51 }
 0x45f   : > { %v2072_v22 = vsel %vm1304_vm5, %v2053_v38, %v2055_v3  ;;  %v2073_v26 = vsel %vm1304_vm5, %v2055_v3, %v2057_v21  ;;  %v1826_v38 = vmul.f32 %v5407_v44, %v1794_v47  ;;  %v1775_v47 = vsel %vm1457_vm4, %v5359_v13, %v5365_v62 }
 0x460   : > { %v2093_v58 = vadd.f32 %v2072_v22, %v1825_v30  ;;  %v1774_v30 = vsel %vm1457_vm4, %v5361_v43, %v5359_v13  ;;  %v1669_v62 = vsel %vm683_vm0, %v5305_v52, %v5371_v41  ;;  %v1596_v13 = vmul.f32 %v6346_v55, %v5104_v53 }
 0x461   : > { %v2371_v35 = vpop.permute.xlu0 %2370  ;;  %v2094_v12 = vadd.f32 %v2073_v26, %v1826_v38  ;;  %v1592_v38 = vmul.f32 0.0, %v6345_v29  ;;  %v1595_v53 = vmul.f32 0.0, %v6346_v55 }
 0x462   : > { %v2369_v8 = vpop.permute.xlu1 %2368  ;;  %v2413_v17 = vadd.f32 %v2371_v35, %v2092_v6  ;;  %v1594_v6 = vmul.f32 %v6345_v29, %v5090_v33 }
 0x463   : > { %v2392_v50 = vsel %vm2390_vm1, %v2369_v8, %v2371_v35  ;;  %v2391_v45 = vsel %vm2390_vm1, %v2367_v1, %v2369_v8 }
 0x464   : > { %v2412_v20 = vadd.f32 %v2392_v50, %v2091_v24  ;;  %v2438_v16 = vmul.f32 %v5422_v2, %v2413_v17  ;;  %vm2425_vm2 = vcmp.gt.f32.partialorder %v2413_v17, 0.0  ;;  %v2411_v3 = vadd.f32 %v2391_v45, %v2090_v0 }
 0x465   : > { %v2373_v59 = vpop.permute.xlu0 %2372  ;;  %v1667_v50 = vsel %vm683_vm0, %v5273_v54, %v5285_v4  ;;  %v1593_v24 = vmul.f32 %v6345_v29, %v5061_v27  ;;  %v1690_v51 = vadd.f32 %v5285_v4, %v1594_v6  ;;  %v1777_v27 = vsel %vm1457_vm4, %v5369_v23, %v5367_v61 }
 0x466   : > { %v2375_v48 = vpop.permute.xlu1 %2374  ;;  %v2437_v60 = vmul.f32 %v5422_v2, %v2412_v20  ;;  %vm2424_vm3 = vcmp.gt.f32.partialorder %v2412_v20, 0.0  ;;  %v2450_v18 = vsel %vm2425_vm2, %v2413_v17, %v2438_v16  ;;  %v2436_v9 = vmul.f32 %v5422_v2, %v2411_v3 }
 0x467   : > { %v2393_v56 = vsel %vm2390_vm1, %v2373_v59, %v2375_v48  ;;  %vm2423_vm9 = vcmp.gt.f32.partialorder %v2411_v3, 0.0  ;;  %v1689_v33 = vadd.f32 %v1667_v50, %v1593_v24  ;;  %v1798_v26 = vadd.f32 %v1775_v47, %v1690_v51 }
 0x468   : > { %v2414_v32 = vadd.f32 %v2393_v56, %v2093_v58  ;;  %v2449_v5 = vsel %vm2424_vm3, %v2412_v20, %v2437_v60  ;;  %v2448_v11 = vsel %vm2423_vm9, %v2411_v3, %v2436_v9  ;;  %v1666_v4 = vsel %vm683_vm0, %v5357_v25, %v5273_v54 }
 0x469   : > { %v2377_v40 = vpop.permute.xlu0 %2376  ;;  %v1797_v63 = vadd.f32 %v1774_v30, %v1689_v33  ;;  %v1776_v58 = vsel %vm1457_vm4, %v5363_v19, %v5369_v23  ;;  %v1668_v61 = vsel %vm683_vm0, %v5301_v34, %v5305_v52  ;;  %v1692_v56 = vadd.f32 %v1669_v62, %v1596_v13  ;;  %v2513_v62 = vld [vmem:[%s6291_s9] sm:$0xff] }
 0x46a   : > { %v2394_v46 = vsel %vm2390_vm1, %v2375_v48, %v2377_v40  ;;  %v2416_v42 = vadd.f32 %v2377_v40, %v2095_v57  ;;  %v2439_v1 = vmul.f32 %v5422_v2, %v2414_v32  ;;  %vm2426_vm8 = vcmp.gt.f32.partialorder %v2414_v32, 0.0  ;;  %v2059_v22 = vpop.permute.xlu1 %2058 }
 0x46b   : > { %v2415_v15 = vadd.f32 %v2394_v46, %v2094_v12  ;;  %v1693_v48 = vadd.f32 %v5371_v41, %v1597_v37  ;;  %v1830_v54 = vmul.f32 %v5297_v10, %v1798_v26  ;;  %v1688_v41 = vadd.f32 %v1666_v4, %v1592_v38 }
 0x46c   : > { %vm2428_vm6 = vcmp.gt.f32.partialorder %v2416_v42, 0.0  ;;  %v2441_v21 = vmul.f32 %v5422_v2, %v2416_v42  ;;  %v2451_v8 = vsel %vm2426_vm8, %v2414_v32, %v2439_v1  ;;  %v1800_v0 = vadd.f32 %v1776_v58, %v1692_v56 }
 0x46d   : > { %vm2427_vm7 = vcmp.gt.f32.partialorder %v2415_v15, 0.0  ;;  %v2440_v14 = vmul.f32 %v5422_v2, %v2415_v15  ;;  %v2460_v7 = vpack.c.bf16 %v2451_v8, %v2448_v11  ;;  %v1801_v25 = vadd.f32 %v1777_v27, %v1693_v48  ;;  %v2515_v48 = vld [vmem:[%s6291_s9 + $0x10] sm:$0xff] }
 0x46e   : > { %v2453_v35 = vsel %vm2428_vm6, %v2416_v42, %v2441_v21  ;;  %v1829_v32 = vmul.f32 %v5407_v44, %v1797_v63  ;;  %v1691_v23 = vadd.f32 %v1668_v61, %v1595_v53  ;;  %v1796_v3 = vadd.f32 %v5361_v43, %v1688_v41  ;;  %v5519_v63 = vld [vmem:[%s6285_s3] sm:$0xff]  ;;  %v5529_v61 = vld [vmem:[%s6285_s3 + $0x10] sm:$0xff] }
 0x46f   : > { %v2462_v31 = vpack.c.bf16 %v2453_v35, %v2450_v18  ;;  %v2452_v49 = vsel %vm2427_vm7, %v2415_v15, %v2440_v14  ;;  %v1833_v46 = vmul.f32 %v5297_v10, %v1801_v25  ;;  %v1832_v1 = vmul.f32 %v5407_v44, %v1800_v0 }
 0x470   : > { %v2461_v36 = vpack.c.bf16 %v2452_v49, %v2449_v5  ;;  %v2063_v39 = vpop.permute.xlu0 %2062  ;;  %v2061_v17 = vpop.permute.xlu1 %2060  ;;  %v1799_v42 = vadd.f32 %v5363_v19, %v1691_v23  ;;  %v1828_v43 = vmul.f32 %v5355_v28, %v1796_v3  ;;  %v6347_v38 = vmov 4  }
 0x471   : > { %2476 = vrot.lane.b32.xlu0 %v2462_v31, %s4006_s23  ;;  %v2075_v45 = vsel %vm1304_vm5, %v2061_v17, %v2063_v39  ;;  %v2098_v12 = vadd.f32 %v2063_v39, %v1830_v54  ;;  %v2074_v18 = vsel %vm1304_vm5, %v2059_v22, %v2061_v17  ;;  %v6348_v58 = vmov 8   ;;  %v5542_v54 = vld [vmem:[%s6285_s3 + $0x18] sm:$0xff] }
 0x472   : > { %2474 = vrot.lane.b32.xlu1 %v2461_v36, %s4006_s23  ;;  %v2097_v16 = vadd.f32 %v2075_v45, %v1829_v32  ;;  %v1831_v49 = vmul.f32 %v5355_v28, %v1799_v42  ;;  %v6350_v56 = vmov 7   ;;  %v6351_v25 = vmov 6   ;;  %v2514_v45 = vld [vmem:[%s6291_s9 + $0x8] sm:$0xff] }
 0x473   : > { %v6353_v53 = vmov 1   ;;  %v6354_v41 = vmov 2   ;;  %v6355_v0 = vmov 0   ;;  %vm2751_vm9 = vcmask 654336  }
 0x476   : > { %2472 = vrot.lane.b32.xlu1 %v2460_v7, %s4006_s23  ;;  %v2096_v7 = vadd.f32 %v2074_v18, %v1828_v43 }
 0x47b   : > { %v2065_v59 = vpop.permute.xlu0 %2064 }
 0x489   : > { %v2069_v20 = vpop.permute.xlu0 %2068 }
 0x48a   : > { %v2067_v57 = vpop.permute.xlu1 %2066  ;;  %v2101_v21 = vadd.f32 %v2069_v20, %v1833_v46 }
 0x48b   : > { %v2077_v60 = vsel %vm1304_vm5, %v2067_v57, %v2069_v20  ;;  %v2076_v10 = vsel %vm1304_vm5, %v2065_v59, %v2067_v57  ;;  %v6349_v20 = vmov 5   ;;  %v6352_v57 = vmov 3  }
 0x48c   : > { %v2100_v31 = vadd.f32 %v2077_v60, %v1832_v1  ;;  %v2099_v39 = vadd.f32 %v2076_v10, %v1831_v49 }
 0x48d   : > { %v2383_v40 = vpop.permute.xlu0 %2382 }
 0x48e   : > { %v2419_v34 = vadd.f32 %v2383_v40, %v2098_v12  ;;  %v2381_v52 = vpop.permute.xlu1 %2380  ;;  %v2516_v12 = vld [vmem:[%s6291_s9 + $0x18] sm:$0xff] }
 0x48f   : > { %v2396_v15 = vsel %vm2390_vm1, %v2381_v52, %v2383_v40 }
 0x490   : > { %v2418_v14 = vadd.f32 %v2396_v15, %v2097_v16  ;;  %v2444_v35 = vmul.f32 %v5422_v2, %v2419_v34  ;;  %vm2431_vm4 = vcmp.gt.f32.partialorder %v2419_v34, 0.0  ;;  %v3954_v15 = vld [vmem:[%s6290_s8] sm:$0xff]  }
 0x491   : > { %v2389_v9 = vpop.permute.xlu0 %2388 }
 0x492   : > { %v2422_v19 = vadd.f32 %v2389_v9, %v2101_v21  ;;  %v2387_v5 = vpop.permute.xlu1 %2386  ;;  %v2443_v44 = vmul.f32 %v5422_v2, %v2418_v14  ;;  %v2456_v29 = vsel %vm2431_vm4, %v2419_v34, %v2444_v35  ;;  %vm2430_vm5 = vcmp.gt.f32.partialorder %v2418_v14, 0.0  ;;  %v3955_v21 = vld [vmem:[%s6290_s8 + $0x8] sm:$0xff]  }
 0x493   : > { %v2398_v36 = vsel %vm2390_vm1, %v2387_v5, %v2389_v9  ;;  %vm2860_vm4 = vcmask 261120  }
 0x494   : > { %vm2434_vm10 = vcmp.gt.f32.partialorder %v2422_v19, 0.0  ;;  %v2447_v8 = vmul.f32 %v5422_v2, %v2422_v19  ;;  %v2421_v11 = vadd.f32 %v2398_v36, %v2100_v31  ;;  %v2455_v33 = vsel %vm2430_vm5, %v2418_v14, %v2443_v44 }
 0x495   : > { %v2385_v6 = vpop.permute.xlu0 %2384  ;;  %vm2908_vm5 = vcmask 629760  }
 0x496   : > { %v2459_v22 = vsel %vm2434_vm10, %v2422_v19, %v2447_v8  ;;  %vm2433_vm11 = vcmp.gt.f32.partialorder %v2421_v11, 0.0  ;;  %v2446_v50 = vmul.f32 %v5422_v2, %v2421_v11  ;;  %v2397_v47 = vsel %vm2390_vm1, %v2385_v6, %v2387_v5  ;;  %v2379_v28 = vpop.permute.xlu1 %2378  ;;  %v3822_v6 = vld [vmem:[%s6286_s4 + $0x5] ss:$8 sm:$0x3] }
 0x497   : > { %v2420_v24 = vadd.f32 %v2397_v47, %v2099_v39  ;;  %v2395_v51 = vsel %vm2390_vm1, %v2379_v28, %v2381_v52  ;;  %v2465_v30 = vpack.c.bf16 %v2459_v22, %v2456_v29  ;;  %vm3429_vm10 = vcmask 678912  }
 0x498   : > { %v2417_v59 = vadd.f32 %v2395_v51, %v2096_v7  ;;  %v2458_v55 = vsel %vm2433_vm11, %v2421_v11, %v2446_v50  ;;  %v6356_v50 = vld [vmem:[#allocation7_spill] sm:$0xff]  ;;  %vm3161_vm11 = vcmask 1022976  }
 0x499   : > { %vm2432_vm12 = vcmp.gt.f32.partialorder %v2420_v24, 0.0  ;;  %v2445_v37 = vmul.f32 %v5422_v2, %v2420_v24  ;;  %2482 = vrot.lane.b32.xlu1 %v2465_v30, %s4006_s23  ;;  %v2464_v26 = vpack.c.bf16 %v2458_v55, %v2455_v33  ;;  %v3420_v47 = vrot.slane %v3822_v6, %v6356_v50  ;;  %v6357_v30 = vld [vmem:[#allocation8_spill] sm:$0xff] }
 0x49a   : > { %vm2429_vm13 = vcmp.gt.f32.partialorder %v2417_v59, 0.0  ;;  %v2442_v17 = vmul.f32 %v5422_v2, %v2417_v59  ;;  %v5513_v2 = vld [vmem:[%s6285_s3 + $0x8] sm:$0xff] }
 0x49b   : > { %v2457_v27 = vsel %vm2432_vm12, %v2420_v24, %v2445_v37  ;;  %2480 = vrot.lane.b32.xlu0 %v2464_v26, %s4006_s23  ;;  %vm3482_vm12 = vcmask 998400  }
 0x49c   : > { %v2454_v4 = vsel %vm2429_vm13, %v2417_v59, %v2442_v17  ;;  %v3424_v59 = vrot.slane %v3822_v6, %v6357_v30 }
 0x49d   : > { %2519 = vperm.xlu1 %3925, %v2513_v62   ;;  %v2463_v13 = vpack.c.bf16 %v2457_v27, %v2454_v4 }
 0x49f   : > { %2478 = vrot.lane.b32.xlu0 %v2463_v13, %s4006_s23  ;;  %s4012_s23 = smov 122  }
 0x4a1   : > { %2529 = vperm.xlu1 %3925, %v2515_v48  }
 0x4a3   : > { %2958 = vperm.xlu0 %3926, %v5513_v2  }
 0x4a5   : > { %3927 = vset.pattern.permute.xlu1 %v6347_v38 }
 0x4a6   : > { %2954 = vperm.xlu1 %3927, %v5519_v63  }
 0x4a7   : > { %3931 = vset.pattern.permute.xlu0 %v6348_v58 }
 0x4a8   : > { %3323 = vperm.xlu0 %3931, %v5513_v2  }
 0x4aa   : > { %3928 = vset.pattern.permute.xlu1 %v6349_v20 }
 0x4ab   : > { %3223 = vperm.xlu1 %3928, %v5519_v63  }
 0x4ac   : > { %3933 = vset.pattern.permute.xlu0 %v6349_v20 }
 0x4ad   : > { %3231 = vperm.xlu0 %3933, %v5529_v61  }
 0x4af   : > { %3227 = vperm.xlu1 %3928, %v5513_v2  }
 0x4b1   : > { %3934 = vset.pattern.permute.xlu0 %v6350_v56 }
 0x4b2   : > { %3030 = vperm.xlu0 %3934, %v5519_v63  }
 0x4b3   : > { %3929 = vset.pattern.permute.xlu1 %v6350_v56 }
 0x4b4   : > { %3034 = vperm.xlu1 %3929, %v5513_v2  }
 0x4b6   : > { %3042 = vperm.xlu0 %3934, %v5542_v54  }
 0x4b8   : > { %3930 = vset.pattern.permute.xlu1 %v6348_v58 }
 0x4b9   : > { %3319 = vperm.xlu1 %3930, %v5519_v63  }
 0x4ba   : > { %3940 = vset.pattern.permute.xlu0 %v6351_v25 }
 0x4bb   : > { %2801 = vperm.xlu0 %3940, %v5513_v2  }
 0x4bd   : > { %3932 = vset.pattern.permute.xlu1 %v6347_v38 }
 0x4be   : > { %2962 = vperm.xlu1 %3932, %v5529_v61  }
 0x4bf   : > { %3941 = vset.pattern.permute.xlu0 %v6352_v57 }
 0x4c0   : > { %2688 = vperm.xlu0 %3941, %v5519_v63  }
 0x4c2   : > { %2966 = vperm.xlu1 %3932, %v5542_v54  }
 0x4c4   : > { %2700 = vperm.xlu0 %3941, %v5542_v54  }
 0x4c6   : > { %3935 = vset.pattern.permute.xlu1 %v6349_v20 }
 0x4c7   : > { %3235 = vperm.xlu1 %3935, %v5542_v54  }
 0x4c8   : > { %3946 = vset.pattern.permute.xlu0 %v6353_v53 }
 0x4c9   : > { %2934 = vperm.xlu0 %3946, %v5529_v61  }
 0x4cb   : > { %3936 = vset.pattern.permute.xlu1 %v6350_v56 }
 0x4cc   : > { %3038 = vperm.xlu1 %3936, %v5529_v61  }
 0x4cd   : > { %3947 = vset.pattern.permute.xlu0 %v6354_v41 }
 0x4ce   : > { %3195 = vperm.xlu0 %3947, %v5519_v63  }
 0x4d0   : > { %3937 = vset.pattern.permute.xlu1 %v6348_v58 }
 0x4d1   : > { %3327 = vperm.xlu1 %3937, %v5529_v61  }
 0x4d2   : > { %3207 = vperm.xlu0 %3947, %v5542_v54  }
 0x4d5   : > { %3331 = vperm.xlu1 %3937, %v5542_v54  }
 0x4d6   : > { %3950 = vset.pattern.permute.xlu0 %v6355_v0 }
 0x4d7   : > { %2524 = vperm.xlu0 %3950, %v2514_v45  }
 0x4d9   : > { %3938 = vset.pattern.permute.xlu1 %v6352_v57 }
 0x4da   : > { %2692 = vperm.xlu1 %3938, %v5513_v2  }
 0x4db   : > { %2534 = vperm.xlu0 %3950, %v2516_v12  }
 0x4de   : > { %3939 = vset.pattern.permute.xlu1 %v6351_v25 }
 0x4df   : > { %2797 = vperm.xlu1 %3939, %v5519_v63  }
 0x4e3   : > { %v2477_v32 = vpop.permute.xlu0 %2476  ;;  %3942 = vset.pattern.permute.xlu1 %v6353_v53 }
 0x4e4   : > { %v2475_v23 = vpop.permute.xlu1 %2474  ;;  %2926 = vperm.xlu1 %3942, %v5519_v63  }
 0x4e5   : > { %v2486_v40 = vsel %vm2484_vm14, %v2475_v23, %v2477_v32 }
 0x4e6   : > { %2561 = vmatprep.subr.bf16.mxu1 %v2486_v40  ;;  %3653 = vmatprep.subr.bf16.mxu0 %v2486_v40 }
 0x4e8   : > { %v2473_v16 = vpop.permute.xlu1 %2472  ;;  %2930 = vperm.xlu1 %3942, %v5513_v2  }
 0x4e9   : > { %v2485_v46 = vsel %vm2484_vm14, %v2473_v16, %v2475_v23 }
 0x4ea   : > { %2562 = vmatpush1.bf16.msra.mxu1 %v2485_v46  ;;  %3654 = vmatpush1.bf16.msra.mxu0 %v2485_v46 }
 0x4ec   : > { %3943 = vset.pattern.permute.xlu1 %v6354_v41 }
 0x4ed   : > { %3199 = vperm.xlu1 %3943, %v5513_v2  }
 0x4f1   : > { %3944 = vset.pattern.permute.xlu1 %v6352_v57 }
 0x4f2   : > { %2696 = vperm.xlu1 %3944, %v5529_v61  }
 0x4f6   : > { %3945 = vset.pattern.permute.xlu1 %v6351_v25 }
 0x4f7   : > { %2805 = vperm.xlu1 %3945, %v5529_v61  }
 0x4fb   : > { %2809 = vperm.xlu1 %3945, %v5542_v54  }
 0x4ff   : > { %3948 = vset.pattern.permute.xlu1 %v6353_v53 }
 0x500   : > { %2938 = vperm.xlu1 %3948, %v5542_v54  }
 0x504   : > { %3949 = vset.pattern.permute.xlu1 %v6354_v41 }
 0x505   : > { %3203 = vperm.xlu1 %3949, %v5529_v61  }
 0x509   : > { %3951 = vset.pattern.permute.xlu1 %v6355_v0 }
 0x50b   : > { %v2483_v34 = vpop.permute.xlu1 %2482 }
 0x50d   : > { %v2481_v52 = vpop.permute.xlu0 %2480 }
 0x50e   : > { %v2488_v42 = vsel %vm2484_vm14, %v2481_v52, %v2483_v34 }
 0x50f   : > { %2563 = vmatprep.subr.bf16.mxu1 %v2488_v42  ;;  %3655 = vmatprep.subr.bf16.mxu0 %v2488_v42 }
 0x511   : > { %v2479_v3 = vpop.permute.xlu0 %2478 }
 0x512   : > { %v2487_v60 = vsel %vm2484_vm14, %v2479_v3, %v2481_v52 }
 0x513   : > { %2564 = vmatpush1.bf16.msra.mxu1 %v2487_v60  ;;  %3656 = vmatpush1.bf16.msra.mxu0 %v2487_v60 }
 0x516   : > { %3818 = vmatmul.mubr.msk.bf16.vlgmr.msra.gmra.mrb[8].mxu1 %vm683_vm0, %v3954_v15 }
 0x517   : > { %2595 = vmatprep.mubr.bf16.mxu1 %v6355_v0 }
 0x51c   : > { %v5605_v1 = vpop.permute.xlu1 %2519 }
 0x51e   : > { %3819 = vmatmul.mubr.msk.bf16.gmra.mrb[12].mxu1 %vm683_vm0, %v3955_v21 }
 0x520   : > { %v5608_v14 = vpop.permute.xlu1 %2529 }
 0x522   : > { %v5610_v18 = vpop.permute.xlu0 %2958 }
 0x525   : > { %v5612_v35 = vpop.permute.xlu1 %2954 }
 0x527   : > { %v5614_v9 = vpop.permute.xlu0 %3323 }
 0x528   : > { %v3339_v11 = vmul.f32 0.0, %v5614_v9 }
 0x52a   : > { %v5616_v10 = vpop.permute.xlu1 %3223 }
 0x52b   : > { %v3240_v31 = vmul.f32 0.0, %v5616_v10 }
 0x52c   : > { %v5619_v19 = vpop.permute.xlu0 %3231 }
 0x52d   : > { %3266 = vrot.lane.b32.xlu0 %v3240_v31, %s4007_s30  ;;  %v3246_v29 = vmul.f32 0.0, %v5619_v19 }
 0x52e   : > { %v5622_v5 = vpop.permute.xlu1 %3227 }
 0x52f   : > { %v3243_v43 = vmul.f32 0.0, %v5622_v5 }
 0x531   : > { %v5625_v49 = vpop.permute.xlu0 %3030  ;;  %3272 = vrot.lane.b32.xlu1 %v3243_v43, %s4007_s30 }
 0x532   : > { %v3047_v36 = vmul.f32 0.0, %v5625_v49 }
 0x533   : > { %v5629_v44 = vpop.permute.xlu1 %3034 }
 0x534   : > { %v3050_v8 = vmul.f32 0.0, %v5629_v44  ;;  %3073 = vrot.lane.b32.xlu0 %v3047_v36, %s4008_s13 }
 0x535   : > { %v5655_v33 = vpop.permute.xlu0 %3042 }
 0x536   : > { %3079 = vrot.lane.b32.xlu1 %v3050_v8, %s4008_s13  ;;  %v3056_v26 = vmul.f32 0.0, %v5655_v33 }
 0x538   : > { %v5635_v7 = vpop.permute.xlu1 %3319 }
 0x539   : > { %v3336_v39 = vmul.f32 0.0, %v5635_v7 }
 0x53a   : > { %3368 = vrot.lane.b32.xlu1 %v3339_v11, %s4008_s13  ;;  %v5672_v13 = vpop.permute.xlu0 %2801 }
 0x53b   : > { %3362 = vrot.lane.b32.xlu0 %v3336_v39, %s4008_s13  ;;  %v2817_v20 = vmul.f32 0.0, %v5672_v13 }
 0x53d   : > { %v5644_v22 = vpop.permute.xlu1 %2962 }
 0x53f   : > { %3278 = vrot.lane.b32.xlu0 %v3246_v29, %s4007_s30  ;;  %v5679_v58 = vpop.permute.xlu0 %2688 }
 0x540   : > { %v2703_v56 = vmul.f32 0.0, %v5679_v58 }
 0x541   : > { %v5648_v28 = vpop.permute.xlu1 %2966 }
 0x543   : > { %3425 = vrot.lane.b32.xlu0 %v3420_v47, %s4009_s17 }
 0x546   : > { %v5650_v24 = vpop.permute.xlu1 %3235 }
 0x547   : > { %v3249_v51 = vmul.f32 0.0, %v5650_v24 }
 0x549   : > { %3284 = vrot.lane.b32.xlu1 %v3249_v51, %s4007_s30 }
 0x54b   : > { %v5657_v55 = vpop.permute.xlu1 %3038 }
 0x54c   : > { %v3053_v37 = vmul.f32 0.0, %v5657_v55 }
 0x54d   : > { %3427 = vrot.lane.b32.xlu1 %v3424_v59, %s4009_s17 }
 0x54e   : > { %3085 = vrot.lane.b32.xlu0 %v3053_v37, %s4008_s13 }
 0x550   : > { %v5662_v17 = vpop.permute.xlu1 %3327 }
 0x551   : > { %v3342_v62 = vmul.f32 0.0, %v5662_v17  ;;  %3091 = vrot.lane.b32.xlu1 %v3056_v26, %s4008_s13 }
 0x553   : > { %3374 = vrot.lane.b32.xlu0 %v3342_v62, %s4008_s13 }
 0x554   : > { %v5667_v27 = vpop.permute.xlu1 %3331 }
 0x555   : > { %v3345_v4 = vmul.f32 0.0, %v5667_v27 }
 0x557   : > { %3380 = vrot.lane.b32.xlu1 %v3345_v4, %s4008_s13  ;;  %2657 = vperm.xlu0 %3950, %v5519_v63  }
 0x559   : > { %v5674_v48 = vpop.permute.xlu1 %2692 }
 0x55a   : > { %v2706_v38 = vmul.f32 0.0, %v5674_v48 }
 0x55b   : > { %2662 = vperm.xlu1 %3951, %v5513_v2   ;;  %2672 = vperm.xlu0 %3950, %v5542_v54  }
 0x55e   : > { %v5685_v63 = vpop.permute.xlu1 %2797 }
 0x55f   : > { %2667 = vperm.xlu1 %3951, %v5529_v61   ;;  %2733 = vrot.lane.b32.xlu0 %v2706_v38, %s4007_s30  ;;  %v2814_v25 = vmul.f32 0.0, %v5685_v63  ;;  %v5695_v61 = vpop.permute.xlu0 %2700 }
 0x563   : > { %2846 = vrot.lane.b32.xlu0 %v2817_v20, %s4008_s13  ;;  %2727 = vrot.lane.b32.xlu1 %v2703_v56, %s4007_s30  ;;  %v5691_v2 = vpop.permute.xlu1 %2926  ;;  %v5699_v53 = vpop.permute.xlu0 %2934 }
 0x564   : > { %6358 = vst [vmem:[#allocation12_spill] sm:$0xff] %v5699_v53 }
 0x567   : > { %2840 = vrot.lane.b32.xlu1 %v2814_v25, %s4008_s13  ;;  %v5693_v54 = vpop.permute.xlu1 %2930  ;;  %v5703_v45 = vpop.permute.xlu0 %3195 }
 0x56b   : > { %v5707_v32 = vpop.permute.xlu0 %3207 }
 0x56c   : > { %v5697_v57 = vpop.permute.xlu1 %3199  ;;  %6359 = vst [vmem:[#allocation14_spill] sm:$0xff] %v5707_v32 }
 0x56f   : > { %v2525_v40 = vpop.permute.xlu0 %2524 }
 0x571   : > { %v5701_v41 = vpop.permute.xlu1 %2696 }
 0x573   : > { %v2535_v46 = vpop.permute.xlu0 %2534 }
 0x576   : > { %v5705_v12 = vpop.permute.xlu1 %2805 }
 0x57a   : > { %v5709_v23 = vpop.permute.xlu1 %2809 }
 0x57f   : > { %v5711_v16 = vpop.permute.xlu1 %2938 }
 0x580   : > { %6360 = vst [vmem:[#allocation11_spill] sm:$0xff] %v5711_v16 }
 0x584   : > { %v5713_v34 = vpop.permute.xlu1 %3203 }
 0x585   : > { %6361 = vst [vmem:[#allocation13_spill] sm:$0xff] %v5713_v34 }
 0x59f   : > { %v5715_v52 = vpop.permute.xlu0 %3266 }
 0x5a3   : > { %v5717_v42 = vpop.permute.xlu1 %3272 }
 0x5a6   : > { %v5719_v3 = vpop.permute.xlu0 %3073 }
 0x5a8   : > { %v5721_v60 = vpop.permute.xlu1 %3079 }
 0x5ac   : > { %v5725_v21 = vpop.permute.xlu1 %3368 }
 0x5ad   : > { %v5723_v15 = vpop.permute.xlu0 %3362  ;;  %6362 = vst [vmem:[#allocation10_spill] sm:$0xff] %v5725_v21 }
 0x5b1   : > { %v5727_v31 = vpop.permute.xlu0 %3278 }
 0x5b2   : > { %6363 = vst [vmem:[#allocation9_spill] sm:$0xff] %v5727_v31 }
 0x5b5   : > { %v5731_v36 = vpop.permute.xlu0 %3425 }
 0x5bb   : > { %v5729_v43 = vpop.permute.xlu1 %3284 }
 0x5bc   : > { %6364 = vst [vmem:[#allocation7_spill] sm:$0xff] %v5729_v43 }
 0x5bf   : > { %v5733_v8 = vpop.permute.xlu1 %3427 }
 0x5c0   : > { %6365 = vst [vmem:[#allocation8_spill] sm:$0xff] %v5733_v8  ;;  %v5735_v11 = vpop.permute.xlu0 %3085 }
 0x5c1   : > { %6366 = vst [vmem:[#allocation15_spill] sm:$0xff] %v5735_v11 }
 0x5c3   : > { %v5737_v39 = vpop.permute.xlu1 %3091 }
 0x5c4   : > { %6367 = vst [vmem:[#allocation16_spill] sm:$0xff] %v5737_v39 }
 0x5c5   : > { %v5739_v29 = vpop.permute.xlu0 %3374 }
 0x5c6   : > { %6368 = vst [vmem:[#allocation17_spill] sm:$0xff] %v5739_v29 }
 0x5c9   : > { %v5741_v6 = vpop.permute.xlu1 %3380 }
 0x5ca   : > { %6369 = vst [vmem:[#allocation18_spill] sm:$0xff] %v5741_v6 }
 0x5d6   : > { %v5745_v20 = vpop.permute.xlu0 %2657 }
 0x5da   : > { %v5749_v39 = vpop.permute.xlu1 %2662 }
 0x5de   : > { %v5785_v11 = vpop.permute.xlu1 %2667 }
 0x5e9   : > { %v2587_v47 = vpop.f32.mrb[8].mxu1 }
 0x5ea   : > { %v2588_v51 = vadd.f32 %v2587_v47, %v5605_v1  ;;  %v2589_v59 = vpop.f32.mrb[9].mxu1 }
 0x5eb   : > { %v2590_v37 = vadd.f32 %v2589_v59, %v5605_v1  ;;  %v2591_v26 = vpop.f32.mrb[10].mxu1 }
 0x5ec   : > { %vm2606_vm0 = vcmp.gt.f32.partialorder %v2588_v51, 0.0  ;;  %v2614_v62 = vmul.f32 0.01, %v2588_v51  ;;  %v2592_v4 = vadd.f32 %v2591_v26, %v2525_v40  ;;  %v2593_v38 = vpop.f32.mrb[11].mxu1 }
 0x5ed   : > { %vm2607_vm15 = vcmp.gt.f32.partialorder %v2590_v37, 0.0  ;;  %v2615_v56 = vmul.f32 0.01, %v2590_v37  ;;  %v2594_v25 = vadd.f32 %v2593_v38, %v2525_v40 }
 0x5ee   : > { %v5747_v0 = vsel %vm2606_vm0, %v2588_v51, %v2614_v62  ;;  %vm2608_vm1 = vcmp.gt.f32.partialorder %v2592_v4, 0.0  ;;  %v2616_v6 = vmul.f32 0.01, %v2592_v4 }
 0x5ef   : > { %v5751_v47 = vsel %vm2607_vm15, %v2590_v37, %v2615_v56  ;;  %vm2609_vm2 = vcmp.gt.f32.partialorder %v2594_v25, 0.0  ;;  %v2617_v1 = vmul.f32 0.01, %v2594_v25  ;;  %v5755_v59 = vmul.f32 %v5745_v20, %v5747_v0 }
 0x5f0   : > { %v5757_v26 = vsel %vm2608_vm1, %v2592_v4, %v2616_v6  ;;  %v5761_v43 = vmul.f32 %v5745_v20, %v5751_v47  ;;  %v3238_v40 = vmul.f32 %v5616_v10, %v5747_v0  ;;  %v2969_v51 = vmul.f32 %v5612_v35, %v5747_v0 }
 0x5f1   : > { %v5767_v37 = vsel %vm2609_vm2, %v2594_v25, %v2617_v1  ;;  %v5771_v62 = vmul.f32 %v5749_v39, %v5757_v26  ;;  %v2597_v38 = vpop.f32.mrb[12].mxu1  ;;  %v3045_v1 = vmul.f32 %v5625_v49, %v5747_v0  ;;  %v2704_v16 = vmul.f32 %v5679_v58, %v5747_v0 }
 0x5f2   : > { %v5775_v6 = vmul.f32 %v5749_v39, %v5767_v37  ;;  %v2598_v4 = vadd.f32 %v2597_v38, %v5608_v14  ;;  %3262 = vrot.lane.b32.xlu0 %v3238_v40, %s4007_s30  ;;  %2985 = vrot.lane.b32.xlu1 %v2969_v51, %s4007_s30  ;;  %v2599_v56 = vpop.f32.mrb[13].mxu1 }
 0x5f3   : > { %v2600_v32 = vadd.f32 %v2599_v56, %v5608_v14  ;;  %v2601_v25 = vpop.f32.mrb[14].mxu1  ;;  %v5791_v56 = vpop.permute.xlu0 %2672 }
 0x5f4   : > { %vm2610_vm3 = vcmp.gt.f32.partialorder %v2598_v4, 0.0  ;;  %v2618_v29 = vmul.f32 0.01, %v2598_v4  ;;  %v2602_v34 = vadd.f32 %v2601_v25, %v2535_v46  ;;  %v2603_v31 = vpop.f32.mrb[15].mxu1 }
 0x5f5   : > { %vm2611_vm6 = vcmp.gt.f32.partialorder %v2600_v32, 0.0  ;;  %v2619_v40 = vmul.f32 0.01, %v2600_v32  ;;  %v2604_v38 = vadd.f32 %v2603_v31, %v2535_v46  ;;  %v3334_v31 = vmul.f32 %v5635_v7, %v5747_v0 }
 0x5f6   : > { %v5787_v51 = vsel %vm2610_vm3, %v2598_v4, %v2618_v29  ;;  %vm2612_vm7 = vcmp.gt.f32.partialorder %v2602_v34, 0.0  ;;  %v2620_v14 = vmul.f32 0.01, %v2602_v34  ;;  %3069 = vrot.lane.b32.xlu0 %v3045_v1, %s4008_s13  ;;  %2729 = vrot.lane.b32.xlu1 %v2704_v16, %s4007_s30  ;;  %v2812_v16 = vmul.f32 %v5685_v63, %v5747_v0 }
 0x5f7   : > { %v5793_v25 = vsel %vm2611_vm6, %v2600_v32, %v2619_v40  ;;  %vm2613_vm8 = vcmp.gt.f32.partialorder %v2604_v38, 0.0  ;;  %v2621_v53 = vmul.f32 0.01, %v2604_v38  ;;  %v5797_v21 = vmul.f32 %v5785_v11, %v5787_v51 }
 0x5f8   : > { %v5799_v8 = vsel %vm2612_vm7, %v2602_v34, %v2620_v14  ;;  %v5803_v46 = vmul.f32 %v5785_v11, %v5793_v25  ;;  %v2705_v4 = vmul.f32 %v5679_v58, %v5751_v47  ;;  %v2970_v1 = vmul.f32 %v5612_v35, %v5751_v47 }
 0x5f9   : > { %v5809_v32 = vsel %vm2613_vm8, %v2604_v38, %v2621_v53  ;;  %v5813_v29 = vmul.f32 %v5791_v56, %v5799_v8  ;;  %v2813_v53 = vmul.f32 %v5685_v63, %v5751_v47  ;;  %v3239_v40 = vmul.f32 %v5616_v10, %v5751_v47 }
 0x5fa   : > { %3358 = vrot.lane.b32.xlu0 %v3334_v31, %s4008_s13  ;;  %2836 = vrot.lane.b32.xlu1 %v2812_v16, %s4008_s13  ;;  %v5819_v34 = vmul.f32 %v5791_v56, %v5809_v32  ;;  %v2971_v58 = vmul.f32 %v5610_v18, %v5757_v26  ;;  %v3046_v35 = vmul.f32 %v5625_v49, %v5751_v47 }
 0x5fb   : > { %v2815_v63 = vmul.f32 %v5672_v13, %v5757_v26  ;;  %v3335_v10 = vmul.f32 %v5635_v7, %v5751_v47  ;;  %v3242_v38 = vmul.f32 %v5622_v5, %v5767_v37  ;;  %v3241_v49 = vmul.f32 %v5622_v5, %v5757_v26 }
 0x5fc   : > { %v3049_v14 = vmul.f32 %v5629_v44, %v5767_v37  ;;  %v3048_v7 = vmul.f32 %v5629_v44, %v5757_v26  ;;  %v3338_v31 = vmul.f32 %v5614_v9, %v5767_v37  ;;  %v3337_v5 = vmul.f32 %v5614_v9, %v5757_v26 }
 0x5fd   : > { %v2708_v16 = vmul.f32 %v5674_v48, %v5767_v37  ;;  %v2707_v44 = vmul.f32 %v5674_v48, %v5757_v26  ;;  %v2972_v9 = vmul.f32 %v5610_v18, %v5767_v37  ;;  %v2816_v48 = vmul.f32 %v5672_v13, %v5767_v37 }
 0x5fe   : > { %2731 = vrot.lane.b32.xlu0 %v2705_v4, %s4007_s30  ;;  %2987 = vrot.lane.b32.xlu1 %v2970_v1, %s4007_s30  ;;  %v2973_v4 = vmul.f32 %v5644_v22, %v5787_v51  ;;  %v3244_v1 = vmul.f32 %v5619_v19, %v5787_v51  ;;  %v2710_v18 = vmul.f32 %v5701_v41, %v5787_v51 }
 0x5ff   : > { %v2974_v13 = vmul.f32 %v5644_v22, %v5793_v25  ;;  %v2975_v22 = vmul.f32 %v5648_v28, %v5799_v8 }
 0x602   : > { %2838 = vrot.lane.b32.xlu0 %v2813_v53, %s4008_s13  ;;  %3264 = vrot.lane.b32.xlu1 %v3239_v40, %s4007_s30  ;;  %v3051_v53 = vmul.f32 %v5657_v55, %v5787_v51  ;;  %v3340_v40 = vmul.f32 %v5662_v17, %v5787_v51 }
 0x606   : > { %2989 = vrot.lane.b32.xlu0 %v2971_v58, %s4007_s30  ;;  %3071 = vrot.lane.b32.xlu1 %v3046_v35, %s4008_s13  ;;  %v2711_v58 = vmul.f32 %v5701_v41, %v5793_v25  ;;  %v3245_v35 = vmul.f32 %v5619_v19, %v5793_v25 }
 0x60a   : > { %2842 = vrot.lane.b32.xlu0 %v2815_v63, %s4008_s13  ;;  %3360 = vrot.lane.b32.xlu1 %v3335_v10, %s4008_s13  ;;  %v3821_v63 = vld [vmem:[%s6286_s4 + $0x4] ss:$8 sm:$0x3]  ;;  %v3052_v10 = vmul.f32 %v5657_v55, %v5793_v25  ;;  %v3248_v55 = vmul.f32 %v5650_v24, %v5809_v32 }
 0x60b   : > { %v2903_v19 = vrot.slane %v3821_v63, %v6357_v30  ;;  %v3054_v30 = vmul.f32 %v5655_v33, %v5799_v8 }
 0x60e   : > { %3270 = vrot.lane.b32.xlu0 %v3242_v38, %s4007_s30  ;;  %3268 = vrot.lane.b32.xlu1 %v3241_v49, %s4007_s30  ;;  %v3341_v38 = vmul.f32 %v5662_v17, %v5793_v25  ;;  %v2712_v49 = vmul.f32 0.0, %v5695_v61  ;;  %v3055_v17 = vmul.f32 %v5655_v33, %v5809_v32  ;;  %v2976_v33 = vmul.f32 %v5648_v28, %v5809_v32 }
 0x60f   : > { %v2818_v28 = vmul.f32 %v5705_v12, %v5787_v51 }
 0x612   : > { %3077 = vrot.lane.b32.xlu0 %v3049_v14, %s4008_s13  ;;  %3075 = vrot.lane.b32.xlu1 %v3048_v7, %s4008_s13  ;;  %v3247_v14 = vmul.f32 %v5650_v24, %v5799_v8  ;;  %v3343_v7 = vmul.f32 %v5667_v27, %v5799_v8  ;;  %v3344_v24 = vmul.f32 %v5667_v27, %v5809_v32 }
 0x613   : > { %v2821_v27 = vmul.f32 %v5709_v23, %v5799_v8 }
 0x616   : > { %3366 = vrot.lane.b32.xlu0 %v3338_v31, %s4008_s13  ;;  %3364 = vrot.lane.b32.xlu1 %v3337_v5, %s4008_s13  ;;  %v2713_v31 = vmul.f32 %v5695_v61, %v5799_v8  ;;  %v2819_v5 = vmul.f32 %v5705_v12, %v5793_v25 }
 0x61a   : > { %2737 = vrot.lane.b32.xlu0 %v2708_v16, %s4007_s30  ;;  %2735 = vrot.lane.b32.xlu1 %v2707_v44, %s4007_s30  ;;  %v2899_v16 = vrot.slane %v3821_v63, %v6356_v50  ;;  %v2709_v44 = vmul.f32 0.0, %v5701_v41  ;;  %v2714_v50 = vmul.f32 %v5695_v61, %v5809_v32  ;;  %v5956_v41 = vpop.permute.xlu0 %2733 }
 0x61e   : > { %2993 = vrot.lane.b32.xlu0 %v2973_v4, %s4007_s30  ;;  %2991 = vrot.lane.b32.xlu1 %v2972_v9, %s4007_s30  ;;  %v2823_v4 = vmul.f32 0.0, %v5709_v23  ;;  %v2820_v9 = vmul.f32 0.0, %v5705_v12 }
 0x622   : > { %3274 = vrot.lane.b32.xlu0 %v3244_v1, %s4007_s30  ;;  %2844 = vrot.lane.b32.xlu1 %v2816_v48, %s4008_s13  ;;  %v2728_v1 = vpop.permute.xlu1 %2727  ;;  %v2822_v48 = vmul.f32 %v5709_v23, %v5809_v32 }
 0x626   : > { %3081 = vrot.lane.b32.xlu0 %v3051_v53, %s4008_s13  ;;  %2741 = vrot.lane.b32.xlu1 %v2710_v18, %s4007_s30  ;;  %v2841_v53 = vpop.permute.xlu1 %2840  ;;  %v5962_v18 = vpop.permute.xlu0 %2846 }
 0x62a   : > { %3370 = vrot.lane.b32.xlu0 %v3340_v40, %s4008_s13  ;;  %2995 = vrot.lane.b32.xlu1 %v2974_v13, %s4007_s30  ;;  %v2941_v13 = vmul.f32 0.0, %v5691_v2 }
 0x62e   : > { %2743 = vrot.lane.b32.xlu0 %v2711_v58, %s4007_s30  ;;  %3276 = vrot.lane.b32.xlu1 %v3245_v35, %s4007_s30  ;;  %v2675_v58 = vmul.f32 0.0, %v5745_v20 }
 0x632   : > { %2997 = vrot.lane.b32.xlu0 %v2975_v22, %s4007_s30  ;;  %3083 = vrot.lane.b32.xlu1 %v3052_v10, %s4008_s13 }
 0x636   : > { %2906 = vrot.lane.b32.xlu0 %v2903_v19, %s4010_s26  ;;  %3372 = vrot.lane.b32.xlu1 %v3341_v38, %s4008_s13 }
 0x63a   : > { %2745 = vrot.lane.b32.xlu0 %v2712_v49, %s4007_s30  ;;  %3280 = vrot.lane.b32.xlu1 %v3247_v14, %s4007_s30 }
 0x63e   : > { %3282 = vrot.lane.b32.xlu0 %v3248_v55, %s4007_s30  ;;  %3087 = vrot.lane.b32.xlu1 %v3054_v30, %s4008_s13 }
 0x642   : > { %3089 = vrot.lane.b32.xlu0 %v3055_v17, %s4008_s13  ;;  %3376 = vrot.lane.b32.xlu1 %v3343_v7, %s4008_s13 }
 0x646   : > { %3378 = vrot.lane.b32.xlu0 %v3344_v24, %s4008_s13  ;;  %2747 = vrot.lane.b32.xlu1 %v2713_v31, %s4007_s30  ;;  %v3210_v31 = vmul.f32 0.0, %v5703_v45 }
 0x64a   : > { %2999 = vrot.lane.b32.xlu1 %v2976_v33, %s4007_s30  ;;  %2850 = vrot.lane.b32.xlu0 %v2819_v5, %s4008_s13 }
 0x64e   : > { %2904 = vrot.lane.b32.xlu1 %v2899_v16, %s4010_s26  ;;  %2854 = vrot.lane.b32.xlu0 %v2821_v27, %s4008_s13  ;;  %v2942_v27 = vmul.f32 %v5691_v2, %v5747_v0 }
 0x652   : > { %2739 = vrot.lane.b32.xlu1 %v2709_v44, %s4007_s30  ;;  %2858 = vrot.lane.b32.xlu0 %v2823_v4, %s4008_s13  ;;  %v2943_v44 = vmul.f32 %v5691_v2, %v5751_v47 }
 0x656   : > { %2848 = vrot.lane.b32.xlu1 %v2818_v28, %s4008_s13  ;;  %2749 = vrot.lane.b32.xlu0 %v2714_v50, %s4007_s30 }
 0x65a   : > { %2852 = vrot.lane.b32.xlu1 %v2820_v9, %s4008_s13 }
 0x65e   : > { %2856 = vrot.lane.b32.xlu1 %v2822_v48, %s4008_s13 }
 0x664   : > { %v5964_v61 = vpop.permute.xlu0 %3262  ;;  %v2986_v40 = vpop.permute.xlu1 %2985 }
 0x665   : > { %v3017_v12 = vadd.f32 %v2986_v40, %v2941_v13  ;;  %v3306_v4 = vadd.f32 %v5964_v61, %v3210_v31 }
 0x668   : > { %v3070_v35 = vpop.permute.xlu0 %3069  ;;  %v2730_v63 = vpop.permute.xlu1 %2729 }
 0x669   : > { %v3113_v22 = vadd.f32 %v3070_v35, %v3017_v12  ;;  %v2752_v10 = vsel %vm2751_vm9, %v2728_v1, %v2730_v63 }
 0x66a   : > { %v2772_v23 = vadd.f32 %v2752_v10, %v2675_v58  ;;  %v2944_v10 = vmul.f32 0.0, %v5693_v54 }
 0x66b   : > { %3137 = vrot.lane.b32.xlu1 %v3113_v22, %s4011_s16 }
 0x66c   : > { %v5970_v19 = vpop.permute.xlu0 %3358  ;;  %v2837_v38 = vpop.permute.xlu1 %2836 }
 0x66d   : > { %v5972_v49 = vadd.f32 %v2837_v38, %v2772_v23 }
 0x670   : > { %v2732_v14 = vpop.permute.xlu0 %2731  ;;  %v2988_v55 = vpop.permute.xlu1 %2987 }
 0x671   : > { %v2753_v30 = vsel %vm2751_vm9, %v2730_v63, %v2732_v14  ;;  %v2774_v20 = vadd.f32 %v2732_v14, %v5761_v43  ;;  %v3001_v33 = vsel %vm2751_vm9, %v2986_v40, %v2988_v55  ;;  %v3019_v50 = vadd.f32 %v2988_v55, %v2943_v44 }
 0x672   : > { %v2773_v17 = vadd.f32 %v2753_v30, %v5755_v59  ;;  %v3018_v28 = vadd.f32 %v3001_v33, %v2942_v27  ;;  %v3402_v40 = vadd.f32 %v5970_v19, %v3306_v4  ;;  %v3212_v4 = vmul.f32 %v5703_v45, %v5751_v47 }
 0x674   : > { %v2839_v7 = vpop.permute.xlu0 %2838  ;;  %v3265_v24 = vpop.permute.xlu1 %3264  ;;  %v3434_v63 = vmul.f32 %v5731_v36, %v3402_v40 }
 0x675   : > { %v2861_v5 = vsel %vm2860_vm4, %v2837_v38, %v2839_v7  ;;  %v2862_v16 = vsel %vm2860_vm4, %v2839_v7, %v2841_v53 }
 0x676   : > { %v5985_v43 = vadd.f32 %v2861_v5, %v2773_v17  ;;  %v5987_v59 = vadd.f32 %v2862_v16, %v2774_v20  ;;  %v2678_v20 = vmul.f32 0.0, %v5749_v39  ;;  %v3287_v16 = vsel %vm2751_vm9, %v3265_v24, %v5715_v52 }
 0x677   : > { %v3286_v39 = vsel %vm2751_vm9, %v5964_v61, %v3265_v24  ;;  %v3308_v47 = vadd.f32 %v3287_v16, %v3212_v4 }
 0x678   : > { %v2990_v9 = vpop.permute.xlu0 %2989  ;;  %v3072_v1 = vpop.permute.xlu1 %3071 }
 0x679   : > { %v3093_v48 = vsel %vm2860_vm4, %v3070_v35, %v3072_v1  ;;  %v3094_v53 = vsel %vm2860_vm4, %v3072_v1, %v5719_v3  ;;  %v3020_v3 = vadd.f32 %v2990_v9, %v2944_v10 }
 0x67a   : > { %v3114_v13 = vadd.f32 %v3093_v48, %v3018_v28  ;;  %v3115_v12 = vadd.f32 %v3094_v53, %v3019_v50 }
 0x67c   : > { %v2843_v2 = vpop.permute.xlu0 %2842  ;;  %3141 = vrot.lane.b32.xlu0 %v3115_v12, %s4011_s16  ;;  %3139 = vrot.lane.b32.xlu1 %v3114_v13, %s4011_s16  ;;  %v3361_v58 = vpop.permute.xlu1 %3360 }
 0x67d   : > { %v3383_v28 = vsel %vm2860_vm4, %v3361_v58, %v5723_v15  ;;  %v3382_v61 = vsel %vm2860_vm4, %v5970_v19, %v3361_v58  ;;  %v3214_v19 = vmul.f32 %v5697_v57, %v5757_v26 }
 0x67e   : > { %v3404_v40 = vadd.f32 %v3383_v28, %v3308_v47 }
 0x680   : > { %v3271_v22 = vpop.permute.xlu0 %3270  ;;  %3458 = vrot.lane.b32.xlu1 %v3434_v63, %s4012_s23  ;;  %v3269_v35 = vpop.permute.xlu1 %3268 }
 0x681   : > { %v3288_v13 = vsel %vm2751_vm9, %v3269_v35, %v3271_v22 }
 0x684   : > { %v3078_v23 = vpop.permute.xlu0 %3077  ;;  %v3076_v38 = vpop.permute.xlu1 %3075 }
 0x685   : > { %v3116_v14 = vadd.f32 %v3076_v38, %v3020_v3 }
 0x687   : > { %3143 = vrot.lane.b32.xlu0 %v3116_v14, %s4011_s16 }
 0x688   : > { %v3367_v55 = vpop.permute.xlu0 %3366  ;;  %v3365_v30 = vpop.permute.xlu1 %3364 }
 0x689   : > { %v3384_v14 = vsel %vm2860_vm4, %v3365_v30, %v3367_v55 }
 0x68c   : > { %v2738_v17 = vpop.permute.xlu0 %2737  ;;  %v2736_v7 = vpop.permute.xlu1 %2735 }
 0x68d   : > { %v2777_v31 = vadd.f32 %v2738_v17, %v5775_v6  ;;  %v2754_v33 = vsel %vm2751_vm9, %v5956_v41, %v2736_v7  ;;  %v2755_v5 = vsel %vm2751_vm9, %v2736_v7, %v2738_v17  ;;  %v2946_v6 = vmul.f32 %v5693_v54, %v5767_v37  ;;  %v6370_v7 = vld [vmem:[#allocation8_spill] sm:$0xff] }
 0x68e   : > { %v2775_v27 = vadd.f32 %v2754_v33, %v2678_v20  ;;  %v2776_v44 = vadd.f32 %v2755_v5, %v5771_v62  ;;  %v3211_v41 = vmul.f32 %v5703_v45, %v5747_v0  ;;  %v2945_v62 = vmul.f32 %v5693_v54, %v5757_v26 }
 0x68f   : > { %v3213_v0 = vmul.f32 0.0, %v5697_v57  ;;  %v3096_v45 = vsel %vm2860_vm4, %v3078_v23, %v5721_v60  ;;  %v3095_v54 = vsel %vm2860_vm4, %v3076_v38, %v3078_v23  ;;  %v3289_v23 = vsel %vm2751_vm9, %v3271_v22, %v5717_v42  ;;  %v6371_v42 = vld [vmem:[#allocation10_spill] sm:$0xff] }
 0x690   : > { %v6018_v50 = vadd.f32 %v2843_v2, %v2775_v27  ;;  %v2994_v52 = vpop.permute.xlu0 %2993  ;;  %v2992_v1 = vpop.permute.xlu1 %2991  ;;  %v3307_v53 = vadd.f32 %v3286_v39, %v3211_v41  ;;  %v3310_v38 = vadd.f32 %v3288_v13, %v3214_v19  ;;  %v3385_v22 = vsel %vm2860_vm4, %v3367_v55, %v6371_v42 }
 0x691   : > { %v3002_v24 = vsel %vm2751_vm9, %v2990_v9, %v2992_v1  ;;  %v3022_v48 = vadd.f32 %v2992_v1, %v2946_v6  ;;  %v3309_v3 = vadd.f32 %v3269_v35, %v3213_v0  ;;  %v6047_v35 = vsel %vm3429_vm10, %v5731_v36, %v6370_v7 }
 0x692   : > { %v3021_v15 = vadd.f32 %v3002_v24, %v2945_v62  ;;  %v3403_v63 = vadd.f32 %v3382_v61, %v3307_v53  ;;  %v3406_v16 = vadd.f32 %v3384_v14, %v3310_v38  ;;  %vm3576_vm10 = vcmask 416768  }
 0x693   : > { %v3118_v12 = vadd.f32 %v3096_v45, %v3022_v48  ;;  %v3405_v33 = vadd.f32 %v3365_v30, %v3309_v3 }
 0x694   : > { %v3117_v9 = vadd.f32 %v3095_v54, %v3021_v15  ;;  %v6032_v58 = vpop.permute.xlu0 %3274  ;;  %v2845_v10 = vpop.permute.xlu1 %2844  ;;  %v3435_v5 = vmul.f32 %v6047_v35, %v3403_v63  ;;  %v6373_v54 = vld [vmem:[#allocation15_spill] sm:$0xff] }
 0x695   : > { %v2863_v60 = vsel %vm2860_vm4, %v2843_v2, %v2845_v10  ;;  %v2864_v20 = vsel %vm2860_vm4, %v2845_v10, %v5962_v18  ;;  %3147 = vrot.lane.b32.xlu0 %v3118_v12, %s4011_s16  ;;  %v3436_v2 = vmul.f32 %v6370_v7, %v3404_v40  ;;  %v3215_v18 = vmul.f32 %v5697_v57, %v5767_v37  ;;  %v6372_v37 = vld [vmem:[#allocation12_spill] sm:$0xff] }
 0x696   : > { %v6041_v17 = vadd.f32 %v2863_v60, %v2776_v44  ;;  %v2886_v26 = vadd.f32 %v2864_v20, %v2777_v31  ;;  %3145 = vrot.lane.b32.xlu1 %v3117_v9, %s4011_s16  ;;  %v3437_v39 = vmul.f32 %v5731_v36, %v3405_v33  ;;  %v3438_v57 = vmul.f32 %v6047_v35, %v3406_v16  ;;  %v6374_v20 = vld [vmem:[#allocation11_spill] sm:$0xff] }
 0x697   : > { %v3311_v44 = vadd.f32 %v3289_v23, %v3215_v18  ;;  %v2947_v30 = vmul.f32 0.0, %v6372_v37  ;;  %v2948_v53 = vmul.f32 %v6372_v37, %v5787_v51  ;;  %v2949_v0 = vmul.f32 %v6372_v37, %v5793_v25 }
 0x698   : > { %v3082_v31 = vpop.permute.xlu0 %3081  ;;  %v6055_v27 = vpop.permute.xlu1 %2741  ;;  %v2950_v23 = vmul.f32 0.0, %v6374_v20 }
 0x699   : > { %3462 = vrot.lane.b32.xlu0 %v3436_v2, %s4012_s23  ;;  %v3407_v4 = vadd.f32 %v3385_v22, %v3311_v44  ;;  %v3023_v55 = vadd.f32 %v2994_v52, %v2947_v30  ;;  %v2684_v22 = vmul.f32 0.0, %v5791_v56  ;;  %v2952_v56 = vmul.f32 %v6374_v20, %v5809_v32 }
 0x69a   : > { %3460 = vrot.lane.b32.xlu1 %v3435_v5, %s4012_s23 }
 0x69b   : > { %v3439_v28 = vmul.f32 %v6370_v7, %v3407_v4  ;;  %v3119_v62 = vadd.f32 %v3082_v31, %v3023_v55 }
 0x69c   : > { %v6062_v6 = vpop.permute.xlu0 %3370  ;;  %v2996_v41 = vpop.permute.xlu1 %2995 }
 0x69d   : > { %3464 = vrot.lane.b32.xlu0 %v3437_v39, %s4012_s23  ;;  %v3003_v61 = vsel %vm2751_vm9, %v2994_v52, %v2996_v41  ;;  %v3025_v15 = vadd.f32 %v2996_v41, %v2949_v0  ;;  %v6376_v39 = vld [vmem:[#allocation13_spill] sm:$0xff] }
 0x69e   : > { %3466 = vrot.lane.b32.xlu1 %v3438_v57, %s4012_s23  ;;  %v3024_v52 = vadd.f32 %v3003_v61, %v2948_v53  ;;  %v3217_v57 = vmul.f32 %v6376_v39, %v5787_v51  ;;  %v3218_v37 = vmul.f32 %v6376_v39, %v5793_v25  ;;  %v6377_v41 = vld [vmem:[#allocation17_spill] sm:$0xff]  ;;  %v2951_v51 = vmul.f32 %v6374_v20, %v5799_v8 }
 0x6a0   : > { %v2744_v1 = vpop.permute.xlu0 %2743  ;;  %v3277_v47 = vpop.permute.xlu1 %3276 }
 0x6a1   : > { %v2757_v24 = vsel %vm2751_vm9, %v6055_v27, %v2744_v1  ;;  %v6071_v48 = vadd.f32 %v2744_v1, %v5803_v46  ;;  %3468 = vrot.lane.b32.xlu0 %v3439_v28, %s4012_s23  ;;  %v3290_v30 = vsel %vm2751_vm9, %v6032_v58, %v3277_v47  ;;  %v6378_v28 = vld [vmem:[#allocation14_spill] sm:$0xff] }
 0x6a2   : > { %v6079_v45 = vadd.f32 %v2757_v24, %v5797_v21  ;;  %3149 = vrot.lane.b32.xlu1 %v3119_v62, %s4011_s16  ;;  %v3221_v62 = vmul.f32 %v6378_v28, %v5809_v32  ;;  %v3313_v0 = vadd.f32 %v3290_v30, %v3217_v57  ;;  %v3216_v30 = vmul.f32 0.0, %v6376_v39 }
 0x6a4   : > { %v2998_v40 = vpop.permute.xlu0 %2997  ;;  %v3084_v13 = vpop.permute.xlu1 %3083 }
 0x6a5   : > { %v3097_v46 = vsel %vm2860_vm4, %v3082_v31, %v3084_v13  ;;  %v3098_v12 = vsel %vm2860_vm4, %v3084_v13, %v6373_v54  ;;  %v3026_v38 = vadd.f32 %v2998_v40, %v2950_v23  ;;  %v6375_v31 = vld [vmem:[#allocation9_spill] sm:$0xff]  ;;  %v6380_v13 = vld [vmem:[#allocation16_spill] sm:$0xff] }
 0x6a6   : > { %v3120_v63 = vadd.f32 %v3097_v46, %v3024_v52  ;;  %v3121_v19 = vadd.f32 %v3098_v12, %v3025_v15  ;;  %v3291_v44 = vsel %vm2751_vm9, %v3277_v47, %v6375_v31  ;;  %v6379_v52 = vld [vmem:[#allocation7_spill] sm:$0xff] }
 0x6a7   : > { %v3314_v25 = vadd.f32 %v3291_v44, %v3218_v37  ;;  %v2681_v37 = vmul.f32 0.0, %v5785_v11 }
 0x6a8   : > { %v6085_v9 = vpop.permute.xlu0 %2906  ;;  %3153 = vrot.lane.b32.xlu0 %v3121_v19, %s4011_s16  ;;  %3151 = vrot.lane.b32.xlu1 %v3120_v63, %s4011_s16  ;;  %v3373_v21 = vpop.permute.xlu1 %3372 }
 0x6a9   : > { %v6091_v10 = vmul.f32 %v6085_v9, %v5987_v59  ;;  %v6094_v3 = vmul.f32 %v6085_v9, %v2886_v26  ;;  %v3387_v55 = vsel %vm2860_vm4, %v3373_v21, %v6377_v41  ;;  %v3386_v47 = vsel %vm2860_vm4, %v6062_v6, %v3373_v21 }
 0x6aa   : > { %v3410_v54 = vadd.f32 %v3387_v55, %v3314_v25  ;;  %v3220_v21 = vmul.f32 %v6378_v28, %v5799_v8 }
 0x6ac   : > { %v2746_v14 = vpop.permute.xlu0 %2745  ;;  %v3281_v60 = vpop.permute.xlu1 %3280  ;;  %v3442_v44 = vmul.f32 %v6370_v7, %v3410_v54 }
 0x6b0   : > { %v3283_v2 = vpop.permute.xlu0 %3282  ;;  %v3088_v18 = vpop.permute.xlu1 %3087 }
 0x6b1   : > { %v3122_v33 = vadd.f32 %v3088_v18, %v3026_v38  ;;  %v3293_v15 = vsel %vm2751_vm9, %v3283_v2, %v6379_v52  ;;  %v3292_v12 = vsel %vm2751_vm9, %v3281_v60, %v3283_v2 }
 0x6b3   : > { %3155 = vrot.lane.b32.xlu0 %v3122_v33, %s4011_s16 }
 0x6b4   : > { %v3090_v5 = vpop.permute.xlu0 %3089  ;;  %v3377_v42 = vpop.permute.xlu1 %3376 }
 0x6b5   : > { %v3100_v32 = vsel %vm2860_vm4, %v3090_v5, %v6380_v13  ;;  %v3099_v63 = vsel %vm2860_vm4, %v3088_v18, %v3090_v5  ;;  %v3316_v18 = vadd.f32 %v3292_v12, %v3220_v21 }
 0x6b8   : > { %v3379_v16 = vpop.permute.xlu0 %3378  ;;  %v6099_v59 = vpop.permute.xlu1 %2747 }
 0x6b9   : > { %v2758_v26 = vsel %vm2751_vm9, %v2746_v14, %v6099_v59  ;;  %v3409_v14 = vadd.f32 %v3386_v47, %v3313_v0 }
 0x6ba   : > { %v2781_v4 = vadd.f32 %v2758_v26, %v2684_v22  ;;  %v3317_v22 = vadd.f32 %v3293_v15, %v3221_v62  ;;  %v3388_v26 = vsel %vm2860_vm4, %v3377_v42, %v3379_v16 }
 0x6bb   : > { %v3412_v41 = vadd.f32 %v3388_v26, %v3316_v18 }
 0x6bc   : > { %v6117_v1 = vpop.permute.xlu0 %2850  ;;  %v3000_v61 = vpop.permute.xlu1 %2999 }
 0x6bd   : > { %v3004_v24 = vsel %vm2751_vm9, %v2998_v40, %v3000_v61  ;;  %v3028_v53 = vadd.f32 %v3000_v61, %v2952_v56  ;;  %v6381_v40 = vld [vmem:[#allocation18_spill] sm:$0xff]  ;;  %v3441_v56 = vmul.f32 %v6047_v35, %v3409_v14  ;;  %v3444_v25 = vmul.f32 %v6047_v35, %v3412_v41 }
 0x6be   : > { %v3027_v46 = vadd.f32 %v3004_v24, %v2951_v51  ;;  %v3389_v20 = vsel %vm2860_vm4, %v3379_v16, %v6381_v40  ;;  %v3219_v16 = vmul.f32 0.0, %v6378_v28  ;;  %v3312_v28 = vadd.f32 %v6032_v58, %v3216_v30 }
 0x6bf   : > { %v3124_v19 = vadd.f32 %v3100_v32, %v3028_v53 }
 0x6c0   : > { %v3123_v23 = vadd.f32 %v3099_v63, %v3027_v46  ;;  %v2855_v38 = vpop.permute.xlu0 %2854  ;;  %v6134_v33 = vpop.permute.xlu1 %2904  ;;  %v3315_v62 = vadd.f32 %v3281_v60, %v3219_v16  ;;  %v3408_v39 = vadd.f32 %v6062_v6, %v3312_v28 }
 0x6c1   : > { %v2890_v31 = vadd.f32 %v2855_v38, %v2781_v4  ;;  %v2909_v2 = vsel %vm2908_vm5, %v6134_v33, %v6085_v9  ;;  %3159 = vrot.lane.b32.xlu0 %v3124_v19, %s4011_s16  ;;  %v3413_v4 = vadd.f32 %v3389_v20, %v3317_v22 }
 0x6c2   : > { %3157 = vrot.lane.b32.xlu1 %v3123_v23, %s4011_s16  ;;  %v6143_v8 = vmul.f32 %v2909_v2, %v5985_v43  ;;  %v6146_v5 = vmul.f32 %v2909_v2, %v6041_v17  ;;  %v3411_v61 = vadd.f32 %v3377_v42, %v3315_v62  ;;  %v3440_v6 = vmul.f32 %v5731_v36, %v3408_v39 }
 0x6c3   : > { %v6151_v57 = vmul.f32 %v6134_v33, %v2890_v31  ;;  %v3445_v11 = vmul.f32 %v6370_v7, %v3413_v4  ;;  %v2913_v23 = vmul.f32 %v6134_v33, %v5972_v49 }
 0x6c4   : > { %v2859_v43 = vpop.permute.xlu0 %2858  ;;  %v2740_v55 = vpop.permute.xlu1 %2739  ;;  %v3443_v7 = vmul.f32 %v5731_v36, %v3411_v61 }
 0x6c5   : > { %v2756_v17 = vsel %vm2751_vm9, %v2740_v55, %v6055_v27  ;;  %3474 = vrot.lane.b32.xlu0 %v3442_v44, %s4012_s23  ;;  %v2916_v44 = vmul.f32 %v6134_v33, %v6018_v50 }
 0x6c6   : > { %v2778_v51 = vadd.f32 %v2756_v17, %v2681_v37  ;;  %3472 = vrot.lane.b32.xlu1 %v3441_v56, %s4012_s23 }
 0x6c8   : > { %v2750_v47 = vpop.permute.xlu0 %2749  ;;  %v2849_v24 = vpop.permute.xlu1 %2848 }
 0x6c9   : > { %v2759_v60 = vsel %vm2751_vm9, %v6099_v59, %v2750_v47  ;;  %v2865_v27 = vsel %vm2860_vm4, %v2849_v24, %v6117_v1  ;;  %v2887_v53 = vadd.f32 %v2849_v24, %v2778_v51  ;;  %3480 = vrot.lane.b32.xlu0 %v3445_v11, %s4012_s23 }
 0x6ca   : > { %v2782_v58 = vadd.f32 %v2759_v60, %v5813_v29  ;;  %v2888_v42 = vadd.f32 %v2865_v27, %v6079_v45  ;;  %3478 = vrot.lane.b32.xlu1 %v3444_v25, %s4012_s23  ;;  %v2783_v45 = vadd.f32 %v2750_v47, %v5819_v34 }
 0x6cb   : > { %v6174_v35 = vmul.f32 %v6134_v33, %v2887_v53 }
 0x6cc   : > { %v2853_v59 = vpop.permute.xlu1 %2852  ;;  %v6177_v0 = vmul.f32 %v2909_v2, %v2888_v42 }
 0x6cd   : > { %v2866_v52 = vsel %vm2860_vm4, %v6117_v1, %v2853_v59  ;;  %3476 = vrot.lane.b32.xlu0 %v3443_v7, %s4012_s23 }
 0x6ce   : > { %v2889_v29 = vadd.f32 %v2866_v52, %v6071_v48  ;;  %3470 = vrot.lane.b32.xlu1 %v3440_v6, %s4012_s23 }
 0x6d0   : > { %v2857_v15 = vpop.permute.xlu1 %2856  ;;  %v6186_v13 = vmul.f32 %v6085_v9, %v2889_v29 }
 0x6d1   : > { %v2867_v36 = vsel %vm2860_vm4, %v2855_v38, %v2857_v15  ;;  %v2868_v32 = vsel %vm2860_vm4, %v2857_v15, %v2859_v43  ;;  %v6207_v43 = vstv %s3820_s24 }
 0x6d2   : > { %v2891_v46 = vadd.f32 %v2867_v36, %v2782_v58  ;;  %v2892_v54 = vadd.f32 %v2868_v32, %v2783_v45 }
 0x6d4   : > { %v6191_v1 = vmul.f32 %v6085_v9, %v2892_v54  ;;  %v6193_v12 = vmul.f32 %v2909_v2, %v2891_v46 }
 0x6dd   : > { %v3138_v48 = vpop.permute.xlu1 %3137 }
 0x6ee   : > { %v3140_v63 = vpop.permute.xlu1 %3139  ;;  %v3142_v19 = vpop.permute.xlu0 %3141 }
 0x6ef   : > { %v3162_v20 = vsel %vm3161_vm11, %v3138_v48, %v3140_v63  ;;  %v3163_v9 = vsel %vm3161_vm11, %v3140_v63, %v3142_v19  ;;  %v3184_v31 = vadd.f32 %v3142_v19, %v6091_v10 }
 0x6f0   : > { %v3182_v22 = vadd.f32 %v3162_v20, %v2913_v23  ;;  %v3183_v49 = vadd.f32 %v3163_v9, %v6143_v8 }
 0x6f2   : > { %v3459_v34 = vpop.permute.xlu1 %3458 }
 0x6f9   : > { %v3144_v14 = vpop.permute.xlu0 %3143 }
 0x707   : > { %v3148_v21 = vpop.permute.xlu0 %3147 }
 0x708   : > { %v3146_v40 = vpop.permute.xlu1 %3145  ;;  %v3187_v17 = vadd.f32 %v3148_v21, %v6094_v3 }
 0x709   : > { %v3164_v2 = vsel %vm3161_vm11, %v3144_v14, %v3146_v40  ;;  %v3165_v56 = vsel %vm3161_vm11, %v3146_v40, %v3148_v21 }
 0x70a   : > { %v3185_v41 = vadd.f32 %v3164_v2, %v2916_v44  ;;  %v3186_v28 = vadd.f32 %v3165_v56, %v6146_v5 }
 0x70b   : > { %v3463_v38 = vpop.permute.xlu0 %3462 }
 0x70c   : > { %v3461_v26 = vpop.permute.xlu1 %3460  ;;  %v3505_v37 = vadd.f32 %v3463_v38, %v3184_v31 }
 0x70d   : > { %v3483_v18 = vsel %vm3482_vm12, %v3459_v34, %v3461_v26  ;;  %v3484_v16 = vsel %vm3482_vm12, %v3461_v26, %v3463_v38 }
 0x70e   : > { %v3503_v4 = vadd.f32 %v3483_v18, %v3182_v22  ;;  %v3504_v55 = vadd.f32 %v3484_v16, %v3183_v49  ;;  %v3530_v8 = vmul.f32 %v6207_v43, %v3505_v37  ;;  %vm3517_vm0 = vcmp.gt.f32.partialorder %v3505_v37, 0.0 }
 0x70f   : > { %v3465_v30 = vpop.permute.xlu0 %3464 }
 0x710   : > { %v3467_v10 = vpop.permute.xlu1 %3466  ;;  %v3528_v50 = vmul.f32 %v6207_v43, %v3503_v4  ;;  %vm3515_vm13 = vcmp.gt.f32.partialorder %v3503_v4, 0.0  ;;  %vm3516_vm15 = vcmp.gt.f32.partialorder %v3504_v55, 0.0  ;;  %v3529_v25 = vmul.f32 %v6207_v43, %v3504_v55 }
 0x711   : > { %v3485_v62 = vsel %vm3482_vm12, %v3465_v30, %v3467_v10  ;;  %v3542_v53 = vsel %vm3517_vm0, %v3505_v37, %v3530_v8 }
 0x712   : > { %v3506_v33 = vadd.f32 %v3485_v62, %v3185_v41  ;;  %v3540_v47 = vsel %vm3515_vm13, %v3503_v4, %v3528_v50  ;;  %v3541_v42 = vsel %vm3516_vm15, %v3504_v55, %v3529_v25 }
 0x713   : > { %v3469_v51 = vpop.permute.xlu0 %3468 }
 0x714   : > { %vm3518_vm14 = vcmp.gt.f32.partialorder %v3506_v33, 0.0  ;;  %v3531_v61 = vmul.f32 %v6207_v43, %v3506_v33  ;;  %v3486_v11 = vsel %vm3482_vm12, %v3467_v10, %v3469_v51  ;;  %v3508_v39 = vadd.f32 %v3469_v51, %v3187_v17  ;;  %v3150_v29 = vpop.permute.xlu1 %3149 }
 0x715   : > { %v3507_v3 = vadd.f32 %v3486_v11, %v3186_v28  ;;  %v3609_v28 = vld [vmem:[%s6293_s11] sm:$0xff]  ;;  %v3611_v11 = vld [vmem:[%s6293_s11 + $0x10] sm:$0xff] }
 0x716   : > { %v3543_v24 = vsel %vm3518_vm14, %v3506_v33, %v3531_v61  ;;  %vm3520_vm1 = vcmp.gt.f32.partialorder %v3508_v39, 0.0  ;;  %v3533_v5 = vmul.f32 %v6207_v43, %v3508_v39 }
 0x717   : > { %vm3519_vm2 = vcmp.gt.f32.partialorder %v3507_v3, 0.0  ;;  %v3532_v60 = vmul.f32 %v6207_v43, %v3507_v3  ;;  %v3552_v27 = vpack.c.bf16 %v3543_v24, %v3540_v47 }
 0x718   : > { %v3545_v58 = vsel %vm3520_vm1, %v3508_v39, %v3533_v5  ;;  %v3612_v39 = vld [vmem:[%s6293_s11 + $0x18] sm:$0xff] }
 0x719   : > { %v3544_v7 = vsel %vm3519_vm2, %v3507_v3, %v3532_v60  ;;  %v3554_v6 = vpack.c.bf16 %v3545_v58, %v3542_v53 }
 0x71a   : > { %v3553_v59 = vpack.c.bf16 %v3544_v7, %v3541_v42  ;;  %v3154_v52 = vpop.permute.xlu0 %3153  ;;  %v3152_v15 = vpop.permute.xlu1 %3151  ;;  %v3956_v7 = vld [vmem:[%s6292_s10] sm:$0xff]  }
 0x71b   : > { %3568 = vrot.lane.b32.xlu0 %v3554_v6, %s4013_s25  ;;  %v3167_v46 = vsel %vm3161_vm11, %v3152_v15, %v3154_v52  ;;  %v3190_v54 = vadd.f32 %v3154_v52, %v6186_v13  ;;  %v3166_v23 = vsel %vm3161_vm11, %v3150_v29, %v3152_v15  ;;  %v6382_v6 = vmov 0  }
 0x71c   : > { %3566 = vrot.lane.b32.xlu1 %v3553_v59, %s4013_s25  ;;  %v3189_v63 = vadd.f32 %v3167_v46, %v6177_v0  ;;  %v3188_v44 = vadd.f32 %v3166_v23, %v6174_v35  ;;  %v3957_v59 = vld [vmem:[%s6292_s10 + $0x8] sm:$0xff]  }
 0x720   : > { %3564 = vrot.lane.b32.xlu1 %v3552_v27, %s4013_s25 }
 0x725   : > { %v3156_v45 = vpop.permute.xlu0 %3155 }
 0x733   : > { %v3160_v36 = vpop.permute.xlu0 %3159 }
 0x734   : > { %v3158_v32 = vpop.permute.xlu1 %3157  ;;  %v3193_v40 = vadd.f32 %v3160_v36, %v6191_v1 }
 0x735   : > { %v3169_v34 = vsel %vm3161_vm11, %v3158_v32, %v3160_v36  ;;  %v3168_v22 = vsel %vm3161_vm11, %v3156_v45, %v3158_v32 }
 0x736   : > { %v3192_v13 = vadd.f32 %v3169_v34, %v6193_v12  ;;  %v3191_v16 = vadd.f32 %v3168_v22, %v6151_v57 }
 0x737   : > { %v3475_v48 = vpop.permute.xlu0 %3474 }
 0x738   : > { %v3511_v19 = vadd.f32 %v3475_v48, %v3190_v54  ;;  %v3473_v14 = vpop.permute.xlu1 %3472 }
 0x739   : > { %v3488_v21 = vsel %vm3482_vm12, %v3473_v14, %v3475_v48 }
 0x73a   : > { %v3510_v20 = vadd.f32 %v3488_v21, %v3189_v63  ;;  %v3536_v38 = vmul.f32 %v6207_v43, %v3511_v19  ;;  %vm3523_vm3 = vcmp.gt.f32.partialorder %v3511_v19, 0.0 }
 0x73b   : > { %v3481_v9 = vpop.permute.xlu0 %3480 }
 0x73c   : > { %v3514_v0 = vadd.f32 %v3481_v9, %v3193_v40  ;;  %v3479_v26 = vpop.permute.xlu1 %3478  ;;  %v3535_v2 = vmul.f32 %v6207_v43, %v3510_v20  ;;  %v3548_v4 = vsel %vm3523_vm3, %v3511_v19, %v3536_v38  ;;  %vm3522_vm7 = vcmp.gt.f32.partialorder %v3510_v20, 0.0 }
 0x73d   : > { %v3490_v31 = vsel %vm3482_vm12, %v3479_v26, %v3481_v9 }
 0x73e   : > { %vm3526_vm6 = vcmp.gt.f32.partialorder %v3514_v0, 0.0  ;;  %v3539_v1 = vmul.f32 %v6207_v43, %v3514_v0  ;;  %v3513_v18 = vadd.f32 %v3490_v31, %v3192_v13  ;;  %v3547_v62 = vsel %vm3522_vm7, %v3510_v20, %v3535_v2 }
 0x73f   : > { %v3477_v49 = vpop.permute.xlu0 %3476 }
 0x740   : > { %v3551_v37 = vsel %vm3526_vm6, %v3514_v0, %v3539_v1  ;;  %vm3525_vm8 = vcmp.gt.f32.partialorder %v3513_v18, 0.0  ;;  %v3538_v12 = vmul.f32 %v6207_v43, %v3513_v18  ;;  %v3489_v30 = vsel %vm3482_vm12, %v3477_v49, %v3479_v26  ;;  %v3471_v56 = vpop.permute.xlu1 %3470 }
 0x741   : > { %v3557_v41 = vpack.c.bf16 %v3551_v37, %v3548_v4  ;;  %v3512_v10 = vadd.f32 %v3489_v30, %v3191_v16  ;;  %v3487_v55 = vsel %vm3482_vm12, %v3471_v56, %v3473_v14 }
 0x742   : > { %v3550_v17 = vsel %vm3525_vm8, %v3513_v18, %v3538_v12  ;;  %v3509_v50 = vadd.f32 %v3487_v55, %v3188_v44 }
 0x743   : > { %vm3524_vm9 = vcmp.gt.f32.partialorder %v3512_v10, 0.0  ;;  %v3537_v57 = vmul.f32 %v6207_v43, %v3512_v10  ;;  %3574 = vrot.lane.b32.xlu1 %v3557_v41, %s4013_s25  ;;  %v3556_v35 = vpack.c.bf16 %v3550_v17, %v3547_v62 }
 0x744   : > { %vm3521_vm4 = vcmp.gt.f32.partialorder %v3509_v50, 0.0  ;;  %v3534_v33 = vmul.f32 %v6207_v43, %v3509_v50  ;;  %v3610_v43 = vld [vmem:[%s6293_s11 + $0x8] sm:$0xff] }
 0x745   : > { %v3549_v8 = vsel %vm3524_vm9, %v3512_v10, %v3537_v57  ;;  %3572 = vrot.lane.b32.xlu0 %v3556_v35, %s4013_s25 }
 0x746   : > { %v3546_v51 = vsel %vm3521_vm4, %v3509_v50, %v3534_v33 }
 0x747   : > { %3615 = vperm.xlu1 %3951, %v3609_v28   ;;  %v3555_v61 = vpack.c.bf16 %v3549_v8, %v3546_v51 }
 0x749   : > { %3570 = vrot.lane.b32.xlu0 %v3555_v61, %s4013_s25  ;;  %s6269_s25 = scalar_lea.vmem %s6294_s12, %s3827_s19 }
 0x74b   : > { %3625 = vperm.xlu1 %3951, %v3611_v11  }
 0x74d   : > { %3620 = vperm.xlu0 %3950, %v3610_v43  }
 0x751   : > { %3630 = vperm.xlu0 %3950, %v3612_v39  }
 0x78d   : > { %v3569_v25 = vpop.permute.xlu0 %3568 }
 0x78e   : > { %v3567_v3 = vpop.permute.xlu1 %3566 }
 0x78f   : > { %v3578_v47 = vsel %vm3576_vm10, %v3567_v3, %v3569_v25 }
 0x790   : > { %3657 = vmatprep.subr.bf16.mxu0 %v3578_v47 }
 0x792   : > { %v3565_v24 = vpop.permute.xlu1 %3564 }
 0x793   : > { %v3577_v5 = vsel %vm3576_vm10, %v3565_v24, %v3567_v3 }
 0x794   : > { %3658 = vmatpush1.bf16.msra.mxu0 %v3577_v5 }
 0x7b5   : > { %v3575_v60 = vpop.permute.xlu1 %3574 }
 0x7b7   : > { %v3573_v27 = vpop.permute.xlu0 %3572 }
 0x7b8   : > { %v3580_v53 = vsel %vm3576_vm10, %v3573_v27, %v3575_v60 }
 0x7b9   : > { %3659 = vmatprep.subr.bf16.mxu0 %v3580_v53 }
 0x7bb   : > { %v3571_v58 = vpop.permute.xlu0 %3570 }
 0x7bc   : > { %v3579_v42 = vsel %vm3576_vm10, %v3571_v58, %v3573_v27 }
 0x7bd   : > { %3660 = vmatpush1.bf16.msra.mxu0 %v3579_v42 }
 0x7c0   : > { %3678 = vmatmul.mubr.bf16.vlgmr.msra.gmra.mrb[0].mxu0 %v3956_v7 }
 0x7c1   : > { %3687 = vmatprep.mubr.bf16.mxu0 %v6382_v6 }
 0x7c6   : > { %v3616_v52 = vpop.permute.xlu1 %3615 }
 0x7c8   : > { %3688 = vmatmul.mubr.bf16.gmra.mrb[4].mxu0 %v3957_v59 }
 0x7ca   : > { %v3626_v38 = vpop.permute.xlu1 %3625 }
 0x7cc   : > { %v3621_v36 = vpop.permute.xlu0 %3620 }
 0x7d0   : > { %v3631_v26 = vpop.permute.xlu0 %3630 }
 0x893   : > { %v3679_v29 = vpop.f32.mrb[0].mxu0 }
 0x894   : > { %v3680_v45 = vadd.f32 %v3679_v29, %v3616_v52  ;;  %v3681_v15 = vpop.f32.mrb[1].mxu0 }
 0x895   : > { %v3682_v32 = vadd.f32 %v3681_v15, %v3616_v52  ;;  %v3683_v46 = vpop.f32.mrb[2].mxu0 }
 0x896   : > { %vm3698_vm5 = vcmp.gt.f32.partialorder %v3680_v45, 0.0  ;;  %v3706_v54 = vmul.f32 0.01, %v3680_v45  ;;  %v3684_v48 = vadd.f32 %v3683_v46, %v3621_v36  ;;  %v3685_v63 = vpop.f32.mrb[3].mxu0 }
 0x897   : > { %vm3699_vm11 = vcmp.gt.f32.partialorder %v3682_v32, 0.0  ;;  %v3707_v19 = vmul.f32 0.01, %v3682_v32  ;;  %v3686_v14 = vadd.f32 %v3685_v63, %v3621_v36 }
 0x898   : > { %v3714_v34 = vsel %vm3698_vm5, %v3680_v45, %v3706_v54  ;;  %vm3700_vm12 = vcmp.gt.f32.partialorder %v3684_v48, 0.0  ;;  %v3708_v21 = vmul.f32 0.01, %v3684_v48 }
 0x899   : > { %3722 = vst [vmem:[%s6269_s25] sm:$0xff] %v3714_v34  ;;  %v3715_v40 = vsel %vm3699_vm11, %v3682_v32, %v3707_v19  ;;  %vm3701_vm13 = vcmp.gt.f32.partialorder %v3686_v14, 0.0  ;;  %v3709_v20 = vmul.f32 0.01, %v3686_v14 }
 0x89a   : > { %3723 = vst [vmem:[%s6269_s25 + $0x8] sm:$0xff] %v3715_v40  ;;  %v3716_v23 = vsel %vm3700_vm12, %v3684_v48, %v3708_v21 }
 0x89b   : > { %3724 = vst [vmem:[%s6269_s25 + $0x10] sm:$0xff] %v3716_v23  ;;  %v3717_v9 = vsel %vm3701_vm13, %v3686_v14, %v3709_v20  ;;  %v3689_v22 = vpop.f32.mrb[4].mxu0 }
 0x89c   : > { %3725 = vst [vmem:[%s6269_s25 + $0x18] sm:$0xff] %v3717_v9  ;;  %v3690_v13 = vadd.f32 %v3689_v22, %v3626_v38  ;;  %v3691_v0 = vpop.f32.mrb[5].mxu0 }
 0x89d   : > { %v3692_v31 = vadd.f32 %v3691_v0, %v3626_v38  ;;  %v3693_v2 = vpop.f32.mrb[6].mxu0 }
 0x89e   : > { %vm3702_vm14 = vcmp.gt.f32.partialorder %v3690_v13, 0.0  ;;  %v3710_v1 = vmul.f32 0.01, %v3690_v13  ;;  %v3694_v18 = vadd.f32 %v3693_v2, %v3631_v26  ;;  %v3695_v44 = vpop.f32.mrb[7].mxu0 }
 0x89f   : > { %vm3703_vm0 = vcmp.gt.f32.partialorder %v3692_v31, 0.0  ;;  %v3711_v16 = vmul.f32 0.01, %v3692_v31  ;;  %v3696_v4 = vadd.f32 %v3695_v44, %v3631_v26 }
 0x8a0   : > { %v3718_v49 = vsel %vm3702_vm14, %v3690_v13, %v3710_v1  ;;  %vm3704_vm15 = vcmp.gt.f32.partialorder %v3694_v18, 0.0  ;;  %v3712_v37 = vmul.f32 0.01, %v3694_v18 }
 0x8a1   : > { %3726 = vst [vmem:[%s6269_s25 + $0x20] sm:$0xff] %v3718_v49  ;;  %v3719_v12 = vsel %vm3703_vm0, %v3692_v31, %v3711_v16  ;;  %vm3705_vm1 = vcmp.gt.f32.partialorder %v3696_v4, 0.0  ;;  %v3713_v30 = vmul.f32 0.01, %v3696_v4 }
 0x8a2   : > { %3727 = vst [vmem:[%s6269_s25 + $0x28] sm:$0xff] %v3719_v12  ;;  %v3720_v56 = vsel %vm3704_vm15, %v3694_v18, %v3712_v37 }
 0x8a3   : > { %3728 = vst [vmem:[%s6269_s25 + $0x30] sm:$0xff] %v3720_v56  ;;  %v3721_v41 = vsel %vm3705_vm1, %v3696_v4, %v3713_v30 }
 0x8a4   : > { %3729 = vst [vmem:[%s6269_s25 + $0x38] sm:$0xff] %v3721_v41 }
 0x8a5 PF: > { %s23_s21 = sadd.s32 1, %s3983_s21  }
 0x8a6   : > { %p20_p1 = scmp.ge.s32.totalorder %s23_s21, 4  }
 0x8a8   :  { %22 = sbr.rel (!%p20_p1) target bundleno = 1 (0x1), region = 108 }
 0x8af   :  { %3751 = vsyncpa [#allocation5], 1 }
 0x8b0   :  { %3753 = vsyncpa [#allocation5 + $0x1], 1 }

</bundles_post_ra>
